<compile_context>
chip_gen: v7x
topology: tpu7x:2x2x1
jax: 0.10.0
libtpu: 0.0.40
codegen_flags: <defaults>
</compile_context>

<pallas_src>
import functools
import math

import jax
import jax.numpy as jnp
from jax.experimental import pallas as pl
from jax.experimental.pallas import tpu as pltpu


def _pick_q_tile(n, cap):
    """Whole sequence if it fits under the cap; else the largest divisor of n
    that is <= cap and a multiple of 8 (f32 sublane); else fall back to n."""
    if n <= cap:
        return n
    for t in range(min(cap, n), 0, -1):
        if n % t == 0 and t % 8 == 0:
            return t
    return n


# ---------------------------------------------------------------------------
# Shared attention math (runs on VMEM-resident values inside the kernel).
# ---------------------------------------------------------------------------
def _attention_math(xq, xf, wqkv_ref, wp_ref, bp_ref, *, num_heads, head_dim,
                    fused_proj):
    """xq: (TQ, C) bf16 query rows; xf: (N, C) bf16 full rows (kv source).

    wqkv_ref: (C, 3C) bf16 = [Wq*scale | Wk | Wv]; wp_ref: (C, C) bf16;
    bp_ref: (1, C) f32.  Returns the (TQ, C) f32 projected output.
    """
    H, hd = num_heads, head_dim
    C = H * hd
    TQ = xq.shape[0]
    N = xf.shape[0]

    if fused_proj:
        # xq is xf: one (N, C) x (C, 3C) matmul (3x MXU column utilization vs
        # three C-wide matmuls).  Scale is already folded into the q columns.
        qkv = jnp.dot(xf, wqkv_ref[...], preferred_element_type=jnp.float32)
        q2d = qkv[:, :C]
        k2d = qkv[:, C:2 * C]
        v2d = qkv[:, 2 * C:]
    else:
        # q from the query tile, k/v from the full sequence.
        q2d = jnp.dot(xq, wqkv_ref[:, :C], preferred_element_type=jnp.float32)
        kv2d = jnp.dot(xf, wqkv_ref[:, C:], preferred_element_type=jnp.float32)
        k2d = kv2d[:, :C]
        v2d = kv2d[:, C:]

    # Head split: one relayout each, once per grid step (no kv loop).
    # bf16 operands for the MXU; accumulation stays f32.
    q = q2d.reshape(TQ, H, hd).transpose(1, 0, 2).astype(jnp.bfloat16)  # (H,TQ,hd)
    k = k2d.reshape(N, H, hd).transpose(1, 0, 2).astype(jnp.bfloat16)   # (H,N,hd)
    v = v2d.reshape(N, H, hd).transpose(1, 0, 2).astype(jnp.bfloat16)   # (H,N,hd)

    # Scores + single-pass softmax (whole kv range resident -> no online
    # softmax rescaling).  Softmax math in f32 (v5e has no bf16 EUP/VPU).
    s = jnp.einsum('hqd,hkd->hqk', q, k,
                   preferred_element_type=jnp.float32)                  # (H,TQ,N)
    m = jnp.max(s, axis=-1, keepdims=True)
    p = jnp.exp(s - m)                                                  # f32 EUP
    l = jnp.sum(p, axis=-1, keepdims=True)                              # (H,TQ,1)

    ctx = jnp.einsum('hqk,hkd->hqd', p.astype(jnp.bfloat16), v,
                     preferred_element_type=jnp.float32)                # (H,TQ,hd)
    # Normalize the small (H,TQ,hd) context (EUP reciprocal), not the big
    # (H,TQ,N) probability matrix.
    ctx = ctx * pl.reciprocal(l, approx=True)

    # Merge heads and fuse the output projection + bias.
    ctx = ctx.transpose(1, 0, 2).reshape(TQ, C).astype(jnp.bfloat16)    # (TQ,C)
    out = jnp.dot(ctx, wp_ref[...], preferred_element_type=jnp.float32)
    return out + bp_ref[...]


# ---------------------------------------------------------------------------
# Kernel bodies.
# ---------------------------------------------------------------------------
def _attn_kernel_fast(x_ref, wqkv_ref, wp_ref, bp_ref, o_ref, *, num_heads,
                      head_dim):
    """Fast path: one grid step per batch element, whole sequence in VMEM."""
    x = x_ref[0].astype(jnp.bfloat16)                                   # (N, C)
    out = _attention_math(x, x, wqkv_ref, wp_ref, bp_ref,
                          num_heads=num_heads, head_dim=head_dim,
                          fused_proj=True)
    o_ref[0] = out.astype(o_ref.dtype)


def _attn_kernel_tiled(xq_ref, xf_ref, wqkv_ref, wp_ref, bp_ref, o_ref, *,
                       num_heads, head_dim):
    """General path: q tiled over the sequence, full-N kv per step."""
    xq = xq_ref[0].astype(jnp.bfloat16)                                 # (TQ, C)
    xf = xf_ref[0].astype(jnp.bfloat16)                                 # (N, C)
    out = _attention_math(xq, xf, wqkv_ref, wp_ref, bp_ref,
                          num_heads=num_heads, head_dim=head_dim,
                          fused_proj=False)
    o_ref[0] = out.astype(o_ref.dtype)


# ---------------------------------------------------------------------------
# Wrapper.
# ---------------------------------------------------------------------------
@functools.partial(jax.jit, static_argnames=("num_heads", "q_tile"))
def attention_pallas(x, wq, wkv, wproj, bproj, *, num_heads, q_tile=256):
    """Forward pass of InMo Attention (sr_ratio=1, qkv_bias=False).

    x: (B, N, C); weights stored as (in, out) so y = x @ W (+ bias), which is
    equivalent to torch.nn.Linear's x @ W.T + b.  Callers running in bf16
    should pass x as bf16 (halves the kernel's input HBM bytes); the kernel
    casts to bf16 internally either way.
    """
    B, N, C = x.shape
    assert C % num_heads == 0
    hd = C // num_heads
    scale = hd ** -0.5

    # One-time weight prep (constant-folds under jit when weights are static):
    #  - softmax scale folded into the q columns,
    #  - [Wq*scale | Wk | Wv] concatenated -> single (C, 3C) bf16 MXU operand,
    #  - kv column split matches kv.reshape(B,N,2,H,hd): [:, :C]=k, [:, C:]=v.
    wqkv_f = jnp.concatenate([wq * scale, wkv], axis=1).astype(jnp.bfloat16)
    wp_b = wproj.astype(jnp.bfloat16)
    bp = bproj.reshape(1, C).astype(jnp.float32)

    # 32 MiB scoped VMEM: raises v5e's 16 MiB default, matches v6e/v7x default,
    # comfortably below physical on every listed generation.
    vmem_limit = 32 * 1024 * 1024

    TQ = _pick_q_tile(N, q_tile)
    if TQ == N:
        # ---- Fast path: grid over batch only, everything fused -------------
        kernel = functools.partial(_attn_kernel_fast,
                                   num_heads=num_heads, head_dim=hd)
        out = pl.pallas_call(
            kernel,
            out_shape=jax.ShapeDtypeStruct((B, N, C), x.dtype),
            grid=(B,),
            in_specs=[
                pl.BlockSpec((1, N, C), lambda b: (b, 0, 0)),      # x
                pl.BlockSpec((C, 3 * C), lambda b: (0, 0)),        # [Wq*s|Wk|Wv]
                pl.BlockSpec((C, C), lambda b: (0, 0)),            # Wproj
                pl.BlockSpec((1, C), lambda b: (0, 0)),            # bias
            ],
            out_specs=pl.BlockSpec((1, N, C), lambda b: (b, 0, 0)),
            compiler_params=pltpu.CompilerParams(
                dimension_semantics=("parallel",),
                vmem_limit_bytes=vmem_limit),
        )(x, wqkv_f, wp_b, bp)
    else:
        # ---- General path: q tiled; kv recomputed from the full-N x block
        # (the full-N block index is constant over qi, so it is DMAed once per
        # batch element by the pipeline).
        nq = N // TQ
        kernel = functools.partial(_attn_kernel_tiled,
                                   num_heads=num_heads, head_dim=hd)
        out = pl.pallas_call(
            kernel,
            out_shape=jax.ShapeDtypeStruct((B, N, C), x.dtype),
            grid=(B, nq),
            in_specs=[
                pl.BlockSpec((1, TQ, C), lambda b, qi: (b, qi, 0)),  # x q-tile
                pl.BlockSpec((1, N, C), lambda b, qi: (b, 0, 0)),    # x full (kv)
                pl.BlockSpec((C, 3 * C), lambda b, qi: (0, 0)),
                pl.BlockSpec((C, C), lambda b, qi: (0, 0)),
                pl.BlockSpec((1, C), lambda b, qi: (0, 0)),
            ],
            out_specs=pl.BlockSpec((1, TQ, C), lambda b, qi: (b, qi, 0)),
            compiler_params=pltpu.CompilerParams(
                dimension_semantics=("parallel", "parallel"),
                vmem_limit_bytes=vmem_limit),
        )(x, x, wqkv_f, wp_b, bp)
    return out


def attention_reference(x, wq, wkv, wproj, bproj, *, num_heads):
    """Pure-JAX f32 reference mirroring the PyTorch forward (sr_ratio=1)."""
    B, N, C = x.shape
    hd = C // num_heads
    scale = hd ** -0.5
    q = x @ wq
    kv = x @ wkv
    q = q.reshape(B, N, num_heads, hd).transpose(0, 2, 1, 3)          # (B,H,N,hd)
    kv = kv.reshape(B, N, 2, num_heads, hd).transpose(2, 0, 3, 1, 4)  # (2,B,H,N,hd)
    k, v = kv[0], kv[1]
    attn = jnp.einsum('bhnd,bhmd->bhnm', q, k) * scale
    attn = jax.nn.softmax(attn, axis=-1)
    out = jnp.einsum('bhnm,bhmd->bhnd', attn, v)
    out = out.transpose(0, 2, 1, 3).reshape(B, N, C)
    return out @ wproj + bproj.reshape(C)


if __name__ == "__main__":
    # Small deterministic config consistent with the module:
    # dim=32 divisible by num_heads=4; N=64 tokens (H=W=8 spatial), B=2.
    B, N, C = 2, 64, 32
    num_heads = 4

    key = jax.random.PRNGKey(0)
    kx, kq, kkv, kp, kb = jax.random.split(key, 5)
    s = 1.0 / math.sqrt(C)
    x = jax.random.normal(kx, (B, N, C), dtype=jnp.float32)
    wq = jax.random.uniform(kq, (C, C), jnp.float32, -s, s)
    wkv = jax.random.uniform(kkv, (C, 2 * C), jnp.float32, -s, s)
    wproj = jax.random.uniform(kp, (C, C), jnp.float32, -s, s)
    bproj = jax.random.uniform(kb, (C,), jnp.float32, -s, s)

    ref = attention_reference(x, wq, wkv, wproj, bproj, num_heads=num_heads)

    # Fast path (TQ == N): single fused kernel, one grid step per batch elem.
    out = attention_pallas(x, wq, wkv, wproj, bproj, num_heads=num_heads)
    out = jax.block_until_ready(out)
    err = float(jnp.max(jnp.abs(out - ref)))
    # bf16 MXU operands with f32 accumulation -> ~1e-2-level deviation vs f32.
    assert err < 5e-2, f"fast path mismatch vs reference: max abs err {err}"

    # Tiled path (force TQ < N) to exercise the general code path as well.
    out_t = attention_pallas(x, wq, wkv, wproj, bproj, num_heads=num_heads,
                             q_tile=16)
    out_t = jax.block_until_ready(out_t)
    err_t = float(jnp.max(jnp.abs(out_t - ref)))
    assert err_t < 5e-2, f"tiled path mismatch vs reference: max abs err {err_t}"

    print("KERNEL_OK")
</pallas_src>

<mosaic_0001>
module attributes {stable_mosaic.version = 11 : i64} {
  func.func @_attn_kernel_fast(%arg0: i32, %arg1: memref<1x64x32xf32, #tpu.memory_space<vmem>>, %arg2: memref<32x96xbf16, #tpu.memory_space<vmem>>, %arg3: memref<32x32xbf16, #tpu.memory_space<vmem>>, %arg4: memref<1x32xf32, #tpu.memory_space<vmem>>, %arg5: memref<1x64x32xf32, #tpu.memory_space<vmem>>) attributes {dimension_semantics = [#tpu.dimension_semantics<parallel>], iteration_bounds = array<i64: 2>, scalar_prefetch = 0 : i64, scratch_operands = 0 : i64, tpu.core_type = #tpu.core_type<tc>, window_params = [{transform_indices = @transform_0, window_bounds = array<i64: 1, 64, 32>}, {pipeline_mode = #tpu.pipeline_mode<synchronous>, transform_indices = @transform_1, window_bounds = array<i64: 32, 96>}, {pipeline_mode = #tpu.pipeline_mode<synchronous>, transform_indices = @transform_2, window_bounds = array<i64: 32, 32>}, {pipeline_mode = #tpu.pipeline_mode<synchronous>, transform_indices = @transform_3, window_bounds = array<i64: 1, 32>}, {transform_indices = @transform_4, window_bounds = array<i64: 1, 64, 32>}]} {
    %c0 = arith.constant 0 : index
    %c0_0 = arith.constant 0 : index
    %c0_1 = arith.constant 0 : index
    %0 = vector.load %arg1[%c0, %c0_0, %c0_1] : memref<1x64x32xf32, #tpu.memory_space<vmem>>, vector<1x64x32xf32>
    %1 = vector.shape_cast %0 : vector<1x64x32xf32> to vector<64x32xf32>
    %2 = arith.truncf %1 : vector<64x32xf32> to vector<64x32xbf16>
    %c0_2 = arith.constant 0 : index
    %c0_3 = arith.constant 0 : index
    %3 = vector.load %arg2[%c0_2, %c0_3] : memref<32x96xbf16, #tpu.memory_space<vmem>>, vector<32x96xbf16>
    %cst = arith.constant dense<0.000000e+00> : vector<64x96xf32>
    %4 = tpu.matmul %2, %3, %cst {dimension_numbers = #tpu.dot_dimension_numbers<[1], [0], [0], [1], [0, 0, 1, 1], [], []>} : vector<64x32xbf16>, vector<32x96xbf16>, vector<64x96xf32> -> vector<64x96xf32>
    %5 = vector.extract_strided_slice %4 {offsets = [0, 0], sizes = [64, 32], strides = [1, 1]} : vector<64x96xf32> to vector<64x32xf32>
    %6 = vector.extract_strided_slice %4 {offsets = [0, 32], sizes = [64, 32], strides = [1, 1]} : vector<64x96xf32> to vector<64x32xf32>
    %7 = vector.extract_strided_slice %4 {offsets = [0, 64], sizes = [64, 32], strides = [1, 1]} : vector<64x96xf32> to vector<64x32xf32>
    %8 = vector.shape_cast %5 : vector<64x32xf32> to vector<64x4x8xf32>
    %9 = tpu.transpose %8, [1, 0, 2] : vector<64x4x8xf32> -> vector<4x64x8xf32>
    %10 = arith.truncf %9 : vector<4x64x8xf32> to vector<4x64x8xbf16>
    %11 = vector.shape_cast %6 : vector<64x32xf32> to vector<64x4x8xf32>
    %12 = tpu.transpose %11, [1, 0, 2] : vector<64x4x8xf32> -> vector<4x64x8xf32>
    %13 = arith.truncf %12 : vector<4x64x8xf32> to vector<4x64x8xbf16>
    %14 = vector.shape_cast %7 : vector<64x32xf32> to vector<64x4x8xf32>
    %15 = tpu.transpose %14, [1, 0, 2] : vector<64x4x8xf32> -> vector<4x64x8xf32>
    %16 = arith.truncf %15 : vector<4x64x8xf32> to vector<4x64x8xbf16>
    "tpu.trace_start"() <{level = 10 : i32, message = "hqd,hkd->hqk"}> : () -> ()
    %cst_4 = arith.constant dense<0.000000e+00> : vector<4x64x64xf32>
    %17 = tpu.matmul %10, %13, %cst_4 {dimension_numbers = #tpu.dot_dimension_numbers<[2], [2], [1], [1], [0, 0, 0, 1, 1, 1], [0], [0]>} : vector<4x64x8xbf16>, vector<4x64x8xbf16>, vector<4x64x64xf32> -> vector<4x64x64xf32>
    "tpu.trace_stop"() : () -> ()
    %cst_5 = arith.constant dense<0xFF800000> : vector<4x64xf32>
    %18 = vector.multi_reduction <maximumf>, %17, %cst_5 [2] : vector<4x64x64xf32> to vector<4x64xf32>
    %19 = vector.shape_cast %18 : vector<4x64xf32> to vector<4x64x1xf32>
    %20 = vector.broadcast %19 : vector<4x64x1xf32> to vector<4x64x64xf32>
    %21 = arith.subf %17, %20 : vector<4x64x64xf32>
    %22 = math.exp %21 : vector<4x64x64xf32>
    %cst_6 = arith.constant dense<0.000000e+00> : vector<4x64xf32>
    %23 = vector.multi_reduction <add>, %22, %cst_6 [2] : vector<4x64x64xf32> to vector<4x64xf32>
    %24 = vector.shape_cast %23 : vector<4x64xf32> to vector<4x64x1xf32>
    %25 = arith.truncf %22 : vector<4x64x64xf32> to vector<4x64x64xbf16>
    "tpu.trace_start"() <{level = 10 : i32, message = "hqk,hkd->hqd"}> : () -> ()
    %cst_7 = arith.constant dense<0.000000e+00> : vector<4x64x8xf32>
    %26 = tpu.matmul %25, %16, %cst_7 {dimension_numbers = #tpu.dot_dimension_numbers<[2], [1], [1], [2], [0, 0, 0, 1, 1, 2], [0], [0]>} : vector<4x64x64xbf16>, vector<4x64x8xbf16>, vector<4x64x8xf32> -> vector<4x64x8xf32>
    "tpu.trace_stop"() : () -> ()
    %27 = tpu.reciprocal %24 {approx = true} : vector<4x64x1xf32> -> vector<4x64x1xf32>
    %28 = vector.broadcast %27 : vector<4x64x1xf32> to vector<4x64x8xf32>
    %29 = arith.mulf %26, %28 : vector<4x64x8xf32>
    %30 = tpu.transpose %29, [1, 0, 2] : vector<4x64x8xf32> -> vector<64x4x8xf32>
    %31 = vector.shape_cast %30 : vector<64x4x8xf32> to vector<64x32xf32>
    %32 = arith.truncf %31 : vector<64x32xf32> to vector<64x32xbf16>
    %c0_8 = arith.constant 0 : index
    %c0_9 = arith.constant 0 : index
    %33 = vector.load %arg3[%c0_8, %c0_9] : memref<32x32xbf16, #tpu.memory_space<vmem>>, vector<32x32xbf16>
    %cst_10 = arith.constant dense<0.000000e+00> : vector<64x32xf32>
    %34 = tpu.matmul %32, %33, %cst_10 {dimension_numbers = #tpu.dot_dimension_numbers<[1], [0], [0], [1], [0, 0, 1, 1], [], []>} : vector<64x32xbf16>, vector<32x32xbf16>, vector<64x32xf32> -> vector<64x32xf32>
    %c0_11 = arith.constant 0 : index
    %c0_12 = arith.constant 0 : index
    %35 = vector.load %arg4[%c0_11, %c0_12] : memref<1x32xf32, #tpu.memory_space<vmem>>, vector<1x32xf32>
    %36 = vector.broadcast %35 : vector<1x32xf32> to vector<64x32xf32>
    %37 = arith.addf %34, %36 : vector<64x32xf32>
    %c0_13 = arith.constant 0 : index
    %c0_14 = arith.constant 0 : index
    %c0_15 = arith.constant 0 : index
    %38 = vector.load %arg5[%c0_13, %c0_14, %c0_15] : memref<1x64x32xf32, #tpu.memory_space<vmem>>, vector<1x64x32xf32>
    %39 = vector.shape_cast %38 : vector<1x64x32xf32> to vector<64x32xf32>
    %40 = vector.shape_cast %37 : vector<64x32xf32> to vector<1x64x32xf32>
    tpu.vector_store %arg5[%c0_13, %c0_14, %c0_15], %40 {strides = array<i32>} : memref<1x64x32xf32, #tpu.memory_space<vmem>>, vector<1x64x32xf32>,
    return
  }
  func.func @transform_0(%arg0: i32) -> (i32, i32, i32) {
    %c0_i32 = arith.constant 0 : i32
    %c0_i32_0 = arith.constant 0 : i32
    %c0_i32_1 = arith.constant 0 : i32
    return %arg0, %c0_i32, %c0_i32_0 : i32, i32, i32
  }
  func.func @transform_1(%arg0: i32) -> (i32, i32) {
    %c0_i32 = arith.constant 0 : i32
    %c0_i32_0 = arith.constant 0 : i32
    %c0_i32_1 = arith.constant 0 : i32
    return %c0_i32, %c0_i32_0 : i32, i32
  }
  func.func @transform_2(%arg0: i32) -> (i32, i32) {
    %c0_i32 = arith.constant 0 : i32
    %c0_i32_0 = arith.constant 0 : i32
    %c0_i32_1 = arith.constant 0 : i32
    return %c0_i32, %c0_i32_0 : i32, i32
  }
  func.func @transform_3(%arg0: i32) -> (i32, i32) {
    %c0_i32 = arith.constant 0 : i32
    %c0_i32_0 = arith.constant 0 : i32
    %c0_i32_1 = arith.constant 0 : i32
    return %c0_i32, %c0_i32_0 : i32, i32
  }
  func.func @transform_4(%arg0: i32) -> (i32, i32, i32) {
    %c0_i32 = arith.constant 0 : i32
    %c0_i32_0 = arith.constant 0 : i32
    %c0_i32_1 = arith.constant 0 : i32
    return %arg0, %c0_i32, %c0_i32_0 : i32, i32, i32
  }
}

</mosaic_0001>

<bundles_post_ra>
// kernel: attention_pallas.1
= control target key start
LH: loop header
LB: loop body
LE: loop exit
PB: predicated region body
PF: predicated region fallthrough
CT: control target
= control target key end

     0   :  { %s6919_s15 = smov 0   ;;  %s9181_s0 = inlined_call_operand.vmem [shape: f32[2,64,32], index: 0, kind: input, shape index: {}]   ;;  %s9182_s1 = inlined_call_operand.vmem [shape: bf16[32,96], index: 1, kind: input, shape index: {}]   ;;  %s9183_s2 = inlined_call_operand.vmem [shape: bf16[32,32], index: 2, kind: input, shape index: {}]   ;;  %s9184_s3 = inlined_call_operand.vmem [shape: f32[1,32], index: 3, kind: input, shape index: {}]   ;;  %s9185_s4 = inlined_call_operand.vmem [shape: f32[2,64,32], index: 4, kind: output, shape index: {}]  }
   0x1 LB: > { %s6300_s16 = sadd.s32 4294967295, %s6882_s15   ;;  %p6304_p0 = scmp.ge.s32.totalorder %s6882_s15, 1  ;;  %s6882_s15 = sphi %s6919_s15, %s14_s15  }
   0x2   : > { %p162_p1 = scmp.lt.s32.totalorder %s6882_s15, 3 }
   0x4   : > { %p163_p2 = pnand %p6304_p0, %p162_p1 }
   0x6   : > { %166 = sbr.rel (%p163_p2) target bundleno = 1623 (0x657), region = 36 }
   0xd   : > { %v6744_v0 = vld [vmem:[%s9182_s1] sm:$0xff]   ;;  %p188_p3 = scmp.lt.s32.totalorder %s6300_s16, 1  ;;  %v6745_v1 = vld [vmem:[%s9182_s1 + $0x8] sm:$0xff]   ;;  %vm227_vm0 = vcmask 261120   ;;  %s6884_s25 = smov 120   ;;  %v390_v25 = vlaneseq  ;;  %vm3889_vm1 = vcmask 64512  }
   0xe   : > { %6498 = vmatprep.subr.bf16.mxu0 %v6744_v0  ;;  %s6885_s26 = smov 112   ;;  %s6886_s27 = smov 104   ;;  %v6888_v23 = vmov 1983009808   ;;  %v6889_v27 = vmov 1934713408  }
   0xf   : > { %s9295_s16 = smov (!%p188_p3, %s6300_s16), 1  ;;  %6499 = vmatpush3.bf16.msra.mxu0 %v6744_v0  ;;  %s6887_s28 = smov 96   ;;  %v388_v24 = vunpack.c.l.s4 %v6888_v23  ;;  %v420_v28 = vunpack.c.l.s4 %v6889_v27  ;;  %v391_v31 = vshrl.u32 %v390_v25, 7  ;;  %vm4246_vm2 = vcmask 523264  }
  0x10   : > { %6500 = vmatprep.subr.bf16.mxu0 %v6745_v1  ;;  %s6420_s21 = sshll.u32 %s9295_s16, 6  ;;  %s6890_s29 = smov 64   ;;  %vm6115_vm3 = vcmask 130048   ;;  %vm6124_vm4 = vcmask 195584  }
  0x11   : > { %s192_s24 = scalar_lea.vmem %s9181_s0, %s6420_s21  ;;  %v389_v30 = vunpack.c.0.s8 %v388_v24  ;;  %v421_v33 = vunpack.c.0.s8 %v420_v28  ;;  %s6891_s6 = smov 16  }
  0x12   : > { %v199_v2 = vld [vmem:[%s192_s24] sm:$0xff]  ;;  %v200_v3 = vld [vmem:[%s192_s24 + $0x8] sm:$0xff]  ;;  %v201_v4 = vld [vmem:[%s192_s24 + $0x10] sm:$0xff]  ;;  %s6892_s7 = smov 8   ;;  %s6893_s10 = smov 24  }
  0x13   : > { %6501 = vmatpush3.bf16.msra.mxu0 %v6745_v1  ;;  %v207_v5 = vpack.c.bf16 %v200_v3, %v199_v2  ;;  %v202_v6 = vld [vmem:[%s192_s24 + $0x18] sm:$0xff]  ;;  %v203_v7 = vld [vmem:[%s192_s24 + $0x20] sm:$0xff]  ;;  %v204_v8 = vld [vmem:[%s192_s24 + $0x28] sm:$0xff]  ;;  %v7021_v37 = vsub.s32 %v389_v30, %v391_v31  ;;  %v7035_v43 = vsub.s32 %v421_v33, %v391_v31  ;;  %s197_s17 = scalar_lea.vmem %s9185_s4, %s6420_s21 }
  0x14   : > { %v208_v9 = vpack.c.bf16 %v202_v6, %v201_v4  ;;  %v209_v10 = vpack.c.bf16 %v204_v8, %v203_v7  ;;  %v205_v11 = vld [vmem:[%s192_s24 + $0x30] sm:$0xff]  ;;  %v206_v12 = vld [vmem:[%s192_s24 + $0x38] sm:$0xff] }
  0x15   : > { %6502 = vmatprep.mubr.msk.bf16.mxu0 %vm227_vm0, %v207_v5  ;;  %v210_v13 = vpack.c.bf16 %v206_v12, %v205_v11 }
  0x16   : > { %6503 = vmatmul.mubr.msk.bf16.vlgmr.msra.gmra.mrb[0].mxu0 %vm227_vm0, %v208_v9 }
  0x17   : > { %6506 = vmatprep.mubr.msk.bf16.mxu0 %vm227_vm0, %v209_v10 }
  0x1e   : > { %6507 = vmatmul.mubr.msk.bf16.gmra.mrb[4].mxu0 %vm227_vm0, %v210_v13 }
  0xe9   : > { %v6945_v14 = vpop.f32.mrb[0].mxu0 }
  0xea   : > { %317 = vrot.lane.b32.xlu0 %v6945_v14, %s6884_s25  ;;  %v6948_v15 = vpop.f32.mrb[1].mxu0 }
  0xeb   : > { %337 = vrot.lane.b32.xlu1 %v6948_v15, %s6885_s26  ;;  %v6951_v16 = vpop.f32.mrb[2].mxu0 }
  0xec   : > { %v6953_v17 = vpop.f32.mrb[3].mxu0 }
  0xee   : > { %341 = vrot.lane.b32.xlu0 %v6945_v14, %s6885_s26 }
  0xef   : > { %319 = vrot.lane.b32.xlu1 %v6951_v16, %s6884_s25 }
  0xf1   : > { %v6957_v18 = vpop.f32.mrb[4].mxu0 }
  0xf2   : > { %9209 = vst [vmem:[#allocation2_spill] sm:$0xff] %v6957_v18  ;;  %365 = vrot.lane.b32.xlu0 %v6945_v14, %s6886_s27  ;;  %v6960_v19 = vpop.f32.mrb[5].mxu0 }
  0xf3   : > { %9210 = vst [vmem:[#allocation3_spill] sm:$0xff] %v6960_v19  ;;  %343 = vrot.lane.b32.xlu1 %v6951_v16, %s6885_s26  ;;  %v6963_v20 = vpop.f32.mrb[6].mxu0 }
  0xf4   : > { %9211 = vst [vmem:[#allocation4_spill] sm:$0xff] %v6963_v20  ;;  %v6965_v21 = vpop.f32.mrb[7].mxu0 }
  0xf5   : > { %9212 = vst [vmem:[#allocation5_spill] sm:$0xff] %v6965_v21 }
  0xf6   : > { %313 = vrot.lane.b32.xlu0 %v6948_v15, %s6884_s25 }
  0xf7   : > { %367 = vrot.lane.b32.xlu1 %v6951_v16, %s6886_s27 }
  0xfa   : > { %361 = vrot.lane.b32.xlu0 %v6948_v15, %s6886_s27 }
  0xfb   : > { %339 = vrot.lane.b32.xlu1 %v6953_v17, %s6885_s26 }
  0xfe   : > { %315 = vrot.lane.b32.xlu0 %v6953_v17, %s6884_s25 }
  0xff   : > { %363 = vrot.lane.b32.xlu1 %v6953_v17, %s6886_s27 }
 0x102   : > { %325 = vrot.lane.b32.xlu0 %v6957_v18, %s6884_s25 }
 0x103   : > { %327 = vrot.lane.b32.xlu1 %v6963_v20, %s6884_s25 }
 0x106   : > { %349 = vrot.lane.b32.xlu0 %v6957_v18, %s6885_s26 }
 0x107   : > { %351 = vrot.lane.b32.xlu1 %v6963_v20, %s6885_s26 }
 0x10a   : > { %321 = vrot.lane.b32.xlu0 %v6960_v19, %s6884_s25 }
 0x10b   : > { %323 = vrot.lane.b32.xlu1 %v6965_v21, %s6884_s25 }
 0x10e   : > { %345 = vrot.lane.b32.xlu0 %v6960_v19, %s6885_s26 }
 0x10f   : > { %347 = vrot.lane.b32.xlu1 %v6965_v21, %s6885_s26 }
 0x112   : > { %369 = vrot.lane.b32.xlu0 %v6960_v19, %s6886_s27 }
 0x113   : > { %371 = vrot.lane.b32.xlu1 %v6965_v21, %s6886_s27 }
 0x116   : > { %373 = vrot.lane.b32.xlu0 %v6957_v18, %s6886_s27 }
 0x117   : > { %375 = vrot.lane.b32.xlu1 %v6963_v20, %s6886_s27 }
 0x11a   : > { %1489 = vrot.lane.b32.xlu0 %v6948_v15, %s6887_s28 }
 0x11b   : > { %1491 = vrot.lane.b32.xlu1 %v6953_v17, %s6887_s28 }
 0x11e   : > { %1493 = vrot.lane.b32.xlu0 %v6945_v14, %s6887_s28 }
 0x11f   : > { %1495 = vrot.lane.b32.xlu1 %v6951_v16, %s6887_s28 }
 0x122   : > { %1497 = vrot.lane.b32.xlu0 %v6960_v19, %s6887_s28 }
 0x123   : > { %1503 = vrot.lane.b32.xlu1 %v6963_v20, %s6887_s28 }
 0x126   : > { %1501 = vrot.lane.b32.xlu0 %v6957_v18, %s6887_s28 }
 0x127   : > { %1499 = vrot.lane.b32.xlu1 %v6965_v21, %s6887_s28 }
 0x15c   : > { %v7001_v22 = vpop.permute.xlu0 %317 }
 0x15d   : > { %v7003_v26 = vpop.permute.xlu1 %337  ;;  %1509 = vrot.lane.b32.xlu0 %v7001_v22, %s6887_s28 }
 0x15e   : > { %v385_v41 = vcombine.low %v6948_v15, %v7003_v26  ;;  %v386_v42 = vcombine.high %v6948_v15, %v7003_v26 }
 0x160   : > { %v7007_v29 = vpop.permute.xlu0 %341  ;;  %v393_v56 = vrot.slane %v385_v41, %v7021_v37  ;;  %v400_v57 = vrot.slane %v386_v42, %v7021_v37 }
 0x161   : > { %v7009_v32 = vpop.permute.xlu1 %319  ;;  %1525 = vrot.lane.b32.xlu0 %v7007_v29, %s6887_s28  ;;  %v521_v34 = vcombine.low %v6945_v14, %v7007_v29  ;;  %v522_v35 = vcombine.high %v6945_v14, %v7007_v29 }
 0x162   : > { %9213 = vst [vmem:[#allocation6_spill] sm:$0xff] %v7009_v32  ;;  %1511 = vrot.lane.b32.xlu1 %v7009_v32, %s6887_s28 }
 0x163   : > { %v529_v44 = vrot.slane %v521_v34, %v7021_v37  ;;  %v536_v45 = vrot.slane %v522_v35, %v7021_v37 }
 0x164   : > { %v7019_v36 = vpop.permute.xlu0 %365 }
 0x165   : > { %9214 = vst [vmem:[#allocation7_spill] sm:$0xff] %v7019_v36  ;;  %v537_v38 = vcombine.low %v7001_v22, %v7019_v36  ;;  %v538_v39 = vcombine.high %v7001_v22, %v7019_v36  ;;  %v7027_v40 = vpop.permute.xlu1 %343  ;;  %1541 = vrot.lane.b32.xlu0 %v7019_v36, %s6887_s28 }
 0x166   : > { %9215 = vst [vmem:[#allocation8_spill] sm:$0xff] %v7027_v40  ;;  %1527 = vrot.lane.b32.xlu1 %v7027_v40, %s6887_s28  ;;  %v589_v48 = vcombine.low %v6951_v16, %v7027_v40  ;;  %v590_v49 = vcombine.high %v6951_v16, %v7027_v40 }
 0x167   : > { %v545_v46 = vrot.slane %v537_v38, %v7021_v37  ;;  %v552_v47 = vrot.slane %v538_v39, %v7021_v37 }
 0x168   : > { %v7047_v50 = vpop.permute.xlu0 %313  ;;  %v597_v0 = vrot.slane %v589_v48, %v7021_v37  ;;  %v604_v1 = vrot.slane %v590_v49, %v7021_v37 }
 0x169   : > { %v553_v51 = vcombine.low %v529_v44, %v545_v46  ;;  %v554_v52 = vcombine.high %v529_v44, %v545_v46  ;;  %v569_v53 = vcombine.low %v536_v45, %v552_v47  ;;  %v570_v54 = vcombine.high %v536_v45, %v552_v47  ;;  %v7049_v55 = vpop.permute.xlu1 %367  ;;  %1505 = vrot.lane.b32.xlu0 %v7047_v50, %s6887_s28 }
 0x16a   : > { %9216 = vst [vmem:[#allocation9_spill] sm:$0xff] %v7049_v55  ;;  %v605_v58 = vcombine.low %v7009_v32, %v7049_v55  ;;  %v606_v59 = vcombine.high %v7009_v32, %v7049_v55  ;;  %1543 = vrot.lane.b32.xlu1 %v7049_v55, %s6887_s28 }
 0x16b   : > { %v561_v60 = vrot.slane %v553_v51, %v7035_v43  ;;  %v568_v61 = vrot.slane %v554_v52, %v7035_v43  ;;  %v577_v62 = vrot.slane %v569_v53, %v7035_v43  ;;  %v584_v63 = vrot.slane %v570_v54, %v7035_v43 }
 0x16c   : > { %v613_v2 = vrot.slane %v605_v58, %v7021_v37  ;;  %v620_v3 = vrot.slane %v606_v59, %v7021_v37  ;;  %v7069_v4 = vpop.permute.xlu0 %361 }
 0x16d   : > { %v1065_v5 = vcombine.low %v561_v60, %v568_v61  ;;  %v6319_v6 = vcombine.high %v561_v60, %v568_v61  ;;  %v1081_v7 = vcombine.low %v577_v62, %v584_v63  ;;  %v6320_v8 = vcombine.high %v577_v62, %v584_v63  ;;  %v7071_v9 = vpop.permute.xlu1 %339  ;;  %1521 = vrot.lane.b32.xlu0 %v7003_v26, %s6887_s28 }
 0x16e   : > { %v621_v10 = vcombine.low %v597_v0, %v613_v2  ;;  %v622_v11 = vcombine.high %v597_v0, %v613_v2  ;;  %v637_v12 = vcombine.low %v604_v1, %v620_v3  ;;  %v638_v13 = vcombine.high %v604_v1, %v620_v3 }
 0x16f   : > { %v401_v23 = vcombine.low %v7047_v50, %v7069_v4  ;;  %v402_v24 = vcombine.high %v7047_v50, %v7069_v4  ;;  %v453_v25 = vcombine.low %v6953_v17, %v7071_v9  ;;  %v454_v27 = vcombine.high %v6953_v17, %v7071_v9 }
 0x170   : > { %v7084_v28 = vrot.slane %v621_v10, %v7035_v43  ;;  %v7087_v30 = vrot.slane %v622_v11, %v7035_v43  ;;  %v7090_v31 = vrot.slane %v637_v12, %v7035_v43  ;;  %v7093_v33 = vrot.slane %v638_v13, %v7035_v43  ;;  %v7095_v34 = vpop.permute.xlu0 %315 }
 0x171   : > { %v409_v35 = vrot.slane %v401_v23, %v7021_v37  ;;  %v416_v38 = vrot.slane %v402_v24, %v7021_v37  ;;  %v461_v39 = vrot.slane %v453_v25, %v7021_v37  ;;  %v468_v41 = vrot.slane %v454_v27, %v7021_v37  ;;  %v7101_v42 = vpop.permute.xlu1 %363  ;;  %1537 = vrot.lane.b32.xlu0 %v7069_v4, %s6887_s28 }
 0x172   : > { %1507 = vrot.lane.b32.xlu1 %v7095_v34, %s6887_s28  ;;  %v469_v53 = vcombine.low %v7095_v34, %v7101_v42  ;;  %v470_v54 = vcombine.high %v7095_v34, %v7101_v42  ;;  %v7122_v59 = vrot.slane %v1065_v5, %v7021_v37  ;;  %v7125_v60 = vrot.slane %v6319_v6, %v7021_v37 }
 0x173   : > { %v417_v48 = vcombine.low %v393_v56, %v409_v35  ;;  %v418_v49 = vcombine.high %v393_v56, %v409_v35  ;;  %v433_v51 = vcombine.low %v400_v57, %v416_v38  ;;  %v434_v52 = vcombine.high %v400_v57, %v416_v38 }
 0x174   : > { %v7119_v58 = vpop.permute.xlu0 %325  ;;  %v477_v0 = vrot.slane %v469_v53, %v7021_v37  ;;  %v484_v1 = vrot.slane %v470_v54, %v7021_v37  ;;  %v7140_v2 = vrot.slane %v1081_v7, %v7021_v37  ;;  %v7143_v3 = vrot.slane %v6320_v8, %v7021_v37 }
 0x175   : > { %v7127_v61 = vpop.permute.xlu1 %327  ;;  %1517 = vrot.lane.b32.xlu0 %v7119_v58, %s6887_s28  ;;  %v425_v56 = vrot.slane %v417_v48, %v7035_v43  ;;  %v432_v57 = vrot.slane %v418_v49, %v7035_v43  ;;  %v441_v62 = vrot.slane %v433_v51, %v7035_v43  ;;  %v448_v63 = vrot.slane %v434_v52, %v7035_v43 }
 0x176   : > { %1523 = vrot.lane.b32.xlu1 %v7071_v9, %s6887_s28  ;;  %v485_v12 = vcombine.low %v461_v39, %v477_v0  ;;  %v486_v13 = vcombine.high %v461_v39, %v477_v0  ;;  %v501_v23 = vcombine.low %v468_v41, %v484_v1  ;;  %v502_v24 = vcombine.high %v468_v41, %v484_v1 }
 0x177   : > { %v929_v5 = vcombine.low %v425_v56, %v432_v57  ;;  %v6315_v6 = vcombine.high %v425_v56, %v432_v57  ;;  %v945_v10 = vcombine.low %v441_v62, %v448_v63  ;;  %v6316_v11 = vcombine.high %v441_v62, %v448_v63 }
 0x178   : > { %v7145_v25 = vpop.permute.xlu0 %349  ;;  %v493_v48 = vrot.slane %v485_v12, %v7035_v43  ;;  %v500_v49 = vrot.slane %v486_v13, %v7035_v43  ;;  %v509_v53 = vrot.slane %v501_v23, %v7035_v43  ;;  %v516_v54 = vrot.slane %v502_v24, %v7035_v43 }
 0x179   : > { %v793_v27 = vcombine.low %v6957_v18, %v7145_v25  ;;  %v794_v7 = vcombine.high %v6957_v18, %v7145_v25  ;;  %v7151_v35 = vpop.permute.xlu1 %351  ;;  %v7154_v8 = vrot.slane %v929_v5, %v7021_v37  ;;  %v7157_v38 = vrot.slane %v6315_v6, %v7021_v37 }
 0x17a   : > { %v861_v39 = vcombine.low %v6963_v20, %v7151_v35  ;;  %v862_v41 = vcombine.high %v6963_v20, %v7151_v35  ;;  %1539 = vrot.lane.b32.xlu1 %v7101_v42, %s6887_s28  ;;  %v7184_v63 = vrot.slane %v945_v10, %v7021_v37  ;;  %v7187_v0 = vrot.slane %v6316_v11, %v7021_v37 }
 0x17b   : > { %v7168_v51 = vrot.slane %v793_v27, %v7021_v37  ;;  %v7171_v52 = vrot.slane %v794_v7, %v7021_v37  ;;  %v961_v5 = vcombine.low %v7154_v8, %v7157_v38  ;;  %v997_v12 = vcombine.low %v493_v48, %v500_v49 }
 0x17c   : > { %v7176_v56 = vrot.slane %v861_v39, %v7021_v37  ;;  %v7179_v57 = vrot.slane %v862_v41, %v7021_v37  ;;  %v7181_v62 = vpop.permute.xlu0 %321  ;;  %v6317_v13 = vcombine.high %v493_v48, %v500_v49  ;;  %v977_v10 = vcombine.low %v7184_v63, %v7187_v0 }
 0x17d   : > { %9217 = vst [vmem:[#allocation10_spill] sm:$0xff] %v7181_v62  ;;  %1513 = vrot.lane.b32.xlu0 %v7181_v62, %s6887_s28  ;;  %v7191_v1 = vpop.permute.xlu1 %323  ;;  %v1013_v23 = vcombine.low %v509_v53, %v516_v54  ;;  %v6318_v24 = vcombine.high %v509_v53, %v516_v54  ;;  %v7204_v27 = vrot.slane %v961_v5, %v7035_v43 }
 0x17e   : > { %9218 = vst [vmem:[#allocation11_spill] sm:$0xff] %v7191_v1  ;;  %1519 = vrot.lane.b32.xlu1 %v7127_v61, %s6887_s28  ;;  %v7207_v7 = vrot.slane %v997_v12, %v7021_v37  ;;  %v7210_v39 = vrot.slane %v6317_v13, %v7021_v37  ;;  %v1097_v41 = vcombine.low %v7122_v59, %v7125_v60 }
 0x17f   : > { %v7217_v49 = vrot.slane %v977_v10, %v7035_v43  ;;  %v7220_v11 = vrot.slane %v1013_v23, %v7021_v37  ;;  %v7223_v53 = vrot.slane %v6318_v24, %v7021_v37  ;;  %v1098_v54 = vcombine.high %v7122_v59, %v7125_v60 }
 0x180   : > { %v7214_v48 = vpop.permute.xlu0 %345  ;;  %v1029_v10 = vcombine.low %v7207_v7, %v7210_v39 }
 0x181   : > { %9219 = vst [vmem:[#allocation12_spill] sm:$0xff] %v7214_v48  ;;  %v657_v5 = vcombine.low %v6960_v19, %v7214_v48  ;;  %v658_v12 = vcombine.high %v6960_v19, %v7214_v48  ;;  %1529 = vrot.lane.b32.xlu0 %v7214_v48, %s6887_s28  ;;  %v7233_v13 = vpop.permute.xlu1 %347  ;;  %v993_v24 = vcombine.low %v7204_v27, %v7217_v49 }
 0x182   : > { %9220 = vst [vmem:[#allocation13_spill] sm:$0xff] %v7233_v13  ;;  %1515 = vrot.lane.b32.xlu1 %v7191_v1, %s6887_s28  ;;  %v725_v59 = vcombine.low %v6965_v21, %v7233_v13  ;;  %v726_v60 = vcombine.high %v6965_v21, %v7233_v13  ;;  %v994_v6 = vcombine.high %v7204_v27, %v7217_v49 }
 0x183   : > { %v665_v47 = vrot.slane %v657_v5, %v7021_v37  ;;  %v672_v46 = vrot.slane %v658_v12, %v7021_v37  ;;  %v1037_v23 = vrot.slane %v1029_v10, %v7035_v43  ;;  %v1045_v45 = vcombine.low %v7220_v11, %v7223_v53 }
 0x184   : > { %v733_v44 = vrot.slane %v725_v59, %v7021_v37  ;;  %v740_v20 = vrot.slane %v726_v60, %v7021_v37  ;;  %v7256_v18 = vpop.permute.xlu0 %369  ;;  %v7261_v27 = vrot.slane %v1097_v41, %v7035_v43  ;;  %v7273_v59 = vrot.slane %v1098_v54, %v7035_v43 }
 0x185   : > { %9221 = vst [vmem:[#allocation14_spill] sm:$0xff] %v7256_v18  ;;  %v673_v49 = vcombine.low %v7181_v62, %v7256_v18  ;;  %v674_v5 = vcombine.high %v7181_v62, %v7256_v18  ;;  %1545 = vrot.lane.b32.xlu0 %v7256_v18, %s6887_s28  ;;  %v7269_v12 = vpop.permute.xlu1 %371  ;;  %v1053_v10 = vrot.slane %v1045_v45, %v7035_v43 }
 0x186   : > { %1531 = vrot.lane.b32.xlu1 %v7233_v13, %s6887_s28  ;;  %v741_v41 = vcombine.low %v7191_v1, %v7269_v12  ;;  %v742_v60 = vcombine.high %v7191_v1, %v7269_v12  ;;  %v1113_v19 = vcombine.low %v7140_v2, %v7143_v3  ;;  %v1114_v62 = vcombine.high %v7140_v2, %v7143_v3 }
 0x187   : > { %v681_v45 = vrot.slane %v673_v49, %v7021_v37  ;;  %v688_v54 = vrot.slane %v674_v5, %v7021_v37  ;;  %v1061_v18 = vcombine.low %v1037_v23, %v1053_v10  ;;  %v1062_v48 = vcombine.high %v1037_v23, %v1053_v10 }
 0x188   : > { %v749_v13 = vrot.slane %v741_v41, %v7021_v37  ;;  %v756_v55 = vrot.slane %v742_v60, %v7021_v37  ;;  %v7290_v21 = vrot.slane %v1113_v19, %v7035_v43  ;;  %v7293_v1 = vrot.slane %v1114_v62, %v7035_v43 }
 0x189   : > { %v689_v40 = vcombine.low %v665_v47, %v681_v45  ;;  %v690_v36 = vcombine.high %v665_v47, %v681_v45  ;;  %v705_v32 = vcombine.low %v672_v46, %v688_v54  ;;  %v706_v2 = vcombine.high %v672_v46, %v688_v54  ;;  %1533 = vrot.lane.b32.xlu0 %v7145_v25, %s6887_s28  ;;  %v7333_v60 = vpop.permute.xlu1 %375 }
 0x18a   : > { %v757_v3 = vcombine.low %v733_v44, %v749_v13  ;;  %v758_v49 = vcombine.high %v733_v44, %v749_v13  ;;  %v773_v23 = vcombine.low %v740_v20, %v756_v55  ;;  %v774_v5 = vcombine.high %v740_v20, %v756_v55  ;;  %1547 = vrot.lane.b32.xlu1 %v7269_v12, %s6887_s28 }
 0x18b   : > { %v7300_v19 = vrot.slane %v689_v40, %v7035_v43  ;;  %v7303_v62 = vrot.slane %v690_v36, %v7035_v43  ;;  %v7306_v47 = vrot.slane %v705_v32, %v7035_v43  ;;  %v7309_v46 = vrot.slane %v706_v2, %v7035_v43  ;;  %v7323_v36 = vpop.permute.xlu0 %373 }
 0x18c   : > { %v7312_v10 = vrot.slane %v757_v3, %v7035_v43  ;;  %v7315_v20 = vrot.slane %v758_v49, %v7035_v43  ;;  %v7318_v55 = vrot.slane %v773_v23, %v7035_v43  ;;  %v7321_v40 = vrot.slane %v774_v5, %v7035_v43 }
 0x18d   : > { %v1201_v32 = vcombine.low %v7300_v19, %v7303_v62  ;;  %v6323_v44 = vcombine.high %v7300_v19, %v7303_v62  ;;  %v1217_v13 = vcombine.low %v7306_v47, %v7309_v46  ;;  %v6324_v41 = vcombine.high %v7306_v47, %v7309_v46  ;;  %1549 = vrot.lane.b32.xlu0 %v7323_v36, %s6887_s28 }
 0x18e   : > { %1535 = vrot.lane.b32.xlu1 %v7151_v35, %s6887_s28  ;;  %v1473_v49 = vpack.c.bf16 %v1061_v18, %v993_v24  ;;  %v1477_v23 = vpack.c.bf16 %v1062_v48, %v994_v6  ;;  %v809_v5 = vcombine.low %v7119_v58, %v7323_v36  ;;  %v810_v19 = vcombine.high %v7119_v58, %v7323_v36 }
 0x18f   : > { %v877_v62 = vcombine.low %v7127_v61, %v7333_v60  ;;  %v878_v47 = vcombine.high %v7127_v61, %v7333_v60  ;;  %v9222_v48 = vcombine.low %v7084_v28, %v7087_v30 }
 0x190   : > { %6518 = vmatprep.mubr.msk.bf16.mxu1 %vm3889_vm1, %v1473_v49  ;;  %6534 = vmatprep.mubr.msk.bf16.mxu0 %vm3889_vm1, %v1477_v23  ;;  %v817_v18 = vrot.slane %v809_v5, %v7021_v37  ;;  %v824_v6 = vrot.slane %v810_v19, %v7021_v37  ;;  %v9223_v49 = vcombine.high %v7084_v28, %v7087_v30 }
 0x191   : > { %v1140_v24 = vrot.slane %v9222_v48, %v7021_v37  ;;  %v885_v2 = vrot.slane %v877_v62, %v7021_v37  ;;  %v892_v46 = vrot.slane %v878_v47, %v7021_v37  ;;  %2689 = vrot.lane.b32.xlu0 %v6948_v15, %s6890_s29 }
 0x192   : > { %1551 = vrot.lane.b32.xlu1 %v7333_v60, %s6887_s28  ;;  %v1148_v23 = vrot.slane %v9223_v49, %v7021_v37  ;;  %v825_v5 = vcombine.low %v7168_v51, %v817_v18  ;;  %v826_v19 = vcombine.high %v7168_v51, %v817_v18  ;;  %v841_v62 = vcombine.low %v7171_v52, %v824_v6 }
 0x193   : > { %v842_v47 = vcombine.high %v7171_v52, %v824_v6  ;;  %v893_v48 = vcombine.low %v7176_v56, %v885_v2  ;;  %v894_v15 = vcombine.high %v7176_v56, %v885_v2  ;;  %v909_v3 = vcombine.low %v7179_v57, %v892_v46 }
 0x194   : > { %v910_v54 = vcombine.high %v7179_v57, %v892_v46  ;;  %v833_v45 = vrot.slane %v825_v5, %v7035_v43  ;;  %v840_v28 = vrot.slane %v826_v19, %v7035_v43  ;;  %v849_v30 = vrot.slane %v841_v62, %v7035_v43 }
 0x195   : > { %v856_v51 = vrot.slane %v842_v47, %v7035_v43  ;;  %v901_v18 = vrot.slane %v893_v48, %v7035_v43  ;;  %v908_v52 = vrot.slane %v894_v15, %v7035_v43  ;;  %v917_v6 = vrot.slane %v909_v3, %v7035_v43  ;;  %2705 = vrot.lane.b32.xlu0 %v7047_v50, %s6890_s29 }
 0x196   : > { %v924_v56 = vrot.slane %v910_v54, %v7035_v43  ;;  %v1337_v57 = vcombine.low %v833_v45, %v840_v28  ;;  %v6327_v2 = vcombine.high %v833_v45, %v840_v28  ;;  %2691 = vrot.lane.b32.xlu1 %v6953_v17, %s6890_s29  ;;  %v9224_v3 = vcombine.low %v7090_v31, %v7093_v33 }
 0x197   : > { %v1353_v46 = vcombine.low %v849_v30, %v856_v51  ;;  %v6328_v49 = vcombine.high %v849_v30, %v856_v51  ;;  %v1405_v5 = vcombine.low %v901_v18, %v908_v52  ;;  %v6329_v19 = vcombine.high %v901_v18, %v908_v52 }
 0x198   : > { %v1421_v62 = vcombine.low %v917_v6, %v924_v56  ;;  %v6330_v47 = vcombine.high %v917_v6, %v924_v56  ;;  %v1156_v48 = vrot.slane %v9224_v3, %v7021_v37  ;;  %v9225_v50 = vcombine.high %v7090_v31, %v7093_v33 }
 0x199   : > { %v1165_v45 = vcombine.low %v1140_v24, %v1148_v23  ;;  %v1166_v15 = vcombine.high %v1140_v24, %v1148_v23  ;;  %2721 = vrot.lane.b32.xlu0 %v7003_v26, %s6890_s29  ;;  %v7408_v17 = vrot.slane %v1201_v32, %v7021_v37  ;;  %v7411_v28 = vrot.slane %v6323_v44, %v7021_v37 }
 0x19a   : > { %v1164_v54 = vrot.slane %v9225_v50, %v7021_v37  ;;  %v7414_v30 = vrot.slane %v1217_v13, %v7021_v37  ;;  %v7417_v51 = vrot.slane %v6324_v41, %v7021_v37  ;;  %2707 = vrot.lane.b32.xlu1 %v7095_v34, %s6890_s29  ;;  %v9226_v41 = vcombine.low %v7312_v10, %v7315_v20 }
 0x19b   : > { %v1173_v31 = vrot.slane %v1165_v45, %v7035_v43  ;;  %v7423_v33 = vrot.slane %v1166_v15, %v7035_v43  ;;  %v1233_v44 = vcombine.low %v7408_v17, %v7411_v28  ;;  %v9227_v34 = vcombine.high %v7312_v10, %v7315_v20 }
 0x19c   : > { %v1181_v26 = vcombine.low %v1156_v48, %v1164_v54  ;;  %v1182_v32 = vcombine.high %v1156_v48, %v1164_v54  ;;  %v1249_v13 = vcombine.low %v7414_v30, %v7417_v51  ;;  %v7433_v24 = vrot.slane %v9226_v41, %v7021_v37 }
 0x19d   : > { %v7439_v23 = vrot.slane %v9227_v34, %v7021_v37  ;;  %v9228_v6 = vcombine.low %v7318_v55, %v7321_v40  ;;  %v9229_v3 = vcombine.high %v7318_v55, %v7321_v40  ;;  %2737 = vrot.lane.b32.xlu0 %v7069_v4, %s6890_s29  ;;  %v1241_v10 = vrot.slane %v1233_v44, %v7035_v43 }
 0x19e   : > { %v1189_v18 = vrot.slane %v1181_v26, %v7035_v43  ;;  %v7443_v52 = vrot.slane %v1182_v32, %v7035_v43  ;;  %v1257_v20 = vrot.slane %v1249_v13, %v7035_v43  ;;  %v7464_v54 = vrot.slane %v1337_v57, %v7021_v37  ;;  %2723 = vrot.lane.b32.xlu1 %v7071_v9, %s6890_s29 }
 0x19f   : > { %v7449_v56 = vrot.slane %v9228_v6, %v7021_v37  ;;  %v7455_v48 = vrot.slane %v9229_v3, %v7021_v37  ;;  %v1301_v50 = vcombine.low %v7433_v24, %v7439_v23  ;;  %v7471_v4 = vrot.slane %v6327_v2, %v7021_v37 }
 0x1a0   : > { %v1197_v45 = vcombine.low %v1173_v31, %v1189_v18  ;;  %v1198_v55 = vcombine.high %v1173_v31, %v1189_v18  ;;  %v1265_v15 = vcombine.low %v1241_v10, %v1257_v20  ;;  %v1266_v32 = vcombine.high %v1241_v10, %v1257_v20 }
 0x1a1   : > { %v1317_v40 = vcombine.low %v7449_v56, %v7455_v48  ;;  %v1309_v26 = vrot.slane %v1301_v50, %v7035_v43  ;;  %v7475_v44 = vrot.slane %v1353_v46, %v7021_v37  ;;  %v9230_v57 = vcombine.low %v7261_v27, %v7290_v21  ;;  %2693 = vrot.lane.b32.xlu0 %v6945_v14, %s6890_s29 }
 0x1a2   : > { %v9231_v9 = vcombine.high %v7261_v27, %v7290_v21  ;;  %v7489_v41 = vrot.slane %v6328_v49, %v7021_v37  ;;  %v1369_v46 = vcombine.low %v7464_v54, %v7471_v4  ;;  %v1412_v34 = vrot.slane %v1405_v5, %v7021_v37  ;;  %2739 = vrot.lane.b32.xlu1 %v7101_v42, %s6890_s29 }
 0x1a3   : > { %v7480_v13 = vpack.c.bf16 %v1197_v45, %v9230_v57  ;;  %v1325_v2 = vrot.slane %v1317_v40, %v7035_v43  ;;  %v1420_v18 = vrot.slane %v6329_v19, %v7021_v37  ;;  %v1428_v6 = vrot.slane %v1421_v62, %v7021_v37 }
 0x1a4   : > { %v7485_v31 = vpack.c.bf16 %v1198_v55, %v9231_v9  ;;  %v1385_v49 = vcombine.low %v7475_v44, %v7489_v41  ;;  %v1436_v3 = vrot.slane %v6330_v47, %v7021_v37  ;;  %v1377_v14 = vrot.slane %v1369_v46, %v7035_v43 }
 0x1a5   : > { %v1333_v21 = vcombine.low %v1309_v26, %v1325_v2  ;;  %v1334_v27 = vcombine.high %v1309_v26, %v1325_v2  ;;  %v1437_v10 = vcombine.low %v1412_v34, %v1420_v18  ;;  %v9232_v5 = vcombine.high %v7154_v8, %v7157_v38  ;;  %2709 = vrot.lane.b32.xlu0 %v7001_v22, %s6890_s29 }
 0x1a6   : > { %v9233_v62 = vcombine.high %v7184_v63, %v7187_v0  ;;  %v1393_v45 = vrot.slane %v1385_v49, %v7035_v43  ;;  %v1453_v47 = vcombine.low %v1428_v6, %v1436_v3  ;;  %v9234_v8 = vcombine.high %v7207_v7, %v7210_v39  ;;  %2695 = vrot.lane.b32.xlu1 %v6951_v16, %s6890_s29 }
 0x1a7   : > { %v976_v19 = vrot.slane %v9232_v5, %v7035_v43  ;;  %v7512_v20 = vpack.c.bf16 %v1333_v21, %v1265_v15  ;;  %v7514_v50 = vpack.c.bf16 %v1334_v27, %v1266_v32  ;;  %v1445_v55 = vrot.slane %v1437_v10, %v7035_v43 }
 0x1a8   : > { %v992_v42 = vrot.slane %v9233_v62, %v7035_v43  ;;  %v1044_v38 = vrot.slane %v9234_v8, %v7035_v43  ;;  %v9235_v63 = vcombine.high %v7220_v11, %v7223_v53  ;;  %v1401_v15 = vcombine.low %v1377_v14, %v1393_v45 }
 0x1a9   : > { %v1461_v26 = vrot.slane %v1453_v47, %v7035_v43  ;;  %v1402_v22 = vcombine.high %v1377_v14, %v1393_v45  ;;  %v1131_v2 = vcombine.low %v7273_v59, %v7293_v1  ;;  %v1199_v7 = vcombine.low %v7423_v33, %v7443_v52  ;;  %2725 = vrot.lane.b32.xlu0 %v7007_v29, %s6890_s29  ;;  %v9239_v14 = vld [vmem:[#allocation6_spill] sm:$0xff]  ;;  %v9244_v45 = vld [vmem:[#allocation5_spill] sm:$0xff] }
 0x1aa   : > { %v995_v40 = vcombine.low %v976_v19, %v992_v42  ;;  %v1060_v0 = vrot.slane %v9235_v63, %v7035_v43  ;;  %v996_v32 = vcombine.high %v976_v19, %v992_v42  ;;  %v1132_v11 = vcombine.high %v7273_v59, %v7293_v1  ;;  %2711 = vrot.lane.b32.xlu1 %v9239_v14, %s6890_s29 }
 0x1ab   : > { %v1469_v39 = vcombine.low %v1445_v55, %v1461_v26  ;;  %v1470_v46 = vcombine.high %v1445_v55, %v1461_v26  ;;  %v1200_v16 = vcombine.high %v7423_v33, %v7443_v52  ;;  %v7545_v27 = vpack.c.bf16 %v1199_v7, %v1131_v2  ;;  %v9251_v26 = vld [vmem:[#allocation3_spill] sm:$0xff]  ;;  %v9254_v2 = vld [vmem:[#allocation2_spill] sm:$0xff] }
 0x1ac   : > { %v1063_v57 = vcombine.low %v1044_v38, %v1060_v0  ;;  %v1064_v9 = vcombine.high %v1044_v38, %v1060_v0  ;;  %v1234_v49 = vcombine.high %v7408_v17, %v7411_v28  ;;  %v1250_v29 = vcombine.high %v7414_v30, %v7417_v51  ;;  %v9242_v30 = vld [vmem:[#allocation7_spill] sm:$0xff]  ;;  %v9247_v38 = vld [vmem:[#allocation9_spill] sm:$0xff] }
 0x1ad   : > { %9238 = vst [vmem:[#allocation17_spill] sm:$0xff] %v7545_v27  ;;  %v7551_v10 = vpack.c.bf16 %v1469_v39, %v1401_v15  ;;  %v7553_v1 = vpack.c.bf16 %v1470_v46, %v1402_v22  ;;  %v7555_v59 = vpack.c.bf16 %v1200_v16, %v1132_v11  ;;  %v1302_v52 = vcombine.high %v7433_v24, %v7439_v23  ;;  %v9250_v15 = vld [vmem:[#allocation12_spill] sm:$0xff]  ;;  %v7595_v22 = vpop.permute.xlu0 %1489 }
 0x1ae   : > { %v7541_v53 = vpack.c.bf16 %v1063_v57, %v995_v40  ;;  %v7543_v21 = vpack.c.bf16 %v1064_v9, %v996_v32  ;;  %v1248_v33 = vrot.slane %v1234_v49, %v7035_v43  ;;  %v1318_v17 = vcombine.high %v7449_v56, %v7455_v48  ;;  %2741 = vrot.lane.b32.xlu0 %v9242_v30, %s6890_s29  ;;  %v9243_v56 = vld [vmem:[#allocation8_spill] sm:$0xff]  ;;  %v9252_v32 = vld [vmem:[#allocation14_spill] sm:$0xff]  ;;  %v7601_v9 = vpop.permute.xlu1 %1491 }
 0x1af   : > { %9240 = vst [vmem:[#allocation6_spill] sm:$0xff] %v7553_v1  ;;  %9241 = vst [vmem:[#allocation18_spill] sm:$0xff] %v7555_v59  ;;  %v1370_v28 = vcombine.high %v7464_v54, %v7471_v4  ;;  %v1264_v5 = vrot.slane %v1250_v29, %v7035_v43  ;;  %v1386_v19 = vcombine.high %v7475_v44, %v7489_v41  ;;  %2727 = vrot.lane.b32.xlu1 %v9243_v56, %s6890_s29  ;;  %v9253_v57 = vld [vmem:[#allocation10_spill] sm:$0xff]  ;;  %v9255_v39 = vld [vmem:[#allocation4_spill] sm:$0xff] }
 0x1b0   : > { %9236 = vst [vmem:[#allocation15_spill] sm:$0xff] %v7541_v53  ;;  %9237 = vst [vmem:[#allocation16_spill] sm:$0xff] %v7543_v21  ;;  %v1438_v62 = vcombine.high %v1412_v34, %v1420_v18  ;;  %v1454_v42 = vcombine.high %v1428_v6, %v1436_v3  ;;  %v1316_v51 = vrot.slane %v1302_v52, %v7035_v43 }
 0x1b1   : > { %v1332_v24 = vrot.slane %v1318_v17, %v7035_v43  ;;  %v1384_v23 = vrot.slane %v1370_v28, %v7035_v43  ;;  %v1267_v48 = vcombine.low %v1248_v33, %v1264_v5  ;;  %v1268_v54 = vcombine.high %v1248_v33, %v1264_v5  ;;  %v1494_v7 = vpop.permute.xlu0 %1493 }
 0x1b2   : > { %v1400_v4 = vrot.slane %v1386_v19, %v7035_v43  ;;  %v1452_v44 = vrot.slane %v1438_v62, %v7035_v43  ;;  %v1468_v18 = vrot.slane %v1454_v42, %v7035_v43  ;;  %2699 = vrot.lane.b32.xlu0 %v9244_v45, %s6890_s29  ;;  %v1496_v46 = vpop.permute.xlu1 %1495 }
 0x1b3   : > { %v1335_v41 = vcombine.low %v1316_v51, %v1332_v24  ;;  %v1336_v34 = vcombine.high %v1316_v51, %v1332_v24  ;;  %2743 = vrot.lane.b32.xlu1 %v9247_v38, %s6890_s29 }
 0x1b4   : > { %v1403_v6 = vcombine.low %v1384_v23, %v1400_v4  ;;  %v1404_v3 = vcombine.high %v1384_v23, %v1400_v4  ;;  %v1471_v40 = vcombine.low %v1452_v44, %v1468_v18  ;;  %v1472_v8 = vcombine.high %v1452_v44, %v1468_v18 }
 0x1b5   : > { %v7581_v47 = vpack.c.bf16 %v1335_v41, %v1267_v48  ;;  %v7583_v55 = vpack.c.bf16 %v1336_v34, %v1268_v54  ;;  %v7611_v11 = vpop.permute.xlu0 %1497 }
 0x1b6   : > { %v7587_v63 = vpack.c.bf16 %v1471_v40, %v1403_v6  ;;  %v7589_v0 = vpack.c.bf16 %v1472_v8, %v1404_v3  ;;  %2729 = vrot.lane.b32.xlu0 %v9250_v15, %s6890_s29  ;;  %v7617_v16 = vpop.permute.xlu1 %1503 }
 0x1b7   : > { %9245 = vst [vmem:[#allocation7_spill] sm:$0xff] %v7581_v47  ;;  %9246 = vst [vmem:[#allocation8_spill] sm:$0xff] %v7583_v55  ;;  %2697 = vrot.lane.b32.xlu1 %v9251_v26, %s6890_s29 }
 0x1b8   : > { %9248 = vst [vmem:[#allocation5_spill] sm:$0xff] %v7587_v63  ;;  %9249 = vst [vmem:[#allocation9_spill] sm:$0xff] %v7589_v0 }
 0x1b9   : > { %v7621_v49 = vpop.permute.xlu0 %1501 }
 0x1ba   : > { %2745 = vrot.lane.b32.xlu0 %v9252_v32, %s6890_s29  ;;  %v7627_v14 = vpop.permute.xlu1 %1499 }
 0x1bb   : > { %2713 = vrot.lane.b32.xlu1 %v9253_v57, %s6890_s29 }
 0x1be   : > { %2701 = vrot.lane.b32.xlu0 %v9254_v2, %s6890_s29 }
 0x1bf   : > { %2703 = vrot.lane.b32.xlu1 %v9255_v39, %s6890_s29 }
 0x1c2   : > { %2717 = vrot.lane.b32.xlu0 %v7119_v58, %s6890_s29  ;;  %v9256_v58 = vld [vmem:[#allocation11_spill] sm:$0xff] }
 0x1c3   : > { %2719 = vrot.lane.b32.xlu1 %v7127_v61, %s6890_s29 }
 0x1c6   : > { %2733 = vrot.lane.b32.xlu0 %v7145_v25, %s6890_s29  ;;  %v9257_v25 = vld [vmem:[#allocation13_spill] sm:$0xff] }
 0x1c7   : > { %2735 = vrot.lane.b32.xlu1 %v7151_v35, %s6890_s29 }
 0x1ca   : > { %2749 = vrot.lane.b32.xlu0 %v7323_v36, %s6890_s29 }
 0x1cb   : > { %2751 = vrot.lane.b32.xlu1 %v7333_v60, %s6890_s29 }
 0x1cf   : > { %2715 = vrot.lane.b32.xlu1 %v9256_v58, %s6890_s29  ;;  %v1510_v61 = vpop.permute.xlu0 %1509 }
 0x1d3   : > { %2731 = vrot.lane.b32.xlu1 %v9257_v25, %s6890_s29  ;;  %v1526_v35 = vpop.permute.xlu0 %1525 }
 0x1d4   : > { %v1512_v29 = vpop.permute.xlu1 %1511  ;;  %v1721_v33 = vcombine.low %v1494_v7, %v1526_v35  ;;  %v1722_v52 = vcombine.high %v1494_v7, %v1526_v35 }
 0x1d6   : > { %v1729_v5 = vrot.slane %v1721_v33, %v7021_v37  ;;  %v1736_v19 = vrot.slane %v1722_v52, %v7021_v37 }
 0x1d7   : > { %2747 = vrot.lane.b32.xlu1 %v7269_v12, %s6890_s29  ;;  %v1542_v36 = vpop.permute.xlu0 %1541 }
 0x1d8   : > { %v1737_v17 = vcombine.low %v1510_v61, %v1542_v36  ;;  %v1738_v28 = vcombine.high %v1510_v61, %v1542_v36  ;;  %v1528_v60 = vpop.permute.xlu1 %1527 }
 0x1d9   : > { %v1789_v30 = vcombine.low %v1496_v46, %v1528_v60  ;;  %v1790_v51 = vcombine.high %v1496_v46, %v1528_v60 }
 0x1da   : > { %v1745_v62 = vrot.slane %v1737_v17, %v7021_v37  ;;  %v1752_v42 = vrot.slane %v1738_v28, %v7021_v37 }
 0x1db   : > { %v1506_v24 = vpop.permute.xlu0 %1505  ;;  %v1797_v3 = vrot.slane %v1789_v30, %v7021_v37  ;;  %v1804_v45 = vrot.slane %v1790_v51, %v7021_v37 }
 0x1dc   : > { %v1753_v23 = vcombine.low %v1729_v5, %v1745_v62  ;;  %v1754_v56 = vcombine.high %v1729_v5, %v1745_v62  ;;  %v1769_v48 = vcombine.low %v1736_v19, %v1752_v42  ;;  %v1770_v54 = vcombine.high %v1736_v19, %v1752_v42  ;;  %v1544_v12 = vpop.permute.xlu1 %1543 }
 0x1dd   : > { %v1805_v4 = vcombine.low %v1512_v29, %v1544_v12  ;;  %v1806_v44 = vcombine.high %v1512_v29, %v1544_v12 }
 0x1de   : > { %v1761_v41 = vrot.slane %v1753_v23, %v7035_v43  ;;  %v1768_v34 = vrot.slane %v1754_v56, %v7035_v43  ;;  %v1777_v18 = vrot.slane %v1769_v48, %v7035_v43  ;;  %v1784_v6 = vrot.slane %v1770_v54, %v7035_v43 }
 0x1df   : > { %v1813_v40 = vrot.slane %v1805_v4, %v7021_v37  ;;  %v1820_v8 = vrot.slane %v1806_v44, %v7021_v37  ;;  %v1522_v38 = vpop.permute.xlu0 %1521 }
 0x1e0   : > { %v2265_v15 = vcombine.low %v1761_v41, %v1768_v34  ;;  %v6335_v26 = vcombine.high %v1761_v41, %v1768_v34  ;;  %v2281_v32 = vcombine.low %v1777_v18, %v1784_v6  ;;  %v6336_v57 = vcombine.high %v1777_v18, %v1784_v6 }
 0x1e1   : > { %v1821_v2 = vcombine.low %v1797_v3, %v1813_v40  ;;  %v1822_v7 = vcombine.high %v1797_v3, %v1813_v40  ;;  %v1837_v39 = vcombine.low %v1804_v45, %v1820_v8  ;;  %v1838_v46 = vcombine.high %v1804_v45, %v1820_v8 }
 0x1e2   : > { %v7646_v58 = vrot.slane %v2265_v15, %v7021_v37  ;;  %v7649_v61 = vrot.slane %v6335_v26, %v7021_v37  ;;  %v7652_v25 = vrot.slane %v2281_v32, %v7021_v37  ;;  %v1585_v17 = vcombine.low %v7595_v22, %v1522_v38 }
 0x1e3   : > { %v1829_v35 = vrot.slane %v1821_v2, %v7035_v43  ;;  %v1836_v29 = vrot.slane %v1822_v7, %v7035_v43  ;;  %v1845_v33 = vrot.slane %v1837_v39, %v7035_v43  ;;  %v1852_v52 = vrot.slane %v1838_v46, %v7035_v43  ;;  %v1538_v36 = vpop.permute.xlu0 %1537 }
 0x1e4   : > { %v1586_v28 = vcombine.high %v7595_v22, %v1522_v38  ;;  %v1601_v60 = vcombine.low %v1506_v24, %v1538_v36  ;;  %v1602_v5 = vcombine.high %v1506_v24, %v1538_v36  ;;  %v1508_v19 = vpop.permute.xlu1 %1507  ;;  %v7661_v62 = vrot.slane %v6336_v57, %v7021_v37 }
 0x1e5   : > { %v2333_v42 = vcombine.low %v1829_v35, %v1836_v29  ;;  %v6337_v30 = vcombine.high %v1829_v35, %v1836_v29  ;;  %v2349_v51 = vcombine.low %v1845_v33, %v1852_v52  ;;  %v1593_v23 = vrot.slane %v1585_v17, %v7021_v37 }
 0x1e6   : > { %v1600_v56 = vrot.slane %v1586_v28, %v7021_v37  ;;  %v1609_v48 = vrot.slane %v1601_v60, %v7021_v37  ;;  %v1616_v54 = vrot.slane %v1602_v5, %v7021_v37  ;;  %v6338_v24 = vcombine.high %v1845_v33, %v1852_v52 }
 0x1e7   : > { %v7668_v12 = vrot.slane %v2333_v42, %v7021_v37  ;;  %v7671_v22 = vrot.slane %v6337_v30, %v7021_v37  ;;  %v7674_v6 = vrot.slane %v2349_v51, %v7021_v37  ;;  %v2297_v45 = vcombine.low %v7646_v58, %v7649_v61  ;;  %v7690_v7 = vpop.permute.xlu0 %1517 }
 0x1e8   : > { %v1617_v4 = vcombine.low %v1593_v23, %v1609_v48  ;;  %v1618_v44 = vcombine.high %v1593_v23, %v1609_v48  ;;  %v1633_v41 = vcombine.low %v1600_v56, %v1616_v54  ;;  %v1634_v34 = vcombine.high %v1600_v56, %v1616_v54  ;;  %v1524_v18 = vpop.permute.xlu1 %1523 }
 0x1e9   : > { %v1653_v3 = vcombine.low %v7601_v9, %v1524_v18  ;;  %v2313_v40 = vcombine.low %v7652_v25, %v7661_v62  ;;  %v7686_v32 = vrot.slane %v6338_v24, %v7021_v37  ;;  %v1654_v57 = vcombine.high %v7601_v9, %v1524_v18 }
 0x1ea   : > { %v1625_v8 = vrot.slane %v1617_v4, %v7035_v43  ;;  %v1632_v38 = vrot.slane %v1618_v44, %v7035_v43  ;;  %v1641_v15 = vrot.slane %v1633_v41, %v7035_v43  ;;  %v1648_v26 = vrot.slane %v1634_v34, %v7035_v43 }
 0x1eb   : > { %v1661_v2 = vrot.slane %v1653_v3, %v7021_v37  ;;  %v7693_v39 = vrot.slane %v2297_v45, %v7035_v43  ;;  %v2321_v28 = vrot.slane %v2313_v40, %v7035_v43  ;;  %v2365_v60 = vcombine.low %v7668_v12, %v7671_v22 }
 0x1ec   : > { %v1540_v46 = vpop.permute.xlu1 %1539  ;;  %v2129_v35 = vcombine.low %v1625_v8, %v1632_v38  ;;  %v6331_v29 = vcombine.high %v1625_v8, %v1632_v38  ;;  %v2145_v33 = vcombine.low %v1641_v15, %v1648_v26  ;;  %v6332_v52 = vcombine.high %v1641_v15, %v1648_v26 }
 0x1ed   : > { %v1669_v36 = vcombine.low %v1508_v19, %v1540_v46  ;;  %v1670_v17 = vcombine.high %v1508_v19, %v1540_v46  ;;  %v1668_v51 = vrot.slane %v1654_v57, %v7021_v37  ;;  %v2381_v48 = vcombine.low %v7674_v6, %v7686_v32 }
 0x1ee   : > { %v7699_v9 = vrot.slane %v2129_v35, %v7021_v37  ;;  %v7702_v5 = vrot.slane %v6331_v29, %v7021_v37  ;;  %v7705_v42 = vrot.slane %v2145_v33, %v7021_v37  ;;  %v7708_v30 = vrot.slane %v6332_v52, %v7021_v37 }
 0x1ef   : > { %v1677_v19 = vrot.slane %v1669_v36, %v7021_v37  ;;  %v1684_v23 = vrot.slane %v1670_v17, %v7021_v37  ;;  %v1514_v56 = vpop.permute.xlu0 %1513  ;;  %v2329_v3 = vcombine.low %v7693_v39, %v2321_v28  ;;  %v2373_v45 = vrot.slane %v2365_v60, %v7035_v43 }
 0x1f0   : > { %v7715_v54 = vpop.permute.xlu1 %1519  ;;  %v2161_v24 = vcombine.low %v7699_v9, %v7702_v5  ;;  %v2177_v4 = vcombine.low %v7705_v42, %v7708_v30  ;;  %v2389_v40 = vrot.slane %v2381_v48, %v7035_v43 }
 0x1f1   : > { %v1685_v44 = vcombine.low %v1661_v2, %v1677_v19  ;;  %v1686_v41 = vcombine.high %v1661_v2, %v1677_v19  ;;  %v1701_v34 = vcombine.low %v1668_v51, %v1684_v23  ;;  %v1702_v18 = vcombine.high %v1668_v51, %v1684_v23 }
 0x1f2   : > { %v7731_v29 = vrot.slane %v2161_v24, %v7035_v43  ;;  %v7734_v33 = vrot.slane %v2177_v4, %v7035_v43  ;;  %v2397_v23 = vcombine.low %v2373_v45, %v2389_v40  ;;  %v2398_v48 = vcombine.high %v2373_v45, %v2389_v40 }
 0x1f3   : > { %v1693_v8 = vrot.slane %v1685_v44, %v7035_v43  ;;  %v1700_v38 = vrot.slane %v1686_v41, %v7035_v43  ;;  %v1709_v15 = vrot.slane %v1701_v34, %v7035_v43  ;;  %v1716_v26 = vrot.slane %v1702_v18, %v7035_v43  ;;  %v1530_v57 = vpop.permute.xlu0 %1529 }
 0x1f4   : > { %v1857_v46 = vcombine.low %v7611_v11, %v1530_v57  ;;  %v1858_v2 = vcombine.high %v7611_v11, %v1530_v57  ;;  %v1516_v35 = vpop.permute.xlu1 %1515  ;;  %v2330_v45 = vcombine.high %v7693_v39, %v2321_v28  ;;  %v7759_v57 = vpack.c.bf16 %v2397_v23, %v2329_v3 }
 0x1f5   : > { %v2197_v52 = vcombine.low %v1693_v8, %v1700_v38  ;;  %v6333_v36 = vcombine.high %v1693_v8, %v1700_v38  ;;  %v2213_v17 = vcombine.low %v1709_v15, %v1716_v26  ;;  %v6334_v60 = vcombine.high %v1709_v15, %v1716_v26 }
 0x1f6   : > { %v1865_v40 = vrot.slane %v1857_v46, %v7021_v37  ;;  %v1872_v15 = vrot.slane %v1858_v2, %v7021_v37 }
 0x1f7   : > { %v1546_v11 = vpop.permute.xlu0 %1545  ;;  %v7741_v44 = vrot.slane %v2197_v52, %v7021_v37  ;;  %v7744_v24 = vrot.slane %v6333_v36, %v7021_v37  ;;  %v7747_v4 = vrot.slane %v2213_v17, %v7021_v37  ;;  %v7750_v41 = vrot.slane %v6334_v60, %v7021_v37 }
 0x1f8   : > { %v1873_v34 = vcombine.low %v1514_v56, %v1546_v11  ;;  %v1874_v18 = vcombine.high %v1514_v56, %v1546_v11  ;;  %v1532_v8 = vpop.permute.xlu1 %1531  ;;  %v7764_v17 = vpack.c.bf16 %v2398_v48, %v2330_v45 }
 0x1f9   : > { %v1925_v56 = vcombine.low %v7627_v14, %v1532_v8  ;;  %v1926_v60 = vcombine.high %v7627_v14, %v1532_v8  ;;  %v2229_v28 = vcombine.low %v7741_v44, %v7744_v24  ;;  %v2245_v3 = vcombine.low %v7747_v4, %v7750_v41 }
 0x1fa   : > { %v1881_v52 = vrot.slane %v1873_v34, %v7021_v37  ;;  %v1888_v36 = vrot.slane %v1874_v18, %v7021_v37 }
 0x1fb   : > { %v1534_v39 = vpop.permute.xlu0 %1533  ;;  %v1933_v38 = vrot.slane %v1925_v56, %v7021_v37 }
 0x1fc   : > { %v1889_v2 = vcombine.low %v1865_v40, %v1881_v52  ;;  %v1890_v23 = vcombine.high %v1865_v40, %v1881_v52  ;;  %v1905_v11 = vcombine.low %v1872_v15, %v1888_v36  ;;  %v1906_v34 = vcombine.high %v1872_v15, %v1888_v36  ;;  %v1548_v18 = vpop.permute.xlu1 %1547 }
 0x1fd   : > { %v1993_v48 = vcombine.low %v7621_v49, %v1534_v39  ;;  %v1994_v45 = vcombine.high %v7621_v49, %v1534_v39  ;;  %v1941_v14 = vcombine.low %v1516_v35, %v1548_v18  ;;  %v1942_v8 = vcombine.high %v1516_v35, %v1548_v18 }
 0x1fe   : > { %v1897_v19 = vrot.slane %v1889_v2, %v7035_v43  ;;  %v1904_v51 = vrot.slane %v1890_v23, %v7035_v43  ;;  %v1913_v46 = vrot.slane %v1905_v11, %v7035_v43  ;;  %v1920_v26 = vrot.slane %v1906_v34, %v7035_v43 }
 0x1ff   : > { %v1940_v40 = vrot.slane %v1926_v60, %v7021_v37  ;;  %v1949_v15 = vrot.slane %v1941_v14, %v7021_v37  ;;  %v1956_v52 = vrot.slane %v1942_v8, %v7021_v37  ;;  %v1550_v36 = vpop.permute.xlu0 %1549  ;;  %v2001_v56 = vrot.slane %v1993_v48, %v7021_v37 }
 0x200   : > { %v2401_v49 = vcombine.low %v1897_v19, %v1904_v51  ;;  %v6339_v39 = vcombine.high %v1897_v19, %v1904_v51  ;;  %v2417_v35 = vcombine.low %v1913_v46, %v1920_v26  ;;  %v1536_v18 = vpop.permute.xlu1 %1535  ;;  %v6340_v63 = vcombine.high %v1913_v46, %v1920_v26 }
 0x201   : > { %v1957_v23 = vcombine.low %v1933_v38, %v1949_v15  ;;  %v1958_v11 = vcombine.high %v1933_v38, %v1949_v15  ;;  %v1973_v0 = vcombine.low %v1940_v40, %v1956_v52  ;;  %v1974_v34 = vcombine.high %v1940_v40, %v1956_v52 }
 0x202   : > { %v2008_v60 = vrot.slane %v1994_v45, %v7021_v37  ;;  %v2237_v14 = vrot.slane %v2229_v28, %v7035_v43  ;;  %v2009_v2 = vcombine.low %v7690_v7, %v1550_v36  ;;  %v2010_v38 = vcombine.high %v7690_v7, %v1550_v36 }
 0x203   : > { %v1965_v8 = vrot.slane %v1957_v23, %v7035_v43  ;;  %v1972_v51 = vrot.slane %v1958_v11, %v7035_v43  ;;  %v1981_v19 = vrot.slane %v1973_v0, %v7035_v43  ;;  %v1988_v55 = vrot.slane %v1974_v34, %v7035_v43  ;;  %v7796_v48 = vpop.permute.xlu0 %2689 }
 0x204   : > { %v2061_v26 = vcombine.low %v7617_v16, %v1536_v18  ;;  %v2062_v46 = vcombine.high %v7617_v16, %v1536_v18  ;;  %v1552_v45 = vpop.permute.xlu1 %1551  ;;  %v7799_v28 = vrot.slane %v2401_v49, %v7021_v37  ;;  %v7802_v40 = vrot.slane %v6339_v39, %v7021_v37 }
 0x205   : > { %v7805_v0 = vrot.slane %v2417_v35, %v7021_v37  ;;  %v2469_v15 = vcombine.low %v1965_v8, %v1972_v51  ;;  %v7808_v52 = vrot.slane %v6340_v63, %v7021_v37  ;;  %v6341_v7 = vcombine.high %v1965_v8, %v1972_v51 }
 0x206   : > { %v2017_v36 = vrot.slane %v2009_v2, %v7021_v37  ;;  %v2024_v16 = vrot.slane %v2010_v38, %v7021_v37  ;;  %v2485_v18 = vcombine.low %v1981_v19, %v1988_v55  ;;  %v6342_v23 = vcombine.high %v1981_v19, %v1988_v55 }
 0x207   : > { %v2069_v49 = vrot.slane %v2061_v26, %v7021_v37  ;;  %v2076_v11 = vrot.slane %v2062_v46, %v7021_v37  ;;  %v2706_v59 = vpop.permute.xlu0 %2705  ;;  %v7815_v27 = vrot.slane %v2469_v15, %v7021_v37  ;;  %v2253_v63 = vrot.slane %v2245_v3, %v7035_v43 }
 0x208   : > { %v2025_v39 = vcombine.low %v2001_v56, %v2017_v36  ;;  %v2026_v34 = vcombine.high %v2001_v56, %v2017_v36  ;;  %v2041_v47 = vcombine.low %v2008_v60, %v2024_v16  ;;  %v2042_v35 = vcombine.high %v2008_v60, %v2024_v16  ;;  %v7820_v51 = vpop.permute.xlu1 %2691 }
 0x209   : > { %v2077_v2 = vcombine.low %v7715_v54, %v1552_v45  ;;  %v2078_v8 = vcombine.high %v7715_v54, %v1552_v45  ;;  %v7827_v38 = vrot.slane %v6341_v7, %v7021_v37  ;;  %v2261_v26 = vcombine.low %v2237_v14, %v2253_v63 }
 0x20a   : > { %v2033_v55 = vrot.slane %v2025_v39, %v7035_v43  ;;  %v2040_v19 = vrot.slane %v2026_v34, %v7035_v43  ;;  %v2049_v56 = vrot.slane %v2041_v47, %v7035_v43  ;;  %v2056_v60 = vrot.slane %v2042_v35, %v7035_v43 }
 0x20b   : > { %v2262_v46 = vcombine.high %v2237_v14, %v2253_v63  ;;  %v2085_v3 = vrot.slane %v2077_v2, %v7021_v37  ;;  %v2092_v45 = vrot.slane %v2078_v8, %v7021_v37  ;;  %v2722_v16 = vpop.permute.xlu0 %2721  ;;  %v9258_v39 = vcombine.low %v7731_v29, %v7734_v33 }
 0x20c   : > { %v2537_v15 = vcombine.low %v2033_v55, %v2040_v19  ;;  %v6343_v36 = vcombine.high %v2033_v55, %v2040_v19  ;;  %v2553_v54 = vcombine.low %v2049_v56, %v2056_v60  ;;  %v9259_v47 = vcombine.high %v7731_v29, %v7734_v33  ;;  %v7837_v53 = vpop.permute.xlu1 %2707 }
 0x20d   : > { %v2673_v34 = vpack.c.bf16 %v2261_v26, %v9258_v39  ;;  %v2093_v7 = vcombine.low %v2069_v49, %v2085_v3  ;;  %v2094_v21 = vcombine.high %v2069_v49, %v2085_v3  ;;  %v7840_v14 = vrot.slane %v2485_v18, %v7021_v37 }
 0x20e   : > { %v2677_v35 = vpack.c.bf16 %v2262_v46, %v9259_v47  ;;  %v7843_v63 = vrot.slane %v6342_v23, %v7021_v37  ;;  %v7846_v2 = vrot.slane %v2537_v15, %v7021_v37  ;;  %v6344_v8 = vcombine.high %v2049_v56, %v2056_v60 }
 0x20f   : > { %9260 = vst [vmem:[#allocation12_spill] sm:$0xff] %v7840_v14  ;;  %6650 = vmatprep.subr.msk.bf16.mxu1 %vm3889_vm1, %v2673_v34  ;;  %v3903_v29 = vsel %vm3889_vm1, %v2673_v34, 0  ;;  %v2101_v49 = vrot.slane %v2093_v7, %v7035_v43  ;;  %v2108_v18 = vrot.slane %v2094_v21, %v7035_v43  ;;  %v2109_v23 = vcombine.low %v2076_v11, %v2092_v45  ;;  %v2738_v60 = vpop.permute.xlu0 %2737 }
 0x210   : > { %9261 = vst [vmem:[#allocation3_spill] sm:$0xff] %v7843_v63  ;;  %9262 = vst [vmem:[#allocation14_spill] sm:$0xff] %v7846_v2  ;;  %6654 = vmatprep.subr.msk.bf16.mxu0 %vm3889_vm1, %v2677_v35  ;;  %v3992_v33 = vsel %vm3889_vm1, %v2677_v35, 0  ;;  %6511 = vmatpush3.bf16.xpose.msra.mxu1 %v3903_v29  ;;  %v2110_v55 = vcombine.high %v2076_v11, %v2092_v45  ;;  %v3906_v19 = vsel %vm3889_vm1, %v7759_v57, 0  ;;  %v3995_v21 = vsel %vm3889_vm1, %v7764_v17, 0  ;;  %v2724_v3 = vpop.permute.xlu1 %2723 }
 0x211   : > { %6527 = vmatpush3.bf16.xpose.msra.mxu0 %v3992_v33  ;;  %v2785_v56 = vcombine.low %v7796_v48, %v2722_v16  ;;  %v7858_v26 = vrot.slane %v6343_v36, %v7021_v37  ;;  %v7861_v46 = vrot.slane %v2553_v54, %v7021_v37  ;;  %6651 = vmatprep.subr.msk.bf16.mxu1 %vm3889_vm1, %v7759_v57 }
 0x212   : > { %6655 = vmatprep.subr.msk.bf16.mxu0 %vm3889_vm1, %v7764_v17  ;;  %v2786_v11 = vcombine.high %v7796_v48, %v2722_v16  ;;  %v2117_v15 = vrot.slane %v2109_v23, %v7035_v43  ;;  %v2124_v36 = vrot.slane %v2110_v55, %v7035_v43  ;;  %v2605_v45 = vcombine.low %v2101_v49, %v2108_v18 }
 0x213   : > { %9263 = vst [vmem:[#allocation10_spill] sm:$0xff] %v7858_v26  ;;  %9264 = vst [vmem:[#allocation2_spill] sm:$0xff] %v7861_v46  ;;  %v2801_v39 = vcombine.low %v2706_v59, %v2738_v60  ;;  %v7873_v54 = vrot.slane %v6344_v8, %v7021_v37  ;;  %v6345_v34 = vcombine.high %v2101_v49, %v2108_v18  ;;  %v7878_v16 = vpop.permute.xlu0 %2693 }
 0x214   : > { %v2793_v57 = vrot.slane %v2785_v56, %v7021_v37  ;;  %v2802_v47 = vcombine.high %v2706_v59, %v2738_v60  ;;  %v2621_v35 = vcombine.low %v2117_v15, %v2124_v36  ;;  %v6346_v7 = vcombine.high %v2117_v15, %v2124_v36  ;;  %v2740_v18 = vpop.permute.xlu1 %2739 }
 0x215   : > { %9265 = vst [vmem:[#allocation4_spill] sm:$0xff] %v7873_v54  ;;  %v2800_v17 = vrot.slane %v2786_v11, %v7021_v37  ;;  %v2809_v48 = vrot.slane %v2801_v39, %v7021_v37  ;;  %v2853_v33 = vcombine.low %v7820_v51, %v2724_v3  ;;  %v2433_v8 = vcombine.low %v7799_v28, %v7802_v40 }
 0x216   : > { %v2816_v29 = vrot.slane %v2802_v47, %v7021_v37  ;;  %v2449_v49 = vcombine.low %v7805_v0, %v7808_v52  ;;  %v7887_v59 = vrot.slane %v2605_v45, %v7021_v37  ;;  %v2854_v56 = vcombine.high %v7820_v51, %v2724_v3 }
 0x217   : > { %v2817_v23 = vcombine.low %v2793_v57, %v2809_v48  ;;  %v2818_v55 = vcombine.high %v2793_v57, %v2809_v48  ;;  %v7891_v60 = vrot.slane %v6345_v34, %v7021_v37  ;;  %v7894_v11 = vrot.slane %v2621_v35, %v7021_v37  ;;  %v7903_v47 = vpop.permute.xlu0 %2709 }
 0x218   : > { %9266 = vst [vmem:[#allocation11_spill] sm:$0xff] %v7887_v59  ;;  %v2833_v15 = vcombine.low %v2800_v17, %v2816_v29  ;;  %v2834_v36 = vcombine.high %v2800_v17, %v2816_v29  ;;  %6513 = vmatpush3.bf16.xpose.msra.mxu1 %v3906_v19  ;;  %v2441_v57 = vrot.slane %v2433_v8, %v7035_v43 }
 0x219   : > { %9267 = vst [vmem:[#allocation13_spill] sm:$0xff] %v7891_v60  ;;  %9268 = vst [vmem:[#allocation19_spill] sm:$0xff] %v7894_v11  ;;  %6529 = vmatpush3.bf16.xpose.msra.mxu0 %v3995_v21  ;;  %v7897_v39 = vrot.slane %v2817_v23, %v7035_v43  ;;  %v7900_v45 = vrot.slane %v2818_v55, %v7035_v43  ;;  %v7906_v51 = vrot.slane %v6346_v7, %v7021_v37  ;;  %v7912_v21 = vpop.permute.xlu1 %2695 }
 0x21a   : > { %v2861_v3 = vrot.slane %v2853_v33, %v7021_v37  ;;  %v2457_v34 = vrot.slane %v2449_v49, %v7035_v43  ;;  %v2501_v19 = vcombine.low %v7815_v27, %v7827_v38  ;;  %v7915_v35 = vrot.slane %v2833_v15, %v7035_v43 }
 0x21b   : > { %9269 = vst [vmem:[#allocation20_spill] sm:$0xff] %v7906_v51  ;;  %v2868_v17 = vrot.slane %v2854_v56, %v7021_v37  ;;  %v2517_v48 = vcombine.low %v7840_v14, %v7843_v63  ;;  %v2869_v7 = vcombine.low %v7837_v53, %v2740_v18  ;;  %v7922_v29 = vrot.slane %v2834_v36, %v7035_v43  ;;  %v7930_v1 = vpop.permute.xlu0 %2725 }
 0x21c   : > { %v2465_v8 = vcombine.low %v2441_v57, %v2457_v34  ;;  %v2509_v49 = vrot.slane %v2501_v19, %v7035_v43  ;;  %v2466_v55 = vcombine.high %v2441_v57, %v2457_v34  ;;  %v2870_v15 = vcombine.high %v7837_v53, %v2740_v18 }
 0x21d   : > { %v2525_v23 = vrot.slane %v2517_v48, %v7035_v43  ;;  %v2877_v56 = vrot.slane %v2869_v7, %v7021_v37  ;;  %v2569_v14 = vcombine.low %v7846_v2, %v7858_v26  ;;  %v2585_v36 = vcombine.low %v7861_v46, %v7873_v54  ;;  %v7940_v48 = vpop.permute.xlu1 %2711 }
 0x21e   : > { %v2637_v33 = vcombine.low %v7887_v59, %v7891_v60  ;;  %v2653_v19 = vcombine.low %v7894_v11, %v7906_v51  ;;  %v2884_v18 = vrot.slane %v2870_v15, %v7021_v37  ;;  %v6347_v7 = vcombine.high %v7897_v39, %v7900_v45 }
 0x21f   : > { %v2533_v57 = vcombine.low %v2509_v49, %v2525_v23  ;;  %v2534_v53 = vcombine.high %v2509_v49, %v2525_v23  ;;  %v2885_v34 = vcombine.low %v2861_v3, %v2877_v56  ;;  %v2886_v2 = vcombine.high %v2861_v3, %v2877_v56 }
 0x220   : > { %v2577_v26 = vrot.slane %v2569_v14, %v7035_v43  ;;  %v2593_v46 = vrot.slane %v2585_v36, %v7035_v43  ;;  %v2901_v60 = vcombine.low %v2868_v17, %v2884_v18  ;;  %v2645_v11 = vrot.slane %v2637_v33, %v7035_v43  ;;  %v2742_v51 = vpop.permute.xlu0 %2741 }
 0x221   : > { %v2675_v54 = vpack.c.bf16 %v2533_v57, %v2465_v8  ;;  %v2679_v59 = vpack.c.bf16 %v2534_v53, %v2466_v55  ;;  %v7949_v63 = vrot.slane %v2885_v34, %v7035_v43  ;;  %v7952_v49 = vrot.slane %v2886_v2, %v7035_v43  ;;  %v7955_v3 = vpop.permute.xlu1 %2727 }
 0x222   : > { %v2902_v23 = vcombine.high %v2868_v17, %v2884_v18  ;;  %v2661_v15 = vrot.slane %v2653_v19, %v7035_v43  ;;  %v3345_v14 = vcombine.low %v7915_v35, %v7922_v29  ;;  %v6348_v8 = vcombine.high %v7915_v35, %v7922_v29 }
 0x223   : > { %6652 = vmatprep.subr.msk.bf16.mxu1 %vm3889_vm1, %v2675_v54  ;;  %6656 = vmatprep.subr.msk.bf16.mxu0 %vm3889_vm1, %v2679_v59  ;;  %v3909_v33 = vsel %vm3889_vm1, %v2675_v54, 0  ;;  %v3998_v2 = vsel %vm3889_vm1, %v2679_v59, 0  ;;  %v7966_v17 = vrot.slane %v2901_v60, %v7035_v43  ;;  %v2601_v55 = vcombine.low %v2577_v26, %v2593_v46 }
 0x224   : > { %6515 = vmatpush3.bf16.xpose.msra.mxu1 %v3909_v33  ;;  %6531 = vmatpush3.bf16.xpose.msra.mxu0 %v3998_v2  ;;  %v2602_v56 = vcombine.high %v2577_v26, %v2593_v46  ;;  %v2669_v36 = vcombine.low %v2645_v11, %v2661_v15  ;;  %v2670_v19 = vcombine.high %v2645_v11, %v2661_v15  ;;  %v7976_v59 = vpop.permute.xlu0 %2699 }
 0x225   : > { %v9270_v57 = vcombine.high %v7699_v9, %v7702_v5  ;;  %v9271_v54 = vcombine.high %v7705_v42, %v7708_v30  ;;  %v7979_v34 = vrot.slane %v2902_v23, %v7035_v43  ;;  %v3397_v26 = vcombine.low %v7949_v63, %v7952_v49  ;;  %v7991_v42 = vpop.permute.xlu1 %2743 }
 0x226   : > { %v9272_v46 = vcombine.high %v7741_v44, %v7744_v24  ;;  %v9273_v9 = vcombine.high %v7747_v4, %v7750_v41  ;;  %v2676_v30 = vpack.c.bf16 %v2669_v36, %v2601_v55  ;;  %v2680_v11 = vpack.c.bf16 %v2670_v19, %v2602_v56 }
 0x227   : > { %v2176_v53 = vrot.slane %v9270_v57, %v7035_v43  ;;  %v2192_v18 = vrot.slane %v9271_v54, %v7035_v43  ;;  %v2921_v57 = vcombine.low %v7878_v16, %v7930_v1  ;;  %v2922_v44 = vcombine.high %v7878_v16, %v7930_v1 }
 0x228   : > { %v2244_v60 = vrot.slane %v9272_v46, %v7035_v43  ;;  %v2260_v5 = vrot.slane %v9273_v9, %v7035_v43  ;;  %6653 = vmatprep.subr.msk.bf16.mxu1 %vm3889_vm1, %v2676_v30  ;;  %6657 = vmatprep.subr.msk.bf16.mxu0 %vm3889_vm1, %v2680_v11  ;;  %v3912_v24 = vsel %vm3889_vm1, %v2676_v30, 0  ;;  %v4001_v4 = vsel %vm3889_vm1, %v2680_v11, 0 }
 0x229   : > { %v2195_v15 = vcombine.low %v2176_v53, %v2192_v18  ;;  %v2196_v23 = vcombine.high %v2176_v53, %v2192_v18  ;;  %v2937_v41 = vcombine.low %v7903_v47, %v2742_v51  ;;  %v2938_v55 = vcombine.high %v7903_v47, %v2742_v51  ;;  %v8006_v1 = vpop.permute.xlu1 %2697 }
 0x22a   : > { %v2263_v33 = vcombine.low %v2244_v60, %v2260_v5  ;;  %v2264_v2 = vcombine.high %v2244_v60, %v2260_v5  ;;  %v6349_v56 = vcombine.high %v7949_v63, %v7952_v49  ;;  %v2929_v53 = vrot.slane %v2921_v57, %v7021_v37  ;;  %v8013_v60 = vpop.permute.xlu0 %2729 }
 0x22b   : > { %v2936_v16 = vrot.slane %v2922_v44, %v7021_v37  ;;  %v2945_v54 = vrot.slane %v2937_v41, %v7021_v37  ;;  %v2952_v18 = vrot.slane %v2938_v55, %v7021_v37  ;;  %v2989_v46 = vcombine.low %v7912_v21, %v7955_v3 }
 0x22c   : > { %v2681_v36 = vpack.c.bf16 %v2263_v33, %v2195_v15  ;;  %v2685_v19 = vpack.c.bf16 %v2264_v2, %v2196_v23  ;;  %6517 = vmatpush3.bf16.xpose.msra.mxu1 %v3912_v24  ;;  %6533 = vmatpush3.bf16.xpose.msra.mxu0 %v4001_v4  ;;  %v2990_v47 = vcombine.high %v7912_v21, %v7955_v3 }
 0x22d   : > { %v2298_v51 = vcombine.high %v7646_v58, %v7649_v61  ;;  %v2314_v9 = vcombine.high %v7652_v25, %v7661_v62  ;;  %v2953_v5 = vcombine.low %v2929_v53, %v2945_v54  ;;  %v2954_v30 = vcombine.high %v2929_v53, %v2945_v54  ;;  %v8038_v24 = vpop.permute.xlu1 %2713 }
 0x22e   : > { %6658 = vmatprep.subr.msk.bf16.mxu1 %vm3889_vm1, %v2681_v36  ;;  %6662 = vmatprep.subr.msk.bf16.mxu0 %vm3889_vm1, %v2685_v19  ;;  %v2969_v11 = vcombine.low %v2936_v16, %v2952_v18  ;;  %v3413_v15 = vcombine.low %v7966_v17, %v7979_v34  ;;  %v6350_v23 = vcombine.high %v7966_v17, %v7979_v34 }
 0x22f   : > { %v2970_v21 = vcombine.high %v2936_v16, %v2952_v18  ;;  %v2312_v3 = vrot.slane %v2298_v51, %v7035_v43  ;;  %v2961_v58 = vrot.slane %v2953_v5, %v7035_v43  ;;  %v2968_v61 = vrot.slane %v2954_v30, %v7035_v43  ;;  %v8043_v16 = vpop.permute.xlu0 %2745 }
 0x230   : > { %v2977_v25 = vrot.slane %v2969_v11, %v7035_v43  ;;  %v2328_v62 = vrot.slane %v2314_v9, %v7035_v43  ;;  %v2997_v2 = vrot.slane %v2989_v46, %v7021_v37  ;;  %v2366_v57 = vcombine.high %v7668_v12, %v7671_v22 }
 0x231   : > { %v2984_v33 = vrot.slane %v2970_v21, %v7035_v43  ;;  %v2382_v44 = vcombine.high %v7674_v6, %v7686_v32  ;;  %v3465_v4 = vcombine.low %v2961_v58, %v2968_v61  ;;  %v6351_v41 = vcombine.high %v2961_v58, %v2968_v61  ;;  %v8073_v11 = vpop.permute.xlu1 %2703 }
 0x232   : > { %v3004_v55 = vrot.slane %v2990_v47, %v7021_v37  ;;  %v3005_v53 = vcombine.low %v7940_v48, %v7991_v42  ;;  %v2331_v54 = vcombine.low %v2312_v3, %v2328_v62  ;;  %v2380_v18 = vrot.slane %v2366_v57, %v7035_v43 }
 0x233   : > { %v2396_v46 = vrot.slane %v2382_v44, %v7035_v43  ;;  %v2332_v12 = vcombine.high %v2312_v3, %v2328_v62  ;;  %v3481_v22 = vcombine.low %v2977_v25, %v2984_v33  ;;  %v6352_v51 = vcombine.high %v2977_v25, %v2984_v33  ;;  %6519 = vmatmul.mubr.msk.bf16.vlgmr.msra.gmra.mrb[0].mxu1 %vm3889_vm1, %v7480_v13  ;;  %v8075_v61 = vpop.permute.xlu0 %2701 }
 0x234   : > { %6535 = vmatmul.mubr.msk.bf16.vlgmr.msra.gmra.mrb[8].mxu0 %vm3889_vm1, %v7485_v31  ;;  %v4081_v6 = vsel %vm3889_vm1, %v2681_v36, 0  ;;  %v3006_v32 = vcombine.high %v7940_v48, %v7991_v42  ;;  %v8055_v47 = vrot.slane %v3465_v4, %v7021_v37  ;;  %v8058_v9 = vrot.slane %v6351_v41, %v7021_v37  ;;  %6522 = vmatprep.mubr.msk.bf16.mxu1 %vm3889_vm1, %v7512_v20 }
 0x235   : > { %6538 = vmatprep.mubr.msk.bf16.mxu0 %vm3889_vm1, %v7514_v50  ;;  %v4170_v13 = vsel %vm3889_vm1, %v2685_v19, 0  ;;  %v2399_v31 = vcombine.low %v2380_v18, %v2396_v46  ;;  %6543 = vmatpush3.bf16.xpose.msra.mxu1 %v4081_v6  ;;  %v2400_v36 = vcombine.high %v2380_v18, %v2396_v46  ;;  %v3013_v48 = vrot.slane %v3005_v53, %v7021_v37  ;;  %v9275_v46 = vld [vmem:[#allocation3_spill] sm:$0xff] }
 0x236   : > { %6559 = vmatpush3.bf16.xpose.msra.mxu0 %v4170_v13  ;;  %v3020_v42 = vrot.slane %v3006_v32, %v7021_v37  ;;  %v3057_v30 = vcombine.low %v8006_v1, %v8013_v60  ;;  %v3058_v20 = vcombine.high %v8006_v1, %v8013_v60  ;;  %v2434_v50 = vcombine.high %v7799_v28, %v7802_v40  ;;  %v9277_v32 = vld [vmem:[#allocation15_spill] sm:$0xff] }
 0x237   : > { %v2682_v5 = vpack.c.bf16 %v2399_v31, %v2331_v54  ;;  %v2686_v19 = vpack.c.bf16 %v2400_v36, %v2332_v12  ;;  %v3021_v21 = vcombine.low %v2997_v2, %v3013_v48  ;;  %v3022_v3 = vcombine.high %v2997_v2, %v3013_v48  ;;  %v9274_v54 = vld [vmem:[#allocation6_spill] sm:$0xff]  ;;  %v9276_v12 = vld [vmem:[#allocation12_spill] sm:$0xff]  ;;  %v8120_v36 = vpop.permute.xlu0 %2717 }
 0x238   : > { %v3037_v58 = vcombine.low %v3004_v55, %v3020_v42  ;;  %v8078_v25 = vrot.slane %v3481_v22, %v7021_v37  ;;  %v8081_v62 = vrot.slane %v6352_v51, %v7021_v37  ;;  %v3038_v1 = vcombine.high %v3004_v55, %v3020_v42 }
 0x239   : > { %6659 = vmatprep.subr.msk.bf16.mxu1 %vm3889_vm1, %v2682_v5  ;;  %v8085_v60 = vrot.slane %v3057_v30, %v7021_v37  ;;  %6663 = vmatprep.subr.msk.bf16.mxu0 %vm3889_vm1, %v2686_v19  ;;  %v3029_v28 = vrot.slane %v3021_v21, %v7035_v43  ;;  %v3036_v40 = vrot.slane %v3022_v3, %v7035_v43  ;;  %v4084_v18 = vsel %vm3889_vm1, %v2682_v5, 0  ;;  %v9279_v21 = vld [vmem:[#allocation10_spill] sm:$0xff] }
 0x23a   : > { %v3045_v33 = vrot.slane %v3037_v58, %v7035_v43  ;;  %v3072_v2 = vrot.slane %v3058_v20, %v7021_v37  ;;  %v3052_v57 = vrot.slane %v3038_v1, %v7035_v43  ;;  %v2448_v44 = vrot.slane %v2434_v50, %v7035_v43  ;;  %v9280_v3 = vld [vmem:[#allocation14_spill] sm:$0xff] }
 0x23b   : > { %v2450_v4 = vcombine.high %v7805_v0, %v7808_v52  ;;  %v2502_v41 = vcombine.high %v7815_v27, %v7827_v38  ;;  %v3533_v55 = vcombine.low %v3029_v28, %v3036_v40  ;;  %v6353_v53 = vcombine.high %v3029_v28, %v3036_v40  ;;  %6523 = vmatmul.mubr.msk.bf16.gmra.mrb[4].mxu1 %vm3889_vm1, %v7551_v10  ;;  %v9278_v0 = vld [vmem:[#allocation16_spill] sm:$0xff]  ;;  %v8111_v52 = vpop.permute.xlu1 %2719 }
 0x23c   : > { %6539 = vmatmul.mubr.msk.bf16.gmra.mrb[12].mxu0 %vm3889_vm1, %v9274_v54  ;;  %v2518_v22 = vcombine.high %v9276_v12, %v9275_v46  ;;  %v3549_v51 = vcombine.low %v3045_v33, %v3052_v57  ;;  %v6354_v6 = vcombine.high %v3045_v33, %v3052_v57  ;;  %6550 = vmatprep.mubr.msk.bf16.mxu1 %vm3889_vm1, %v9277_v32  ;;  %v4173_v27 = vsel %vm3889_vm1, %v2686_v19, 0  ;;  %v9281_v40 = vld [vmem:[#allocation4_spill] sm:$0xff]  ;;  %v9282_v33 = vld [vmem:[#allocation2_spill] sm:$0xff]  ;;  %v9286_v46 = vld [vmem:[#allocation19_spill] sm:$0xff] }
 0x23d   : > { %6566 = vmatprep.mubr.msk.bf16.mxu0 %vm3889_vm1, %v9278_v0  ;;  %v2464_v10 = vrot.slane %v2450_v4, %v7035_v43  ;;  %v8114_v38 = vrot.slane %v3533_v55, %v7021_v37  ;;  %v8117_v13 = vrot.slane %v6353_v53, %v7021_v37  ;;  %6545 = vmatpush3.bf16.xpose.msra.mxu1 %v4084_v18  ;;  %v9283_v4 = vld [vmem:[#allocation13_spill] sm:$0xff]  ;;  %v9285_v18 = vld [vmem:[#allocation20_spill] sm:$0xff] }
 0x23e   : > { %6561 = vmatpush3.bf16.xpose.msra.mxu0 %v4173_v27  ;;  %v2516_v31 = vrot.slane %v2502_v41, %v7035_v43  ;;  %v8123_v48 = vrot.slane %v3549_v51, %v7021_v37  ;;  %v8126_v42 = vrot.slane %v6354_v6, %v7021_v37  ;;  %v2532_v30 = vrot.slane %v2518_v22, %v7035_v43  ;;  %v9284_v41 = vld [vmem:[#allocation11_spill] sm:$0xff] }
 0x23f   : > { %v2467_v5 = vcombine.low %v2448_v44, %v2464_v10  ;;  %v2468_v20 = vcombine.high %v2448_v44, %v2464_v10  ;;  %v3073_v50 = vcombine.low %v8038_v24, %v8043_v16  ;;  %v3074_v19 = vcombine.high %v8038_v24, %v8043_v16  ;;  %v2736_v6 = vpop.permute.xlu1 %2735 }
 0x240   : > { %v2570_v58 = vcombine.high %v9280_v3, %v9279_v21  ;;  %v2535_v1 = vcombine.low %v2516_v31, %v2532_v30  ;;  %v2536_v28 = vcombine.high %v2516_v31, %v2532_v30  ;;  %v2586_v57 = vcombine.high %v9282_v33, %v9281_v40  ;;  %v2734_v31 = vpop.permute.xlu0 %2733 }
 0x241   : > { %v2638_v55 = vcombine.high %v9284_v41, %v9283_v4  ;;  %v3081_v53 = vrot.slane %v3073_v50, %v7021_v37  ;;  %v3088_v44 = vrot.slane %v3074_v19, %v7021_v37  ;;  %v2654_v24 = vcombine.high %v9286_v46, %v9285_v18 }
 0x242   : > { %v2584_v54 = vrot.slane %v2570_v58, %v7035_v43  ;;  %v2683_v16 = vpack.c.bf16 %v2535_v1, %v2467_v5  ;;  %v2687_v12 = vpack.c.bf16 %v2536_v28, %v2468_v20  ;;  %v2600_v22 = vrot.slane %v2586_v57, %v7035_v43 }
 0x243   : > { %v2652_v51 = vrot.slane %v2638_v55, %v7035_v43  ;;  %v3089_v32 = vcombine.low %v8085_v60, %v3081_v53  ;;  %v3090_v27 = vcombine.high %v8085_v60, %v3081_v53  ;;  %v3105_v0 = vcombine.low %v3072_v2, %v3088_v44  ;;  %v2752_v18 = vpop.permute.xlu1 %2751 }
 0x244   : > { %v3106_v10 = vcombine.high %v3072_v2, %v3088_v44  ;;  %6660 = vmatprep.subr.msk.bf16.mxu1 %vm3889_vm1, %v2683_v16  ;;  %6664 = vmatprep.subr.msk.bf16.mxu0 %vm3889_vm1, %v2687_v12  ;;  %v4087_v30 = vsel %vm3889_vm1, %v2683_v16, 0  ;;  %v4176_v5 = vsel %vm3889_vm1, %v2687_v12, 0  ;;  %v2603_v20 = vcombine.low %v2584_v54, %v2600_v22 }
 0x245   : > { %v2668_v50 = vrot.slane %v2654_v24, %v7035_v43  ;;  %v3097_v19 = vrot.slane %v3089_v32, %v7035_v43  ;;  %v3104_v21 = vrot.slane %v3090_v27, %v7035_v43  ;;  %v3113_v60 = vrot.slane %v3105_v0, %v7035_v43  ;;  %6547 = vmatpush3.bf16.xpose.msra.mxu1 %v4087_v30 }
 0x246   : > { %v3120_v2 = vrot.slane %v3106_v10, %v7035_v43  ;;  %6563 = vmatpush3.bf16.xpose.msra.mxu0 %v4176_v5  ;;  %v2604_v58 = vcombine.high %v2584_v54, %v2600_v22  ;;  %v3193_v28 = vcombine.low %v8075_v61, %v2734_v31  ;;  %v3194_v53 = vcombine.high %v8075_v61, %v2734_v31 }
 0x247   : > { %v2671_v3 = vcombine.low %v2652_v51, %v2668_v50  ;;  %v2672_v1 = vcombine.high %v2652_v51, %v2668_v50  ;;  %v3601_v40 = vcombine.low %v3097_v19, %v3104_v21  ;;  %v6355_v33 = vcombine.high %v3097_v19, %v3104_v21 }
 0x248   : > { %v3617_v57 = vcombine.low %v3113_v60, %v3120_v2  ;;  %v6356_v4 = vcombine.high %v3113_v60, %v3120_v2  ;;  %v3201_v44 = vrot.slane %v3193_v28, %v7021_v37  ;;  %v3208_v61 = vrot.slane %v3194_v53, %v7021_v37 }
 0x249   : > { %v2684_v41 = vpack.c.bf16 %v2671_v3, %v2603_v20  ;;  %v2688_v55 = vpack.c.bf16 %v2672_v1, %v2604_v58  ;;  %v8161_v46 = vrot.slane %v3601_v40, %v7021_v37  ;;  %v8164_v24 = vrot.slane %v6355_v33, %v7021_v37 }
 0x24a   : > { %v8167_v54 = vrot.slane %v3617_v57, %v7021_v37  ;;  %v8170_v16 = vrot.slane %v6356_v4, %v7021_v37  ;;  %v3261_v12 = vcombine.low %v8073_v11, %v2736_v6  ;;  %v3262_v22 = vcombine.high %v8073_v11, %v2736_v6  ;;  %v2750_v6 = vpop.permute.xlu0 %2749 }
 0x24b   : > { %6661 = vmatprep.subr.msk.bf16.mxu1 %vm3889_vm1, %v2684_v41  ;;  %6665 = vmatprep.subr.msk.bf16.mxu0 %vm3889_vm1, %v2688_v55  ;;  %v4090_v51 = vsel %vm3889_vm1, %v2684_v41, 0  ;;  %v4179_v32 = vsel %vm3889_vm1, %v2688_v55, 0  ;;  %v9287_v27 = vcombine.low %v7897_v39, %v7900_v45  ;;  %v8189_v10 = vrot.slane %v6347_v7, %v7021_v37 }
 0x24c   : > { %v8195_v11 = vrot.slane %v3345_v14, %v7021_v37  ;;  %v3269_v31 = vrot.slane %v3261_v12, %v7021_v37  ;;  %v8199_v30 = vrot.slane %v3262_v22, %v7021_v37  ;;  %v8205_v5 = vrot.slane %v6348_v8, %v7021_v37 }
 0x24d   : > { %v8183_v0 = vrot.slane %v9287_v27, %v7021_v37  ;;  %v8211_v39 = vrot.slane %v3397_v26, %v7021_v37  ;;  %6549 = vmatpush3.bf16.xpose.msra.mxu1 %v4090_v51  ;;  %v8219_v7 = vrot.slane %v6349_v56, %v7021_v37  ;;  %v8225_v35 = vrot.slane %v3413_v15, %v7021_v37  ;;  %v8238_v26 = vpop.permute.xlu1 %2715  ;;  %v9289_v27 = vld [vmem:[#allocation18_spill] sm:$0xff] }
 0x24e   : > { %v8231_v29 = vrot.slane %v6350_v23, %v7021_v37  ;;  %6565 = vmatpush3.bf16.xpose.msra.mxu0 %v4179_v32  ;;  %v3377_v14 = vcombine.low %v8195_v11, %v8205_v5  ;;  %v3209_v63 = vcombine.low %v8120_v36, %v2750_v6  ;;  %v3210_v49 = vcombine.high %v8120_v36, %v2750_v6 }
 0x24f   : > { %v3361_v45 = vcombine.low %v8183_v0, %v8189_v10  ;;  %v3277_v8 = vcombine.low %v8111_v52, %v2752_v18  ;;  %v3429_v15 = vcombine.low %v8211_v39, %v8219_v7  ;;  %v3278_v34 = vcombine.high %v8111_v52, %v2752_v18  ;;  %v9288_v18 = vld [vmem:[#allocation17_spill] sm:$0xff] }
 0x250   : > { %v3445_v17 = vcombine.low %v8225_v35, %v8231_v29  ;;  %v3385_v23 = vrot.slane %v3377_v14, %v7035_v43  ;;  %v3217_v20 = vrot.slane %v3209_v63, %v7021_v37  ;;  %v3224_v36 = vrot.slane %v3210_v49, %v7021_v37 }
 0x251   : > { %v3369_v56 = vrot.slane %v3361_v45, %v7035_v43  ;;  %v3285_v50 = vrot.slane %v3277_v8, %v7021_v37  ;;  %v3437_v19 = vrot.slane %v3429_v15, %v7035_v43  ;;  %v3292_v60 = vrot.slane %v3278_v34, %v7021_v37  ;;  %v2732_v12 = vpop.permute.xlu1 %2731 }
 0x252   : > { %v3453_v21 = vrot.slane %v3445_v17, %v7035_v43  ;;  %v3497_v2 = vcombine.low %v8055_v47, %v8058_v9  ;;  %v3225_v52 = vcombine.low %v3201_v44, %v3217_v20  ;;  %v3226_v1 = vcombine.high %v3201_v44, %v3217_v20 }
 0x253   : > { %v3393_v3 = vcombine.low %v3369_v56, %v3385_v23  ;;  %v3394_v58 = vcombine.high %v3369_v56, %v3385_v23  ;;  %v3241_v33 = vcombine.low %v3208_v61, %v3224_v36  ;;  %v3242_v57 = vcombine.high %v3208_v61, %v3224_v36  ;;  %v9291_v23 = vld [vmem:[#allocation8_spill] sm:$0xff] }
 0x254   : > { %v3461_v28 = vcombine.low %v3437_v19, %v3453_v21  ;;  %v3462_v40 = vcombine.high %v3437_v19, %v3453_v21  ;;  %v3233_v4 = vrot.slane %v3225_v52, %v7035_v43  ;;  %v3240_v41 = vrot.slane %v3226_v1, %v7035_v43  ;;  %6551 = vmatmul.mubr.msk.bf16.vlgmr.msra.gmra.mrb[8].mxu1 %vm3889_vm1, %v9288_v18 }
 0x255   : > { %v3293_v55 = vcombine.low %v3269_v31, %v3285_v50  ;;  %v3294_v53 = vcombine.high %v3269_v31, %v3285_v50  ;;  %v3249_v32 = vrot.slane %v3241_v33, %v7035_v43  ;;  %v3256_v44 = vrot.slane %v3242_v57, %v7035_v43  ;;  %6567 = vmatmul.mubr.msk.bf16.vlgmr.msra.gmra.mrb[16].mxu0 %vm3889_vm1, %v9289_v27  ;;  %v9290_v31 = vld [vmem:[#allocation7_spill] sm:$0xff] }
 0x256   : > { %v3873_v22 = vpack.c.bf16 %v3461_v28, %v3393_v3  ;;  %v3877_v51 = vpack.c.bf16 %v3462_v40, %v3394_v58  ;;  %v3737_v61 = vcombine.low %v3233_v4, %v3240_v41  ;;  %v6359_v6 = vcombine.high %v3233_v4, %v3240_v41  ;;  %6554 = vmatprep.mubr.msk.bf16.mxu1 %vm3889_vm1, %v9290_v31  ;;  %v2748_v58 = vpop.permute.xlu1 %2747  ;;  %v9292_v41 = vld [vmem:[#allocation5_spill] sm:$0xff] }
 0x257   : > { %v3301_v45 = vrot.slane %v3293_v55, %v7035_v43  ;;  %v3308_v14 = vrot.slane %v3294_v53, %v7035_v43  ;;  %v3753_v63 = vcombine.low %v3249_v32, %v3256_v44  ;;  %v6360_v49 = vcombine.high %v3249_v32, %v3256_v44  ;;  %6570 = vmatprep.mubr.msk.bf16.mxu0 %vm3889_vm1, %v9291_v23 }
 0x258   : > { %6574 = vmatprep.subr.bf16.mxu1 %v3873_v22  ;;  %6590 = vmatprep.subr.bf16.mxu0 %v3877_v51  ;;  %v3309_v8 = vcombine.low %v8199_v30, %v3292_v60  ;;  %v8269_v56 = vrot.slane %v3737_v61, %v7021_v37  ;;  %v8272_v15 = vrot.slane %v6359_v6, %v7021_v37 }
 0x259   : > { %v3310_v17 = vcombine.high %v8199_v30, %v3292_v60  ;;  %v3805_v34 = vcombine.low %v3301_v45, %v3308_v14  ;;  %v8278_v20 = vrot.slane %v3753_v63, %v7021_v37  ;;  %v8281_v36 = vrot.slane %v6360_v49, %v7021_v37  ;;  %6575 = vmatpush3.bf16.msra.mxu1 %v3873_v22 }
 0x25a   : > { %v3317_v50 = vrot.slane %v3309_v8, %v7035_v43  ;;  %v6361_v19 = vcombine.high %v3301_v45, %v3308_v14  ;;  %6591 = vmatpush3.bf16.msra.mxu0 %v3877_v51  ;;  %v3505_v30 = vrot.slane %v3497_v2, %v7035_v43  ;;  %v3513_v60 = vcombine.low %v8078_v25, %v8081_v62  ;;  %v9293_v51 = vld [vmem:[#allocation9_spill] sm:$0xff] }
 0x25b   : > { %v3324_v21 = vrot.slane %v3310_v17, %v7035_v43  ;;  %v8286_v3 = vrot.slane %v3805_v34, %v7021_v37  ;;  %v3565_v1 = vcombine.low %v8114_v38, %v8117_v13  ;;  %v3581_v28 = vcombine.low %v8123_v48, %v8126_v42 }
 0x25c   : > { %v8292_v52 = vrot.slane %v6361_v19, %v7021_v37  ;;  %v3125_v40 = vcombine.low %v7976_v59, %v2732_v12  ;;  %v3521_v4 = vrot.slane %v3513_v60, %v7035_v43  ;;  %v3126_v2 = vcombine.high %v7976_v59, %v2732_v12  ;;  %6555 = vmatmul.mubr.msk.bf16.gmra.mrb[12].mxu1 %vm3889_vm1, %v9292_v41 }
 0x25d   : > { %v3821_v33 = vcombine.low %v3317_v50, %v3324_v21  ;;  %v6362_v57 = vcombine.high %v3317_v50, %v3324_v21  ;;  %v3573_v55 = vrot.slane %v3565_v1, %v7035_v43  ;;  %v3589_v53 = vrot.slane %v3581_v28, %v7035_v43  ;;  %6571 = vmatmul.mubr.msk.bf16.gmra.mrb[20].mxu0 %vm3889_vm1, %v9293_v51 }
 0x25e   : > { %v3133_v18 = vrot.slane %v3125_v40, %v7021_v37  ;;  %v3141_v22 = vcombine.low %v8238_v26, %v2748_v58  ;;  %v3529_v59 = vcombine.low %v3505_v30, %v3521_v4  ;;  %v3530_v12 = vcombine.high %v3505_v30, %v3521_v4 }
 0x25f   : > { %v8310_v32 = vrot.slane %v3821_v33, %v7021_v37  ;;  %v8313_v44 = vrot.slane %v6362_v57, %v7021_v37  ;;  %v3597_v27 = vcombine.low %v3573_v55, %v3589_v53  ;;  %v3598_v61 = vcombine.high %v3573_v55, %v3589_v53 }
 0x260   : > { %v3140_v6 = vrot.slane %v3126_v2, %v7021_v37  ;;  %v3142_v45 = vcombine.high %v8238_v26, %v2748_v58  ;;  %v3149_v14 = vrot.slane %v3141_v22, %v7021_v37  ;;  %v3633_v31 = vcombine.low %v8161_v46, %v8164_v24 }
 0x261   : > { %v3649_v63 = vcombine.low %v8167_v54, %v8170_v16  ;;  %v3769_v49 = vcombine.low %v8269_v56, %v8272_v15  ;;  %v3874_v8 = vpack.c.bf16 %v3597_v27, %v3529_v59  ;;  %v3878_v17 = vpack.c.bf16 %v3598_v61, %v3530_v12 }
 0x262   : > { %v3156_v34 = vrot.slane %v3142_v45, %v7021_v37  ;;  %v3785_v23 = vcombine.low %v8278_v20, %v8281_v36  ;;  %v3157_v50 = vcombine.low %v3133_v18, %v3149_v14  ;;  %v3158_v26 = vcombine.high %v3133_v18, %v3149_v14 }
 0x263   : > { %v3641_v19 = vrot.slane %v3633_v31, %v7035_v43  ;;  %v3657_v21 = vrot.slane %v3649_v63, %v7035_v43  ;;  %6576 = vmatprep.subr.bf16.mxu1 %v3874_v8  ;;  %6592 = vmatprep.subr.bf16.mxu0 %v3878_v17  ;;  %v3777_v58 = vrot.slane %v3769_v49, %v7035_v43 }
 0x264   : > { %v3173_v30 = vcombine.low %v3140_v6, %v3156_v34  ;;  %v3174_v60 = vcombine.high %v3140_v6, %v3156_v34  ;;  %6577 = vmatpush3.bf16.msra.mxu1 %v3874_v8  ;;  %6593 = vmatpush3.bf16.msra.mxu0 %v3878_v17  ;;  %v3165_v1 = vrot.slane %v3157_v50, %v7035_v43 }
 0x265   : > { %v3172_v28 = vrot.slane %v3158_v26, %v7035_v43  ;;  %v3665_v40 = vcombine.low %v3641_v19, %v3657_v21  ;;  %v3666_v4 = vcombine.high %v3641_v19, %v3657_v21  ;;  %v3793_v2 = vrot.slane %v3785_v23, %v7035_v43 }
 0x266   : > { %v3181_v33 = vrot.slane %v3173_v30, %v7035_v43  ;;  %v3188_v57 = vrot.slane %v3174_v60, %v7035_v43  ;;  %v3837_v53 = vcombine.low %v8286_v3, %v8292_v52  ;;  %v3853_v18 = vcombine.low %v8310_v32, %v8313_v44 }
 0x267   : > { %v3669_v41 = vcombine.low %v3165_v1, %v3172_v28  ;;  %v6357_v55 = vcombine.high %v3165_v1, %v3172_v28  ;;  %v3801_v59 = vcombine.low %v3777_v58, %v3793_v2  ;;  %v3802_v12 = vcombine.high %v3777_v58, %v3793_v2 }
 0x268   : > { %v3685_v22 = vcombine.low %v3181_v33, %v3188_v57  ;;  %v6358_v51 = vcombine.high %v3181_v33, %v3188_v57  ;;  %v3845_v6 = vrot.slane %v3837_v53, %v7035_v43  ;;  %v3861_v45 = vrot.slane %v3853_v18, %v7035_v43 }
 0x269   : > { %v3676_v27 = vrot.slane %v3669_v41, %v7021_v37  ;;  %v3684_v61 = vrot.slane %v6357_v55, %v7021_v37  ;;  %v3362_v63 = vcombine.high %v8183_v0, %v8189_v10  ;;  %v3378_v49 = vcombine.high %v8195_v11, %v8205_v5 }
 0x26a   : > { %v3692_v14 = vrot.slane %v3685_v22, %v7021_v37  ;;  %v3700_v31 = vrot.slane %v6358_v51, %v7021_v37  ;;  %v3869_v17 = vcombine.low %v3845_v6, %v3861_v45  ;;  %v3870_v34 = vcombine.high %v3845_v6, %v3861_v45 }
 0x26b   : > { %v3701_v8 = vcombine.low %v3676_v27, %v3684_v61  ;;  %v3430_v23 = vcombine.high %v8211_v39, %v8219_v7  ;;  %v3376_v26 = vrot.slane %v3362_v63, %v7035_v43  ;;  %v3392_v19 = vrot.slane %v3378_v49, %v7035_v43 }
 0x26c   : > { %v3717_v50 = vcombine.low %v3692_v14, %v3700_v31  ;;  %v3446_v21 = vcombine.high %v8225_v35, %v8231_v29  ;;  %v3876_v0 = vpack.c.bf16 %v3869_v17, %v3801_v59  ;;  %v3880_v10 = vpack.c.bf16 %v3870_v34, %v3802_v12 }
 0x26d   : > { %v3709_v30 = vrot.slane %v3701_v8, %v7035_v43  ;;  %v3444_v11 = vrot.slane %v3430_v23, %v7035_v43  ;;  %v3395_v60 = vcombine.low %v3376_v26, %v3392_v19  ;;  %v3396_v39 = vcombine.high %v3376_v26, %v3392_v19 }
 0x26e   : > { %v3725_v5 = vrot.slane %v3717_v50, %v7035_v43  ;;  %v3460_v58 = vrot.slane %v3446_v21, %v7035_v43  ;;  %v3498_v7 = vcombine.high %v8055_v47, %v8058_v9  ;;  %v3514_v1 = vcombine.high %v8078_v25, %v8081_v62 }
 0x26f   : > { %v3566_v35 = vcombine.high %v8114_v38, %v8117_v13  ;;  %v3582_v29 = vcombine.high %v8123_v48, %v8126_v42  ;;  %v3634_v42 = vcombine.high %v8161_v46, %v8164_v24  ;;  %v3650_v18 = vcombine.high %v8167_v54, %v8170_v16 }
 0x270   : > { %v3733_v28 = vcombine.low %v3709_v30, %v3725_v5  ;;  %v3734_v33 = vcombine.high %v3709_v30, %v3725_v5  ;;  %v3463_v57 = vcombine.low %v3444_v11, %v3460_v58  ;;  %v3464_v2 = vcombine.high %v3444_v11, %v3460_v58 }
 0x271   : > { %v3512_v41 = vrot.slane %v3498_v7, %v7035_v43  ;;  %v3528_v55 = vrot.slane %v3514_v1, %v7035_v43  ;;  %v3580_v53 = vrot.slane %v3566_v35, %v7035_v43  ;;  %v3596_v47 = vrot.slane %v3582_v29, %v7035_v43 }
 0x272   : > { %v3875_v9 = vpack.c.bf16 %v3733_v28, %v3665_v40  ;;  %v3879_v25 = vpack.c.bf16 %v3734_v33, %v3666_v4  ;;  %v8371_v62 = vpack.c.bf16 %v3463_v57, %v3395_v60  ;;  %v8373_v38 = vpack.c.bf16 %v3464_v2, %v3396_v39 }
 0x273   : > { %v3531_v13 = vcombine.low %v3512_v41, %v3528_v55  ;;  %v3599_v48 = vcombine.low %v3580_v53, %v3596_v47  ;;  %v3702_v22 = vcombine.high %v3676_v27, %v3684_v61  ;;  %v3718_v51 = vcombine.high %v3692_v14, %v3700_v31 }
 0x274   : > { %6578 = vmatprep.subr.bf16.mxu1 %v3875_v9  ;;  %6594 = vmatprep.subr.bf16.mxu0 %v3879_v25  ;;  %v3770_v40 = vcombine.high %v8269_v56, %v8272_v15  ;;  %v3648_v59 = vrot.slane %v3634_v42, %v7035_v43  ;;  %v3664_v12 = vrot.slane %v3650_v18, %v7035_v43 }
 0x275   : > { %6579 = vmatpush3.bf16.msra.mxu1 %v3875_v9  ;;  %6595 = vmatpush3.bf16.msra.mxu0 %v3879_v25  ;;  %v8381_v4 = vpack.c.bf16 %v3599_v48, %v3531_v13  ;;  %v3716_v46 = vrot.slane %v3702_v22, %v7035_v43  ;;  %v3732_v24 = vrot.slane %v3718_v51, %v7035_v43 }
 0x276   : > { %6580 = vmatprep.subr.bf16.mxu1 %v3876_v0  ;;  %6596 = vmatprep.subr.bf16.mxu0 %v3880_v10  ;;  %v3784_v54 = vrot.slane %v3770_v40, %v7035_v43  ;;  %v3667_v16 = vcombine.low %v3648_v59, %v3664_v12  ;;  %v3786_v56 = vcombine.high %v8278_v20, %v8281_v36 }
 0x277   : > { %v3838_v15 = vcombine.high %v8286_v3, %v8292_v52  ;;  %v3854_v27 = vcombine.high %v8310_v32, %v8313_v44  ;;  %v3735_v61 = vcombine.low %v3716_v46, %v3732_v24  ;;  %v3532_v6 = vcombine.high %v3512_v41, %v3528_v55 }
 0x278   : > { %v3600_v45 = vcombine.high %v3580_v53, %v3596_v47  ;;  %v3668_v14 = vcombine.high %v3648_v59, %v3664_v12  ;;  %v3800_v31 = vrot.slane %v3786_v56, %v7035_v43  ;;  %v3736_v3 = vcombine.high %v3716_v46, %v3732_v24 }
 0x279   : > { %6581 = vmatpush3.bf16.msra.mxu1 %v3876_v0  ;;  %6597 = vmatpush3.bf16.msra.mxu0 %v3880_v10  ;;  %v3852_v63 = vrot.slane %v3838_v15, %v7035_v43  ;;  %v3868_v49 = vrot.slane %v3854_v27, %v7035_v43  ;;  %v8399_v20 = vpack.c.bf16 %v3735_v61, %v3667_v16 }
 0x27a   : > { %6606 = vmatprep.subr.bf16.mxu1 %v8371_v62  ;;  %6622 = vmatprep.subr.bf16.mxu0 %v8373_v38  ;;  %v8401_v36 = vpack.c.bf16 %v3600_v45, %v3532_v6  ;;  %v3803_v52 = vcombine.low %v3784_v54, %v3800_v31  ;;  %v3804_v44 = vcombine.high %v3784_v54, %v3800_v31 }
 0x27b   : > { %v3871_v32 = vcombine.low %v3852_v63, %v3868_v49  ;;  %v3872_v8 = vcombine.high %v3852_v63, %v3868_v49  ;;  %v8403_v17 = vpack.c.bf16 %v3736_v3, %v3668_v14 }
 0x27d   : > { %v8405_v34 = vpack.c.bf16 %v3871_v32, %v3803_v52  ;;  %v8407_v23 = vpack.c.bf16 %v3872_v8, %v3804_v44 }
 0x306   : > { %v8409_v50 = vpop.f32.mrb[0].mxu1 }
 0x307   : > { %v8411_v26 = vpop.f32.mrb[8].mxu0  ;;  %v8413_v19 = vpop.f32.mrb[1].mxu1  ;;  %v4253_v30 = vsel %vm4246_vm2, %v8409_v50, -inf }
 0x308   : > { %v8415_v21 = vpop.f32.mrb[9].mxu0  ;;  %4254 = vmax.xlane.f32.xlu1 %v4253_v30  ;;  %v8421_v10 = vpop.f32.mrb[2].mxu1  ;;  %v4247_v11 = vsel %vm4246_vm2, %v8413_v19, -inf  ;;  %v4277_v58 = vsel %vm4246_vm2, %v8411_v26, -inf }
 0x309   : > { %v8419_v0 = vpop.f32.mrb[10].mxu0  ;;  %4248 = vmax.xlane.f32.xlu0 %v4247_v11  ;;  %v8427_v60 = vpop.f32.mrb[3].mxu1  ;;  %v4271_v39 = vsel %vm4246_vm2, %v8415_v21, -inf  ;;  %v4256_v2 = vsel %vm4246_vm2, %v8421_v10, -inf }
 0x30a   : > { %v8425_v5 = vpop.f32.mrb[11].mxu0  ;;  %v4250_v28 = vsel %vm4246_vm2, %v8427_v60, -inf  ;;  %v4280_v47 = vsel %vm4246_vm2, %v8419_v0, -inf }
 0x30b   : > { %v4274_v25 = vsel %vm4246_vm2, %v8425_v5, -inf }
 0x30c   : > { %4278 = vmax.xlane.f32.xlu1 %v4277_v58 }
 0x30d   : > { %4272 = vmax.xlane.f32.xlu0 %v4271_v39 }
 0x30e   : > { %v8433_v7 = vpop.f32.mrb[4].mxu1 }
 0x30f   : > { %v8435_v1 = vpop.f32.mrb[12].mxu0  ;;  %v8437_v35 = vpop.f32.mrb[5].mxu1  ;;  %v4265_v53 = vsel %vm4246_vm2, %v8433_v7, -inf }
 0x310   : > { %v8439_v29 = vpop.f32.mrb[13].mxu0  ;;  %4251 = vmax.xlane.f32.xlu1 %v4250_v28  ;;  %v8445_v57 = vpop.f32.mrb[6].mxu1  ;;  %v4289_v9 = vsel %vm4246_vm2, %v8435_v1, -inf  ;;  %v4259_v48 = vsel %vm4246_vm2, %v8437_v35, -inf }
 0x311   : > { %v8443_v33 = vpop.f32.mrb[14].mxu0  ;;  %4257 = vmax.xlane.f32.xlu0 %v4256_v2  ;;  %v8451_v55 = vpop.f32.mrb[7].mxu1  ;;  %v4283_v42 = vsel %vm4246_vm2, %v8439_v29, -inf  ;;  %v4268_v18 = vsel %vm4246_vm2, %v8445_v57, -inf }
 0x312   : > { %v8449_v41 = vpop.f32.mrb[15].mxu0  ;;  %v4262_v13 = vsel %vm4246_vm2, %v8451_v55, -inf  ;;  %v4292_v12 = vsel %vm4246_vm2, %v8443_v33, -inf }
 0x313   : > { %v4286_v27 = vsel %vm4246_vm2, %v8449_v41, -inf }
 0x314   : > { %4266 = vmax.xlane.f32.xlu1 %v4265_v53 }
 0x315   : > { %4281 = vmax.xlane.f32.xlu0 %v4280_v47 }
 0x318   : > { %4290 = vmax.xlane.f32.xlu1 %v4289_v9 }
 0x319   : > { %4275 = vmax.xlane.f32.xlu0 %v4274_v25 }
 0x31c   : > { %4263 = vmax.xlane.f32.xlu1 %v4262_v13 }
 0x31d   : > { %4260 = vmax.xlane.f32.xlu0 %v4259_v48 }
 0x321   : > { %4284 = vmax.xlane.f32.xlu0 %v4283_v42 }
 0x325   : > { %4269 = vmax.xlane.f32.xlu0 %v4268_v18 }
 0x327   : > { %v8469_v22 = vpop.f32.mrb[8].mxu1 }
 0x328   : > { %v8471_v51 = vpop.f32.mrb[16].mxu0  ;;  %v8473_v40 = vpop.f32.mrb[9].mxu1  ;;  %v4301_v59 = vsel %vm4246_vm2, %v8469_v22, -inf }
 0x329   : > { %v8479_v46 = vpop.f32.mrb[17].mxu0  ;;  %4302 = vmax.xlane.f32.xlu1 %v4301_v59  ;;  %v8481_v24 = vpop.f32.mrb[10].mxu1  ;;  %4293 = vmax.xlane.f32.xlu0 %v4292_v12  ;;  %v4325_v15 = vsel %vm4246_vm2, %v8471_v51, -inf  ;;  %v4295_v14 = vsel %vm4246_vm2, %v8473_v40, -inf }
 0x32a   : > { %v8483_v54 = vpop.f32.mrb[18].mxu0  ;;  %v8485_v16 = vpop.f32.mrb[11].mxu1  ;;  %v4304_v31 = vsel %vm4246_vm2, %v8481_v24, -inf  ;;  %v4319_v44 = vsel %vm4246_vm2, %v8479_v46, -inf }
 0x32b   : > { %v8487_v56 = vpop.f32.mrb[19].mxu0  ;;  %v4328_v8 = vsel %vm4246_vm2, %v8483_v54, -inf  ;;  %v4298_v11 = vsel %vm4246_vm2, %v8485_v16, -inf }
 0x32c   : > { %v4322_v39 = vsel %vm4246_vm2, %v8487_v56, -inf }
 0x32d   : > { %4326 = vmax.xlane.f32.xlu1 %v4325_v15  ;;  %4287 = vmax.xlane.f32.xlu0 %v4286_v27 }
 0x32f   : > { %v8493_v61 = vpop.f32.mrb[12].mxu1 }
 0x330   : > { %v8495_v6 = vpop.f32.mrb[20].mxu0  ;;  %v8497_v45 = vpop.f32.mrb[13].mxu1  ;;  %v4313_v30 = vsel %vm4246_vm2, %v8493_v61, -inf }
 0x331   : > { %v8503_v63 = vpop.f32.mrb[21].mxu0  ;;  %4296 = vmax.xlane.f32.xlu1 %v4295_v14  ;;  %v8505_v49 = vpop.f32.mrb[14].mxu1  ;;  %4305 = vmax.xlane.f32.xlu0 %v4304_v31  ;;  %v4307_v58 = vsel %vm4246_vm2, %v8497_v45, -inf  ;;  %v4337_v53 = vsel %vm4246_vm2, %v8495_v6, -inf }
 0x332   : > { %v8507_v3 = vpop.f32.mrb[22].mxu0  ;;  %v8509_v52 = vpop.f32.mrb[15].mxu1  ;;  %v4331_v28 = vsel %vm4246_vm2, %v8503_v63, -inf  ;;  %v4316_v2 = vsel %vm4246_vm2, %v8505_v49, -inf }
 0x333   : > { %v8511_v32 = vpop.f32.mrb[23].mxu0  ;;  %v4310_v47 = vsel %vm4246_vm2, %v8509_v52, -inf  ;;  %v4340_v25 = vsel %vm4246_vm2, %v8507_v3, -inf }
 0x334   : > { %v4334_v9 = vsel %vm4246_vm2, %v8511_v32, -inf }
 0x335   : > { %4320 = vmax.xlane.f32.xlu1 %v4319_v44  ;;  %4329 = vmax.xlane.f32.xlu0 %v4328_v8 }
 0x339   : > { %4314 = vmax.xlane.f32.xlu1 %v4313_v30  ;;  %4299 = vmax.xlane.f32.xlu0 %v4298_v11 }
 0x33d   : > { %4308 = vmax.xlane.f32.xlu1 %v4307_v58  ;;  %4323 = vmax.xlane.f32.xlu0 %v4322_v39 }
 0x341   : > { %4332 = vmax.xlane.f32.xlu1 %v4331_v28  ;;  %4317 = vmax.xlane.f32.xlu0 %v4316_v2 }
 0x345   : > { %4338 = vmax.xlane.f32.xlu1 %v4337_v53  ;;  %4311 = vmax.xlane.f32.xlu0 %v4310_v47 }
 0x349   : > { %4335 = vmax.xlane.f32.xlu0 %v4334_v9 }
 0x34d   : > { %4341 = vmax.xlane.f32.xlu0 %v4340_v25 }
 0x395   : > { %v4255_v13 = vpop.xlane.xlu1 %4254 }
 0x396   : > { %v4345_v48 = vsub.f32 %v8409_v50, %v4255_v13  ;;  %v4249_v42 = vpop.xlane.xlu0 %4248 }
 0x397   : > { %v4343_v59 = vsub.f32 %v8413_v19, %v4249_v42 }
 0x398   : > { %v4379_v18 = vmul.f32 1.442695, %v4345_v48 }
 0x399   : > { %v4279_v12 = vpop.xlane.xlu1 %4278  ;;  %v4375_v14 = vmul.f32 1.442695, %v4343_v59 }
 0x39a   : > { %6748 = vpow2.f32 %v4379_v18  ;;  %v4353_v15 = vsub.f32 %v8411_v26, %v4279_v12  ;;  %v4273_v27 = vpop.xlane.xlu0 %4272 }
 0x39b   : > { %v4351_v44 = vsub.f32 %v8415_v21, %v4273_v27 }
 0x39c   : > { %v4395_v31 = vmul.f32 1.442695, %v4353_v15 }
 0x39d   : > { %v4252_v8 = vpop.xlane.xlu1 %4251  ;;  %v4391_v58 = vmul.f32 1.442695, %v4351_v44 }
 0x39e   : > { %6750 = vpow2.f32 %v4395_v31  ;;  %v4344_v30 = vsub.f32 %v8427_v60, %v4252_v8  ;;  %v4258_v11 = vpop.xlane.xlu0 %4257 }
 0x39f   : > { %v4346_v50 = vsub.f32 %v8421_v10, %v4258_v11  ;;  %6752 = vpow2.f32 %v4375_v14 }
 0x3a0   : > { %v4377_v39 = vmul.f32 1.442695, %v4344_v30 }
 0x3a1   : > { %v4381_v19 = vmul.f32 1.442695, %v4346_v50  ;;  %v4267_v28 = vpop.xlane.xlu1 %4266 }
 0x3a2   : > { %6754 = vpow2.f32 %v4377_v39  ;;  %v4349_v26 = vsub.f32 %v8433_v7, %v4267_v28  ;;  %v4282_v2 = vpop.xlane.xlu0 %4281 }
 0x3a3   : > { %6756 = vpow2.f32 %v4381_v19  ;;  %v4354_v53 = vsub.f32 %v8419_v0, %v4282_v2 }
 0x3a4   : > { %v6749_v21 = vpop.eup %6748  ;;  %6758 = vpow2.f32 %v4391_v58  ;;  %v4387_v47 = vmul.f32 1.442695, %v4349_v26 }
 0x3a5   : > { %v4397_v9 = vmul.f32 1.442695, %v4354_v53  ;;  %v4291_v60 = vpop.xlane.xlu1 %4290  ;;  %v4445_v25 = vsel %vm4246_vm2, %v6749_v21, 0.0 }
 0x3a6   : > { %v4357_v10 = vsub.f32 %v8435_v1, %v4291_v60  ;;  %v4276_v13 = vpop.xlane.xlu0 %4275  ;;  %4446 = vadd.xlane.f32.xlu1 %v4445_v25 }
 0x3a7   : > { %6760 = vpow2.f32 %v4397_v9  ;;  %v4352_v48 = vsub.f32 %v8425_v5, %v4276_v13 }
 0x3a8   : > { %v8548_v42 = vpop.eup %6750  ;;  %6762 = vpow2.f32 %v4387_v47  ;;  %v4403_v7 = vmul.f32 1.442695, %v4357_v10 }
 0x3a9   : > { %v4393_v18 = vmul.f32 1.442695, %v4352_v48  ;;  %v4264_v0 = vpop.xlane.xlu1 %4263  ;;  %v4469_v59 = vsel %vm4246_vm2, %v8548_v42, 0.0  ;;  %v6753_v12 = vpop.eup %6752 }
 0x3aa   : > { %v4348_v15 = vsub.f32 %v8451_v55, %v4264_v0  ;;  %v4261_v27 = vpop.xlane.xlu0 %4260  ;;  %4470 = vadd.xlane.f32.xlu1 %v4469_v59  ;;  %v4439_v8 = vsel %vm4246_vm2, %v6753_v12, 0.0 }
 0x3ab   : > { %6764 = vpow2.f32 %v4393_v18  ;;  %v4347_v1 = vsub.f32 %v8437_v35, %v4261_v27 }
 0x3ac   : > { %v6755_v14 = vpop.eup %6754  ;;  %v4385_v31 = vmul.f32 1.442695, %v4348_v15  ;;  %6766 = vpow2.f32 %v4403_v7 }
 0x3ad   : > { %v6757_v5 = vpop.eup %6756  ;;  %v4383_v44 = vmul.f32 1.442695, %v4347_v1  ;;  %v4535_v30 = vpack.c.bf16 %v6755_v14, %v6753_v12  ;;  %v4442_v10 = vsel %vm4246_vm2, %v6755_v14, 0.0 }
 0x3ae   : > { %v6759_v11 = vpop.eup %6758  ;;  %v4536_v50 = vpack.c.bf16 %v6757_v5, %v6749_v21  ;;  %6768 = vpow2.f32 %v4385_v31  ;;  %v4285_v58 = vpop.xlane.xlu0 %4284  ;;  %4440 = vadd.xlane.f32.xlu1 %v4439_v8  ;;  %v4448_v55 = vsel %vm4246_vm2, %v6757_v5, 0.0 }
 0x3af   : > { %6770 = vpow2.f32 %v4383_v44  ;;  %v4355_v39 = vsub.f32 %v8439_v29, %v4285_v58  ;;  %4449 = vadd.xlane.f32.xlu0 %v4448_v55  ;;  %6582 = vmatprep.mubr.msk.bf16.mxu1 %vm4246_vm2, %v4535_v30  ;;  %v4463_v28 = vsel %vm4246_vm2, %v6759_v11, 0.0 }
 0x3b0   : > { %6583 = vmatmul.mubr.msk.bf16.vlgmr.msra.gmra.mrb[16].mxu1 %vm4246_vm2, %v4536_v50 }
 0x3b1   : > { %v6761_v35 = vpop.eup %6760  ;;  %v4399_v19 = vmul.f32 1.442695, %v4355_v39  ;;  %6607 = vmatpush3.bf16.msra.mxu1 %v8371_v62 }
 0x3b2   : > { %v8561_v26 = vpop.eup %6762  ;;  %v4540_v2 = vpack.c.bf16 %v6761_v35, %v8548_v42  ;;  %6608 = vmatprep.subr.bf16.mxu1 %v8381_v4  ;;  %v4270_v53 = vpop.xlane.xlu0 %4269  ;;  %4464 = vadd.xlane.f32.xlu1 %v4463_v28  ;;  %v4472_v29 = vsel %vm4246_vm2, %v6761_v35, 0.0 }
 0x3b3   : > { %v4350_v21 = vsub.f32 %v8445_v57, %v4270_v53  ;;  %4473 = vadd.xlane.f32.xlu0 %v4472_v29  ;;  %6772 = vpow2.f32 %v4399_v19  ;;  %v4457_v62 = vsel %vm4246_vm2, %v8561_v26, 0.0 }
 0x3b5   : > { %v6765_v47 = vpop.eup %6764  ;;  %v4389_v9 = vmul.f32 1.442695, %v4350_v21  ;;  %6609 = vmatpush3.bf16.msra.mxu1 %v8381_v4 }
 0x3b6   : > { %6610 = vmatprep.subr.bf16.mxu1 %v8399_v20  ;;  %v4303_v60 = vpop.xlane.xlu1 %4302  ;;  %v4294_v25 = vpop.xlane.xlu0 %4293  ;;  %4458 = vadd.xlane.f32.xlu1 %v4457_v62  ;;  %v4539_v13 = vpack.c.bf16 %v6765_v47, %v6759_v11 }
 0x3b7   : > { %v8572_v48 = vpop.eup %6766  ;;  %6774 = vpow2.f32 %v4389_v9  ;;  %v4361_v57 = vsub.f32 %v8469_v22, %v4303_v60  ;;  %v4358_v42 = vsub.f32 %v8443_v33, %v4294_v25  ;;  %4443 = vadd.xlane.f32.xlu0 %v4442_v10 }
 0x3b8   : > { %v8576_v4 = vpop.eup %6768  ;;  %6598 = vmatprep.mubr.msk.bf16.mxu0 %vm4246_vm2, %v4539_v13  ;;  %v4481_v33 = vsel %vm4246_vm2, %v8572_v48, 0.0 }
 0x3b9   : > { %v6771_v7 = vpop.eup %6770  ;;  %v4411_v18 = vmul.f32 1.442695, %v4361_v57  ;;  %v4405_v0 = vmul.f32 1.442695, %v4358_v42  ;;  %6611 = vmatpush3.bf16.msra.mxu1 %v8399_v20  ;;  %6599 = vmatmul.mubr.msk.bf16.vlgmr.msra.gmra.mrb[24].mxu0 %vm4246_vm2, %v4540_v2  ;;  %v4466_v20 = vsel %vm4246_vm2, %v6765_v47, 0.0 }
 0x3ba   : > { %6612 = vmatprep.subr.bf16.mxu1 %v8405_v34  ;;  %6623 = vmatpush3.bf16.msra.mxu0 %v8373_v38  ;;  %v4327_v59 = vpop.xlane.xlu1 %4326  ;;  %v4288_v22 = vpop.xlane.xlu0 %4287  ;;  %v4537_v12 = vpack.c.bf16 %v8576_v4, %v6771_v7 }
 0x3bb   : > { %6776 = vpow2.f32 %v4411_v18  ;;  %v4369_v15 = vsub.f32 %v8471_v51, %v4327_v59  ;;  %v4356_v27 = vsub.f32 %v8449_v41, %v4288_v22  ;;  %6624 = vmatprep.subr.bf16.mxu0 %v8401_v36  ;;  %4482 = vadd.xlane.f32.xlu1 %v4481_v33  ;;  %v4451_v51 = vsel %vm4246_vm2, %v6771_v7, 0.0 }
 0x3bc   : > { %6778 = vpow2.f32 %v4405_v0  ;;  %4467 = vadd.xlane.f32.xlu0 %v4466_v20  ;;  %6586 = vmatprep.mubr.msk.bf16.mxu1 %vm4246_vm2, %v4537_v12 }
 0x3bd   : > { %v4427_v38 = vmul.f32 1.442695, %v4369_v15  ;;  %v4401_v1 = vmul.f32 1.442695, %v4356_v27  ;;  %6613 = vmatpush3.bf16.msra.mxu1 %v8405_v34  ;;  %v6773_v41 = vpop.eup %6772 }
 0x3be   : > { %6625 = vmatpush3.bf16.msra.mxu0 %v8401_v36  ;;  %v4297_v14 = vpop.xlane.xlu1 %4296  ;;  %v4306_v31 = vpop.xlane.xlu0 %4305  ;;  %v4475_v50 = vsel %vm4246_vm2, %v6773_v41, 0.0 }
 0x3bf   : > { %6780 = vpow2.f32 %v4427_v38  ;;  %v4359_v5 = vsub.f32 %v8473_v40, %v4297_v14  ;;  %v4362_v44 = vsub.f32 %v8481_v24, %v4306_v31  ;;  %6626 = vmatprep.subr.bf16.mxu0 %v8403_v17  ;;  %4452 = vadd.xlane.f32.xlu1 %v4451_v51 }
 0x3c0   : > { %6782 = vpow2.f32 %v4401_v1 }
 0x3c1   : > { %v6775_v8 = vpop.eup %6774  ;;  %v4407_v30 = vmul.f32 1.442695, %v4359_v5  ;;  %v4413_v11 = vmul.f32 1.442695, %v4362_v44 }
 0x3c2   : > { %6627 = vmatpush3.bf16.msra.mxu0 %v8403_v17  ;;  %v4321_v36 = vpop.xlane.xlu1 %4320  ;;  %v4330_v34 = vpop.xlane.xlu0 %4329  ;;  %v4460_v58 = vsel %vm4246_vm2, %v6775_v8, 0.0  ;;  %v4538_v55 = vpack.c.bf16 %v6775_v8, %v8561_v26 }
 0x3c3   : > { %6784 = vpow2.f32 %v4407_v30  ;;  %v4367_v40 = vsub.f32 %v8479_v46, %v4321_v36  ;;  %v4370_v24 = vsub.f32 %v8483_v54, %v4330_v34  ;;  %6628 = vmatprep.subr.bf16.mxu0 %v8407_v23  ;;  %4476 = vadd.xlane.f32.xlu1 %v4475_v50 }
 0x3c4   : > { %6786 = vpow2.f32 %v4413_v11  ;;  %4461 = vadd.xlane.f32.xlu0 %v4460_v58  ;;  %6587 = vmatmul.mubr.msk.bf16.gmra.mrb[20].mxu1 %vm4246_vm2, %v4538_v55 }
 0x3c5   : > { %v8605_v17 = vpop.eup %6776  ;;  %v4423_v39 = vmul.f32 1.442695, %v4367_v40  ;;  %v4429_v35 = vmul.f32 1.442695, %v4370_v24 }
 0x3c6   : > { %v6779_v19 = vpop.eup %6778  ;;  %6629 = vmatpush3.bf16.msra.mxu0 %v8407_v23  ;;  %v4315_v28 = vpop.xlane.xlu1 %4314  ;;  %v4493_v46 = vsel %vm4246_vm2, %v8605_v17, 0.0 }
 0x3c7   : > { %v4300_v26 = vpop.xlane.xlu0 %4299  ;;  %6788 = vpow2.f32 %v4423_v39  ;;  %v4365_v54 = vsub.f32 %v8493_v61, %v4315_v28  ;;  %4494 = vadd.xlane.f32.xlu1 %v4493_v46  ;;  %v4484_v53 = vsel %vm4246_vm2, %v6779_v19, 0.0  ;;  %v4542_v29 = vpack.c.bf16 %v6779_v19, %v8572_v48 }
 0x3c8   : > { %v4360_v2 = vsub.f32 %v8485_v16, %v4300_v26  ;;  %6790 = vpow2.f32 %v4429_v35  ;;  %4485 = vadd.xlane.f32.xlu0 %v4484_v53  ;;  %v4454_v16 = vsel %vm4246_vm2, %v8576_v4, 0.0 }
 0x3c9   : > { %v8614_v21 = vpop.eup %6780  ;;  %v4419_v23 = vmul.f32 1.442695, %v4365_v54 }
 0x3ca   : > { %v4409_v47 = vmul.f32 1.442695, %v4360_v2  ;;  %v6783_v9 = vpop.eup %6782  ;;  %v4309_v62 = vpop.xlane.xlu1 %4308  ;;  %v4517_v25 = vsel %vm4246_vm2, %v8614_v21, 0.0 }
 0x3cb   : > { %v4324_v60 = vpop.xlane.xlu0 %4323  ;;  %6792 = vpow2.f32 %v4419_v23  ;;  %v4363_v61 = vsub.f32 %v8497_v45, %v4309_v62  ;;  %4518 = vadd.xlane.f32.xlu1 %v4517_v25  ;;  %v4541_v13 = vpack.c.bf16 %v6783_v9, %v6773_v41  ;;  %v4478_v45 = vsel %vm4246_vm2, %v6783_v9, 0.0 }
 0x3cc   : > { %v4368_v10 = vsub.f32 %v8487_v56, %v4324_v60  ;;  %6794 = vpow2.f32 %v4409_v47  ;;  %4455 = vadd.xlane.f32.xlu0 %v4454_v16 }
 0x3cd   : > { %v6785_v48 = vpop.eup %6784  ;;  %v4415_v57 = vmul.f32 1.442695, %v4363_v61  ;;  %6602 = vmatprep.mubr.msk.bf16.mxu0 %vm4246_vm2, %v4541_v13 }
 0x3ce   : > { %v4425_v42 = vmul.f32 1.442695, %v4368_v10  ;;  %v6787_v7 = vpop.eup %6786  ;;  %6603 = vmatmul.mubr.msk.bf16.gmra.mrb[28].mxu0 %vm4246_vm2, %v4542_v29  ;;  %v4333_v18 = vpop.xlane.xlu1 %4332  ;;  %v4487_v4 = vsel %vm4246_vm2, %v6785_v48, 0.0 }
 0x3cf   : > { %v4318_v0 = vpop.xlane.xlu0 %4317  ;;  %v4544_v56 = vpack.c.bf16 %v6787_v7, %v8605_v17  ;;  %6796 = vpow2.f32 %v4415_v57  ;;  %v4371_v59 = vsub.f32 %v8503_v63, %v4333_v18  ;;  %4488 = vadd.xlane.f32.xlu1 %v4487_v4  ;;  %v4496_v14 = vsel %vm4246_vm2, %v6787_v7, 0.0 }
 0x3d0   : > { %v4366_v22 = vsub.f32 %v8505_v49, %v4318_v0  ;;  %6798 = vpow2.f32 %v4425_v42  ;;  %4479 = vadd.xlane.f32.xlu0 %v4478_v45 }
 0x3d1   : > { %v6789_v33 = vpop.eup %6788  ;;  %v4431_v12 = vmul.f32 1.442695, %v4371_v59 }
 0x3d2   : > { %v4421_v15 = vmul.f32 1.442695, %v4366_v22  ;;  %v6791_v27 = vpop.eup %6790  ;;  %v4339_v20 = vpop.xlane.xlu1 %4338  ;;  %v4511_v1 = vsel %vm4246_vm2, %v6789_v33, 0.0 }
 0x3d3   : > { %v4312_v38 = vpop.xlane.xlu0 %4311  ;;  %v4548_v31 = vpack.c.bf16 %v6791_v27, %v8614_v21  ;;  %6800 = vpow2.f32 %v4431_v12  ;;  %v4373_v63 = vsub.f32 %v8495_v6, %v4339_v20  ;;  %4512 = vadd.xlane.f32.xlu1 %v4511_v1  ;;  %v4520_v36 = vsel %vm4246_vm2, %v6791_v27, 0.0 }
 0x3d4   : > { %v4364_v49 = vsub.f32 %v8509_v52, %v4312_v38  ;;  %6802 = vpow2.f32 %v4421_v15  ;;  %4497 = vadd.xlane.f32.xlu0 %v4496_v14 }
 0x3d5   : > { %v6793_v51 = vpop.eup %6792  ;;  %v4435_v41 = vmul.f32 1.442695, %v4373_v63 }
 0x3d6   : > { %v4417_v5 = vmul.f32 1.442695, %v4364_v49  ;;  %v6795_v44 = vpop.eup %6794  ;;  %v4505_v30 = vsel %vm4246_vm2, %v6793_v51, 0.0 }
 0x3d7   : > { %v4336_v8 = vpop.xlane.xlu0 %4335  ;;  %6804 = vpow2.f32 %v4435_v41  ;;  %4506 = vadd.xlane.f32.xlu1 %v4505_v30  ;;  %v4543_v34 = vpack.c.bf16 %v6795_v44, %v6785_v48 }
 0x3d8   : > { %v4372_v11 = vsub.f32 %v8511_v32, %v4336_v8  ;;  %6806 = vpow2.f32 %v4417_v5  ;;  %4521 = vadd.xlane.f32.xlu0 %v4520_v36  ;;  %v4490_v32 = vsel %vm4246_vm2, %v6795_v44, 0.0 }
 0x3d9   : > { %v6797_v6 = vpop.eup %6796  ;;  %6614 = vmatprep.mubr.msk.bf16.mxu1 %vm4246_vm2, %v4543_v34 }
 0x3da   : > { %v4433_v52 = vmul.f32 1.442695, %v4372_v11  ;;  %v6799_v50 = vpop.eup %6798  ;;  %6615 = vmatmul.mubr.msk.bf16.vlgmr.msra.gmra.mrb[24].mxu1 %vm4246_vm2, %v4544_v56  ;;  %v4499_v55 = vsel %vm4246_vm2, %v6797_v6, 0.0 }
 0x3db   : > { %v4342_v58 = vpop.xlane.xlu0 %4341  ;;  %4500 = vadd.xlane.f32.xlu1 %v4499_v55  ;;  %v4547_v24 = vpack.c.bf16 %v6799_v50, %v6789_v33  ;;  %v4514_v28 = vsel %vm4246_vm2, %v6799_v50, 0.0 }
 0x3dc   : > { %6808 = vpow2.f32 %v4433_v52  ;;  %v4374_v40 = vsub.f32 %v8507_v3, %v4342_v58  ;;  %4491 = vadd.xlane.f32.xlu0 %v4490_v32 }
 0x3dd   : > { %v6801_v17 = vpop.eup %6800  ;;  %6630 = vmatprep.mubr.msk.bf16.mxu0 %vm4246_vm2, %v4547_v24 }
 0x3de   : > { %v4437_v39 = vmul.f32 1.442695, %v4374_v40  ;;  %v6803_v35 = vpop.eup %6802  ;;  %6631 = vmatmul.mubr.msk.bf16.vlgmr.msra.gmra.mrb[32].mxu0 %vm4246_vm2, %v4548_v31  ;;  %v4523_v19 = vsel %vm4246_vm2, %v6801_v17, 0.0 }
 0x3df   : > { %4524 = vadd.xlane.f32.xlu1 %v4523_v19  ;;  %v4546_v26 = vpack.c.bf16 %v6803_v35, %v6793_v51  ;;  %v4508_v2 = vsel %vm4246_vm2, %v6803_v35, 0.0 }
 0x3e0   : > { %6810 = vpow2.f32 %v4437_v39  ;;  %4515 = vadd.xlane.f32.xlu0 %v4514_v28 }
 0x3e1   : > { %v6805_v3 = vpop.eup %6804 }
 0x3e2   : > { %v6807_v46 = vpop.eup %6806  ;;  %v4529_v54 = vsel %vm4246_vm2, %v6805_v3, 0.0 }
 0x3e3   : > { %4530 = vadd.xlane.f32.xlu1 %v4529_v54  ;;  %v4545_v53 = vpack.c.bf16 %v6807_v46, %v6797_v6  ;;  %v4502_v23 = vsel %vm4246_vm2, %v6807_v46, 0.0 }
 0x3e4   : > { %4509 = vadd.xlane.f32.xlu0 %v4508_v2 }
 0x3e5   : > { %6618 = vmatprep.mubr.msk.bf16.mxu1 %vm4246_vm2, %v4545_v53 }
 0x3e6   : > { %v6809_v29 = vpop.eup %6808  ;;  %6619 = vmatmul.mubr.msk.bf16.gmra.mrb[28].mxu1 %vm4246_vm2, %v4546_v26 }
 0x3e7   : > { %v4549_v21 = vpack.c.bf16 %v6809_v29, %v6801_v17  ;;  %v4526_v62 = vsel %vm4246_vm2, %v6809_v29, 0.0 }
 0x3e8   : > { %4503 = vadd.xlane.f32.xlu0 %v4502_v23 }
 0x3e9   : > { %6634 = vmatprep.mubr.msk.bf16.mxu0 %vm4246_vm2, %v4549_v21 }
 0x3ea   : > { %v6811_v47 = vpop.eup %6810 }
 0x3eb   : > { %v4550_v9 = vpack.c.bf16 %v6811_v47, %v6805_v3  ;;  %v4532_v60 = vsel %vm4246_vm2, %v6811_v47, 0.0 }
 0x3ec   : > { %4527 = vadd.xlane.f32.xlu0 %v4526_v62 }
 0x3ed   : > { %6635 = vmatmul.mubr.msk.bf16.gmra.mrb[36].mxu0 %vm4246_vm2, %v4550_v9 }
 0x3f0   : > { %4533 = vadd.xlane.f32.xlu0 %v4532_v60 }
 0x433   : > { %v4447_v25 = vpop.xlane.xlu1 %4446 }
 0x434   : > { %6812 = vrcp.f32 %v4447_v25 }
 0x437   : > { %v4471_v16 = vpop.xlane.xlu1 %4470 }
 0x438   : > { %6814 = vrcp.f32 %v4471_v16 }
 0x43b   : > { %v4441_v10 = vpop.xlane.xlu1 %4440 }
 0x43c   : > { %v4450_v61 = vpop.xlane.xlu0 %4449  ;;  %6816 = vrcp.f32 %v4441_v10 }
 0x43d   : > { %6818 = vrcp.f32 %v4450_v61 }
 0x43e   : > { %v6813_v11 = vpop.eup %6812 }
 0x43f   : > { %v4465_v48 = vpop.xlane.xlu1 %4464 }
 0x440   : > { %v4474_v13 = vpop.xlane.xlu0 %4473  ;;  %6820 = vrcp.f32 %v4465_v48 }
 0x441   : > { %6822 = vrcp.f32 %v4474_v13 }
 0x442   : > { %v6815_v34 = vpop.eup %6814 }
 0x443   : > { %v4459_v42 = vpop.xlane.xlu1 %4458 }
 0x444   : > { %v4444_v57 = vpop.xlane.xlu0 %4443  ;;  %6824 = vrcp.f32 %v4459_v42 }
 0x445   : > { %6826 = vrcp.f32 %v4444_v57 }
 0x446   : > { %v6817_v52 = vpop.eup %6816 }
 0x447   : > { %v6819_v55 = vpop.eup %6818 }
 0x448   : > { %v4483_v0 = vpop.xlane.xlu1 %4482 }
 0x449   : > { %v4468_v7 = vpop.xlane.xlu0 %4467  ;;  %6828 = vrcp.f32 %v4483_v0 }
 0x44a   : > { %6830 = vrcp.f32 %v4468_v7  ;;  %v6821_v32 = vpop.eup %6820 }
 0x44b   : > { %v6823_v17 = vpop.eup %6822 }
 0x44c   : > { %v4453_v45 = vpop.xlane.xlu1 %4452 }
 0x44d   : > { %6832 = vrcp.f32 %v4453_v45 }
 0x44e   : > { %v6825_v39 = vpop.eup %6824 }
 0x44f   : > { %v6827_v19 = vpop.eup %6826 }
 0x450   : > { %v4477_v59 = vpop.xlane.xlu1 %4476 }
 0x451   : > { %v4462_v18 = vpop.xlane.xlu0 %4461  ;;  %6834 = vrcp.f32 %v4477_v59 }
 0x452   : > { %6836 = vrcp.f32 %v4462_v18 }
 0x453   : > { %v6829_v28 = vpop.eup %6828 }
 0x454   : > { %v4495_v33 = vpop.xlane.xlu1 %4494  ;;  %v6831_v3 = vpop.eup %6830 }
 0x455   : > { %v4486_v4 = vpop.xlane.xlu0 %4485  ;;  %6838 = vrcp.f32 %v4495_v33 }
 0x456   : > { %6840 = vrcp.f32 %v4486_v4 }
 0x457   : > { %v6833_v46 = vpop.eup %6832 }
 0x458   : > { %v4519_v15 = vpop.xlane.xlu1 %4518 }
 0x459   : > { %v4456_v56 = vpop.xlane.xlu0 %4455  ;;  %6842 = vrcp.f32 %v4519_v15 }
 0x45a   : > { %6844 = vrcp.f32 %v4456_v56 }
 0x45b   : > { %v6835_v54 = vpop.eup %6834 }
 0x45c   : > { %v4489_v14 = vpop.xlane.xlu1 %4488  ;;  %v6837_v53 = vpop.eup %6836 }
 0x45d   : > { %v4480_v22 = vpop.xlane.xlu0 %4479  ;;  %6846 = vrcp.f32 %v4489_v14 }
 0x45e   : > { %6848 = vrcp.f32 %v4480_v22 }
 0x45f   : > { %v6839_v23 = vpop.eup %6838 }
 0x460   : > { %v4513_v49 = vpop.xlane.xlu1 %4512  ;;  %v6841_v9 = vpop.eup %6840 }
 0x461   : > { %v4498_v12 = vpop.xlane.xlu0 %4497  ;;  %6850 = vrcp.f32 %v4513_v49 }
 0x462   : > { %6852 = vrcp.f32 %v4498_v12 }
 0x463   : > { %v8675_v25 = vpop.eup %6842 }
 0x464   : > { %v4507_v30 = vpop.xlane.xlu1 %4506  ;;  %v6845_v16 = vpop.eup %6844 }
 0x465   : > { %v4522_v20 = vpop.xlane.xlu0 %4521  ;;  %6854 = vrcp.f32 %v4507_v30 }
 0x466   : > { %6856 = vrcp.f32 %v4522_v20 }
 0x467   : > { %v6847_v61 = vpop.eup %6846 }
 0x468   : > { %v4501_v50 = vpop.xlane.xlu1 %4500  ;;  %v6849_v10 = vpop.eup %6848 }
 0x469   : > { %v4492_v63 = vpop.xlane.xlu0 %4491  ;;  %6858 = vrcp.f32 %v4501_v50 }
 0x46a   : > { %6860 = vrcp.f32 %v4492_v63 }
 0x46b   : > { %v6851_v48 = vpop.eup %6850 }
 0x46c   : > { %v4525_v26 = vpop.xlane.xlu1 %4524  ;;  %v6853_v57 = vpop.eup %6852 }
 0x46d   : > { %v4516_v8 = vpop.xlane.xlu0 %4515  ;;  %6862 = vrcp.f32 %v4525_v26 }
 0x46e   : > { %6864 = vrcp.f32 %v4516_v8 }
 0x46f   : > { %v8677_v42 = vpop.eup %6854 }
 0x470   : > { %v4531_v62 = vpop.xlane.xlu1 %4530  ;;  %v6857_v7 = vpop.eup %6856 }
 0x471   : > { %v4510_v36 = vpop.xlane.xlu0 %4509  ;;  %6866 = vrcp.f32 %v4531_v62 }
 0x472   : > { %6868 = vrcp.f32 %v4510_v36 }
 0x473   : > { %v8683_v56 = vpop.eup %6858 }
 0x475   : > { %v4504_v35 = vpop.xlane.xlu0 %4503 }
 0x476   : > { %6870 = vrcp.f32 %v4504_v35 }
 0x479   : > { %v4528_v29 = vpop.xlane.xlu0 %4527 }
 0x47a   : > { %6872 = vrcp.f32 %v4528_v29 }
 0x47d   : > { %v4534_v13 = vpop.xlane.xlu0 %4533 }
 0x47e   : > { %6874 = vrcp.f32 %v4534_v13 }
 0x483   : > { %v8655_v27 = vpop.f32.mrb[16].mxu1 }
 0x484   : > { %v8657_v38 = vpop.f32.mrb[17].mxu1  ;;  %v4893_v18 = vmul.f32 %v6813_v11, %v8655_v27  ;;  %v6861_v27 = vpop.eup %6860 }
 0x485   : > { %v8659_v1 = vpop.f32.mrb[18].mxu1  ;;  %v4891_v0 = vmul.f32 %v6817_v52, %v8657_v38  ;;  %v8703_v63 = vpop.eup %6862 }
 0x486   : > { %v8661_v31 = vpop.f32.mrb[19].mxu1  ;;  %v4894_v4 = vmul.f32 %v6819_v55, %v8659_v1  ;;  %v6865_v8 = vpop.eup %6864 }
 0x487   : > { %v4892_v45 = vmul.f32 %v6827_v19, %v8661_v31  ;;  %v8713_v52 = vpop.eup %6866 }
 0x48c   : > { %v8663_v51 = vpop.f32.mrb[24].mxu0 }
 0x48d   : > { %v8665_v41 = vpop.f32.mrb[25].mxu0  ;;  %v4901_v59 = vmul.f32 %v6815_v34, %v8663_v51 }
 0x48e   : > { %v8667_v5 = vpop.f32.mrb[26].mxu0  ;;  %v8687_v22 = vmul.f32 %v6821_v32, %v8665_v41 }
 0x48f   : > { %v8669_v44 = vpop.f32.mrb[27].mxu0  ;;  %v8690_v33 = vmul.f32 %v6823_v17, %v8667_v5 }
 0x490   : > { %v8693_v12 = vmul.f32 %v6831_v3, %v8669_v44 }
 0x497   : > { %v8671_v6 = vpop.f32.mrb[20].mxu1 }
 0x498   : > { %v8673_v58 = vpop.f32.mrb[21].mxu1  ;;  %v8696_v20 = vmul.f32 %v6825_v39, %v8671_v6 }
 0x499   : > { %v6589_v40 = vpop.f32.mrb[22].mxu1  ;;  %v8699_v38 = vmul.f32 %v6833_v46, %v8673_v58 }
 0x49a   : > { %v4616_v24 = vpop.f32.mrb[23].mxu1  ;;  %v8701_v1 = vmul.f32 %v6837_v53, %v6589_v40 }
 0x49b   : > { %v8705_v49 = vmul.f32 %v6845_v16, %v4616_v24  ;;  %v8717_v24 = vpop.eup %6868 }
 0x49c   : > { %v8721_v26 = vpop.eup %6870 }
 0x49d   : > { %v8725_v29 = vpop.eup %6872 }
 0x4a1   : > { %v6604_v2 = vpop.f32.mrb[28].mxu0 }
 0x4a2   : > { %v4690_v21 = vpop.f32.mrb[29].mxu0  ;;  %v8707_v51 = vmul.f32 %v6829_v28, %v6604_v2 }
 0x4a3   : > { %v6605_v47 = vpop.f32.mrb[30].mxu0  ;;  %v8709_v41 = vmul.f32 %v6835_v54, %v4690_v21 }
 0x4a4   : > { %v4693_v60 = vpop.f32.mrb[31].mxu0  ;;  %v8711_v30 = vmul.f32 %v6841_v9, %v6605_v47 }
 0x4a5   : > { %v8715_v50 = vmul.f32 %v6849_v10, %v4693_v60  ;;  %v8734_v60 = vpop.eup %6874 }
 0x4ad   : > { %v6616_v15 = vpop.f32.mrb[24].mxu1 }
 0x4ae   : > { %v4909_v14 = vmul.f32 %v6839_v23, %v6616_v15  ;;  %v4751_v31 = vpop.f32.mrb[25].mxu1 }
 0x4af   : > { %v4907_v5 = vmul.f32 %v6847_v61, %v4751_v31  ;;  %v6617_v44 = vpop.f32.mrb[26].mxu1 }
 0x4b0   : > { %v5059_v11 = vcombine.low %v4893_v18, %v4909_v14  ;;  %v5060_v36 = vcombine.high %v4893_v18, %v4909_v14  ;;  %v4910_v34 = vmul.f32 %v6853_v57, %v6617_v44  ;;  %v4754_v6 = vpop.f32.mrb[27].mxu1 }
 0x4b1   : > { %v4923_v58 = vcombine.low %v4891_v0, %v4907_v5  ;;  %v4924_v55 = vcombine.high %v4891_v0, %v4907_v5  ;;  %v4908_v40 = vmul.f32 %v6861_v27, %v4754_v6  ;;  %v6632_v32 = vpop.f32.mrb[32].mxu0 }
 0x4b2   : > { %v5067_v17 = vrot.slane %v5059_v11, %v7021_v37  ;;  %v5074_v39 = vrot.slane %v5060_v36, %v7021_v37  ;;  %v5127_v35 = vcombine.low %v4894_v4, %v4910_v34  ;;  %v5128_v19 = vcombine.high %v4894_v4, %v4910_v34  ;;  %v4828_v28 = vpop.f32.mrb[33].mxu0 }
 0x4b3   : > { %v4931_v3 = vrot.slane %v4923_v58, %v7021_v37  ;;  %v4938_v46 = vrot.slane %v4924_v55, %v7021_v37  ;;  %v4991_v54 = vcombine.low %v4892_v45, %v4908_v40  ;;  %v4992_v2 = vcombine.high %v4892_v45, %v4908_v40  ;;  %v6633_v53 = vpop.f32.mrb[34].mxu0 }
 0x4b4   : > { %v8728_v21 = vrot.slane %v5127_v35, %v7021_v37  ;;  %v8731_v23 = vrot.slane %v5128_v19, %v7021_v37  ;;  %v4917_v47 = vmul.f32 %v8675_v25, %v6632_v32  ;;  %v4915_v9 = vmul.f32 %v6851_v48, %v4828_v28  ;;  %v4831_v62 = vpop.f32.mrb[35].mxu0 }
 0x4b5   : > { %v8737_v16 = vrot.slane %v4991_v54, %v7021_v37  ;;  %v8740_v61 = vrot.slane %v4992_v2, %v7021_v37  ;;  %v4918_v10 = vmul.f32 %v6857_v7, %v6633_v53  ;;  %v4916_v13 = vmul.f32 %v6865_v8, %v4831_v62 }
 0x4b6   : > { %v5075_v57 = vcombine.low %v4901_v59, %v4917_v47  ;;  %v5076_v18 = vcombine.high %v4901_v59, %v4917_v47  ;;  %v4939_v0 = vcombine.low %v8687_v22, %v4915_v9  ;;  %v4940_v4 = vcombine.high %v8687_v22, %v4915_v9 }
 0x4b7   : > { %v5143_v25 = vcombine.low %v8690_v33, %v4918_v10  ;;  %v5144_v48 = vcombine.high %v8690_v33, %v4918_v10  ;;  %v5007_v45 = vcombine.low %v8693_v12, %v4916_v13  ;;  %v5008_v15 = vcombine.high %v8693_v12, %v4916_v13 }
 0x4b8   : > { %v5083_v27 = vrot.slane %v5075_v57, %v7021_v37  ;;  %v5090_v14 = vrot.slane %v5076_v18, %v7021_v37  ;;  %v4947_v7 = vrot.slane %v4939_v0, %v7021_v37  ;;  %v4954_v59 = vrot.slane %v4940_v4, %v7021_v37 }
 0x4b9   : > { %v5151_v31 = vrot.slane %v5143_v25, %v7021_v37  ;;  %v5158_v22 = vrot.slane %v5144_v48, %v7021_v37  ;;  %v5015_v5 = vrot.slane %v5007_v45, %v7021_v37  ;;  %v5022_v33 = vrot.slane %v5008_v15, %v7021_v37  ;;  %v8756_v44 = vpop.f32.mrb[28].mxu1 }
 0x4ba   : > { %v5091_v8 = vcombine.low %v5067_v17, %v5083_v27  ;;  %v5092_v12 = vcombine.high %v5067_v17, %v5083_v27  ;;  %v5107_v11 = vcombine.low %v5074_v39, %v5090_v14  ;;  %v5108_v36 = vcombine.high %v5074_v39, %v5090_v14  ;;  %v8758_v34 = vpop.f32.mrb[29].mxu1 }
 0x4bb   : > { %v4955_v6 = vcombine.low %v4931_v3, %v4947_v7  ;;  %v4956_v58 = vcombine.high %v4931_v3, %v4947_v7  ;;  %v4971_v55 = vcombine.low %v4938_v46, %v4954_v59  ;;  %v4972_v40 = vcombine.high %v4938_v46, %v4954_v59  ;;  %v8760_v32 = vpop.f32.mrb[30].mxu1 }
 0x4bc   : > { %v5099_v35 = vrot.slane %v5091_v8, %v7035_v43  ;;  %v5106_v19 = vrot.slane %v5092_v12, %v7035_v43  ;;  %v5115_v28 = vrot.slane %v5107_v11, %v7035_v43  ;;  %v5122_v54 = vrot.slane %v5108_v36, %v7035_v43  ;;  %v4770_v2 = vpop.f32.mrb[31].mxu1 }
 0x4bd   : > { %v4963_v17 = vrot.slane %v4955_v6, %v7035_v43  ;;  %v4970_v39 = vrot.slane %v4956_v58, %v7035_v43  ;;  %v4979_v53 = vrot.slane %v4971_v55, %v7035_v43  ;;  %v4986_v3 = vrot.slane %v4972_v40, %v7035_v43 }
 0x4be   : > { %v5603_v46 = vcombine.low %v5099_v35, %v5106_v19  ;;  %v6399_v47 = vcombine.high %v5099_v35, %v5106_v19  ;;  %v5619_v9 = vcombine.low %v5115_v28, %v5122_v54  ;;  %v6400_v62 = vcombine.high %v5115_v28, %v5122_v54 }
 0x4bf   : > { %v5467_v10 = vcombine.low %v4963_v17, %v4970_v39  ;;  %v6395_v13 = vcombine.high %v4963_v17, %v4970_v39  ;;  %v5483_v57 = vcombine.low %v4979_v53, %v4986_v3  ;;  %v6396_v18 = vcombine.high %v4979_v53, %v4986_v3 }
 0x4c0   : > { %v6636_v0 = vpop.f32.mrb[36].mxu0  ;;  %v8771_v4 = vrot.slane %v5603_v46, %v7021_v37  ;;  %v8774_v25 = vrot.slane %v6399_v47, %v7021_v37  ;;  %v8777_v48 = vrot.slane %v5619_v9, %v7021_v37  ;;  %v8780_v45 = vrot.slane %v6400_v62, %v7021_v37 }
 0x4c1   : > { %v4844_v15 = vpop.f32.mrb[37].mxu0  ;;  %v8783_v27 = vrot.slane %v5467_v10, %v7021_v37  ;;  %v8786_v14 = vrot.slane %v6395_v13, %v7021_v37  ;;  %v8789_v7 = vrot.slane %v5483_v57, %v7021_v37  ;;  %v8792_v59 = vrot.slane %v6396_v18, %v7021_v37 }
 0x4c2   : > { %v6637_v8 = vpop.f32.mrb[38].mxu0  ;;  %v5159_v12 = vcombine.low %v8728_v21, %v5151_v31  ;;  %v5160_v11 = vcombine.high %v8728_v21, %v5151_v31  ;;  %v5175_v36 = vcombine.low %v8731_v23, %v5158_v22  ;;  %v5176_v6 = vcombine.high %v8731_v23, %v5158_v22 }
 0x4c3   : > { %v4847_v58 = vpop.f32.mrb[39].mxu0  ;;  %v5023_v55 = vcombine.low %v8737_v16, %v5015_v5  ;;  %v5024_v40 = vcombine.high %v8737_v16, %v5015_v5  ;;  %v5039_v35 = vcombine.low %v8740_v61, %v5022_v33  ;;  %v5040_v19 = vcombine.high %v8740_v61, %v5022_v33 }
 0x4c4   : > { %v5167_v28 = vrot.slane %v5159_v12, %v7035_v43  ;;  %v5174_v54 = vrot.slane %v5160_v11, %v7035_v43  ;;  %v5183_v17 = vrot.slane %v5175_v36, %v7035_v43  ;;  %v5190_v21 = vrot.slane %v5176_v6, %v7035_v43 }
 0x4c5   : > { %v5031_v31 = vrot.slane %v5023_v55, %v7035_v43  ;;  %v5038_v23 = vrot.slane %v5024_v40, %v7035_v43  ;;  %v5047_v22 = vrot.slane %v5039_v35, %v7035_v43  ;;  %v5054_v16 = vrot.slane %v5040_v19, %v7035_v43 }
 0x4c6   : > { %v5671_v5 = vcombine.low %v5167_v28, %v5174_v54  ;;  %v6401_v39 = vcombine.high %v5167_v28, %v5174_v54  ;;  %v5687_v53 = vcombine.low %v5183_v17, %v5190_v21  ;;  %v6402_v61 = vcombine.high %v5183_v17, %v5190_v21 }
 0x4c7   : > { %v5535_v33 = vcombine.low %v5031_v31, %v5038_v23  ;;  %v6397_v3 = vcombine.high %v5031_v31, %v5038_v23  ;;  %v5551_v46 = vcombine.low %v5047_v22, %v5054_v16  ;;  %v6398_v47 = vcombine.high %v5047_v22, %v5054_v16 }
 0x4c8   : > { %v8811_v9 = vrot.slane %v5671_v5, %v7021_v37  ;;  %v8814_v62 = vrot.slane %v6401_v39, %v7021_v37  ;;  %v8817_v10 = vrot.slane %v5687_v53, %v7021_v37  ;;  %v8820_v13 = vrot.slane %v6402_v61, %v7021_v37 }
 0x4c9   : > { %v8823_v57 = vrot.slane %v5535_v33, %v7021_v37  ;;  %v8826_v18 = vrot.slane %v6397_v3, %v7021_v37  ;;  %v8829_v12 = vrot.slane %v5551_v46, %v7021_v37  ;;  %v8832_v11 = vrot.slane %v6398_v47, %v7021_v37 }
 0x4ca   : > { %v4913_v36 = vmul.f32 %v8677_v42, %v8756_v44  ;;  %v4911_v6 = vmul.f32 %v8683_v56, %v8758_v34  ;;  %v4914_v55 = vmul.f32 %v8717_v24, %v8760_v32  ;;  %v4912_v40 = vmul.f32 %v8721_v26, %v4770_v2 }
 0x4cb   : > { %v4921_v35 = vmul.f32 %v8713_v52, %v6636_v0  ;;  %v4919_v19 = vmul.f32 %v8703_v63, %v4844_v15  ;;  %v4922_v28 = vmul.f32 %v8734_v60, %v6637_v8  ;;  %v4920_v54 = vmul.f32 %v8725_v29, %v4847_v58 }
 0x4cc   : > { %v5331_v17 = vcombine.low %v8696_v20, %v4913_v36  ;;  %v5332_v42 = vcombine.high %v8696_v20, %v4913_v36  ;;  %v5195_v44 = vcombine.low %v8699_v38, %v4911_v6  ;;  %v5196_v56 = vcombine.high %v8699_v38, %v4911_v6 }
 0x4cd   : > { %v5399_v24 = vcombine.low %v8701_v1, %v4914_v55  ;;  %v5400_v26 = vcombine.high %v8701_v1, %v4914_v55  ;;  %v5263_v52 = vcombine.low %v8705_v49, %v4912_v40  ;;  %v5264_v63 = vcombine.high %v8705_v49, %v4912_v40 }
 0x4ce   : > { %v5339_v60 = vrot.slane %v5331_v17, %v7021_v37  ;;  %v5346_v29 = vrot.slane %v5332_v42, %v7021_v37  ;;  %v5203_v34 = vrot.slane %v5195_v44, %v7021_v37  ;;  %v5210_v20 = vrot.slane %v5196_v56, %v7021_v37 }
 0x4cf   : > { %v5407_v32 = vrot.slane %v5399_v24, %v7021_v37  ;;  %v8859_v38 = vrot.slane %v5400_v26, %v7021_v37  ;;  %v8862_v2 = vrot.slane %v5263_v52, %v7021_v37  ;;  %v8865_v1 = vrot.slane %v5264_v63, %v7021_v37 }
 0x4d0   : > { %v5347_v49 = vcombine.low %v8707_v51, %v4921_v35  ;;  %v5348_v0 = vcombine.high %v8707_v51, %v4921_v35  ;;  %v5211_v15 = vcombine.low %v8709_v41, %v4919_v19  ;;  %v5212_v8 = vcombine.high %v8709_v41, %v4919_v19 }
 0x4d1   : > { %v5415_v58 = vcombine.low %v8711_v30, %v4922_v28  ;;  %v5416_v21 = vcombine.high %v8711_v30, %v4922_v28  ;;  %v5279_v31 = vcombine.low %v8715_v50, %v4920_v54  ;;  %v5280_v23 = vcombine.high %v8715_v50, %v4920_v54 }
 0x4d2   : > { %v5355_v22 = vrot.slane %v5347_v49, %v7021_v37  ;;  %v5362_v16 = vrot.slane %v5348_v0, %v7021_v37  ;;  %v5219_v5 = vrot.slane %v5211_v15, %v7021_v37  ;;  %v5226_v51 = vrot.slane %v5212_v8, %v7021_v37 }
 0x4d3   : > { %v5423_v39 = vrot.slane %v5415_v58, %v7021_v37  ;;  %v5430_v41 = vrot.slane %v5416_v21, %v7021_v37  ;;  %v5287_v53 = vrot.slane %v5279_v31, %v7021_v37  ;;  %v5294_v30 = vrot.slane %v5280_v23, %v7021_v37 }
 0x4d4   : > { %v5363_v61 = vcombine.low %v5339_v60, %v5355_v22  ;;  %v5364_v33 = vcombine.high %v5339_v60, %v5355_v22  ;;  %v5379_v3 = vcombine.low %v5346_v29, %v5362_v16  ;;  %v5380_v50 = vcombine.high %v5346_v29, %v5362_v16 }
 0x4d5   : > { %v5227_v46 = vcombine.low %v5203_v34, %v5219_v5  ;;  %v5228_v47 = vcombine.high %v5203_v34, %v5219_v5  ;;  %v5243_v36 = vcombine.low %v5210_v20, %v5226_v51  ;;  %v5244_v6 = vcombine.high %v5210_v20, %v5226_v51 }
 0x4d6   : > { %v5371_v55 = vrot.slane %v5363_v61, %v7035_v43  ;;  %v5378_v40 = vrot.slane %v5364_v33, %v7035_v43  ;;  %v5387_v35 = vrot.slane %v5379_v3, %v7035_v43  ;;  %v5394_v19 = vrot.slane %v5380_v50, %v7035_v43 }
 0x4d7   : > { %v5235_v28 = vrot.slane %v5227_v46, %v7035_v43  ;;  %v5242_v54 = vrot.slane %v5228_v47, %v7035_v43  ;;  %v5251_v17 = vrot.slane %v5243_v36, %v7035_v43  ;;  %v5258_v42 = vrot.slane %v5244_v6, %v7035_v43 }
 0x4d8   : > { %v5875_v44 = vcombine.low %v5371_v55, %v5378_v40  ;;  %v6407_v56 = vcombine.high %v5371_v55, %v5378_v40  ;;  %v5891_v24 = vcombine.low %v5387_v35, %v5394_v19  ;;  %v6408_v26 = vcombine.high %v5387_v35, %v5394_v19 }
 0x4d9   : > { %v5739_v52 = vcombine.low %v5235_v28, %v5242_v54  ;;  %v6403_v63 = vcombine.high %v5235_v28, %v5242_v54  ;;  %v5755_v60 = vcombine.low %v5251_v17, %v5258_v42  ;;  %v6404_v29 = vcombine.high %v5251_v17, %v5258_v42 }
 0x4da   : > { %v8892_v34 = vrot.slane %v5875_v44, %v7021_v37  ;;  %v8895_v20 = vrot.slane %v6407_v56, %v7021_v37  ;;  %v8898_v49 = vrot.slane %v5891_v24, %v7021_v37  ;;  %v8901_v0 = vrot.slane %v6408_v26, %v7021_v37 }
 0x4db   : > { %v8904_v15 = vrot.slane %v5739_v52, %v7021_v37  ;;  %v8907_v8 = vrot.slane %v6403_v63, %v7021_v37  ;;  %v8910_v58 = vrot.slane %v5755_v60, %v7021_v37  ;;  %v8913_v21 = vrot.slane %v6404_v29, %v7021_v37 }
 0x4dc   : > { %v5431_v31 = vcombine.low %v5407_v32, %v5423_v39  ;;  %v5432_v23 = vcombine.high %v5407_v32, %v5423_v39  ;;  %v5447_v22 = vcombine.low %v8859_v38, %v5430_v41  ;;  %v5448_v16 = vcombine.high %v8859_v38, %v5430_v41 }
 0x4dd   : > { %v5295_v5 = vcombine.low %v8862_v2, %v5287_v53  ;;  %v5296_v51 = vcombine.high %v8862_v2, %v5287_v53  ;;  %v5311_v61 = vcombine.low %v8865_v1, %v5294_v30  ;;  %v5312_v33 = vcombine.high %v8865_v1, %v5294_v30 }
 0x4de   : > { %v5439_v3 = vrot.slane %v5431_v31, %v7035_v43  ;;  %v5446_v50 = vrot.slane %v5432_v23, %v7035_v43  ;;  %v5455_v46 = vrot.slane %v5447_v22, %v7035_v43  ;;  %v5462_v32 = vrot.slane %v5448_v16, %v7035_v43 }
 0x4df   : > { %v5303_v39 = vrot.slane %v5295_v5, %v7035_v43  ;;  %v5310_v38 = vrot.slane %v5296_v51, %v7035_v43  ;;  %v5319_v41 = vrot.slane %v5311_v61, %v7035_v43  ;;  %v5326_v2 = vrot.slane %v5312_v33, %v7035_v43 }
 0x4e0   : > { %v5943_v53 = vcombine.low %v5439_v3, %v5446_v50  ;;  %v6409_v47 = vcombine.high %v5439_v3, %v5446_v50  ;;  %v5959_v36 = vcombine.low %v5455_v46, %v5462_v32  ;;  %v6410_v1 = vcombine.high %v5455_v46, %v5462_v32 }
 0x4e1   : > { %v5807_v30 = vcombine.low %v5303_v39, %v5310_v38  ;;  %v6405_v6 = vcombine.high %v5303_v39, %v5310_v38  ;;  %v5823_v55 = vcombine.low %v5319_v41, %v5326_v2  ;;  %v6406_v40 = vcombine.high %v5319_v41, %v5326_v2 }
 0x4e2   : > { %v8930_v35 = vrot.slane %v5943_v53, %v7021_v37  ;;  %v8933_v19 = vrot.slane %v6409_v47, %v7021_v37  ;;  %v8936_v28 = vrot.slane %v5959_v36, %v7021_v37  ;;  %v8939_v54 = vrot.slane %v6410_v1, %v7021_v37 }
 0x4e3   : > { %v8942_v17 = vrot.slane %v5807_v30, %v7021_v37  ;;  %v8945_v42 = vrot.slane %v6405_v6, %v7021_v37  ;;  %v8948_v44 = vrot.slane %v5823_v55, %v7021_v37  ;;  %v8951_v56 = vrot.slane %v6406_v40, %v7021_v37 }
 0x4e4   : > { %v5636_v24 = vcombine.high %v8771_v4, %v8774_v25  ;;  %v5652_v26 = vcombine.high %v8777_v48, %v8780_v45  ;;  %v5704_v52 = vcombine.high %v8811_v9, %v8814_v62  ;;  %v5720_v63 = vcombine.high %v8817_v10, %v8820_v13 }
 0x4e5   : > { %v5635_v60 = vcombine.low %v8771_v4, %v8774_v25  ;;  %v5651_v29 = vcombine.low %v8777_v48, %v8780_v45  ;;  %v5703_v37 = vcombine.low %v8811_v9, %v8814_v62  ;;  %v5719_v31 = vcombine.low %v8817_v10, %v8820_v13  ;;  %v6746_v4 = vld [vmem:[%s9183_s2] sm:$0xff]  }
 0x4e6   : > { %v5650_v23 = vrot.slane %v5636_v24, %v7035_v43  ;;  %v5666_v22 = vrot.slane %v5652_v26, %v7035_v43  ;;  %v5718_v16 = vrot.slane %v5704_v52, %v7035_v43  ;;  %v5734_v5 = vrot.slane %v5720_v63, %v7035_v43  ;;  %6638 = vmatprep.subr.bf16.mxu1 %v6746_v4 }
 0x4e7   : > { %v8977_v25 = vrot.slane %v5635_v60, %v7035_v43  ;;  %v8980_v48 = vrot.slane %v5651_v29, %v7035_v43  ;;  %v8983_v45 = vrot.slane %v5703_v37, %v7035_v43  ;;  %v8986_v9 = vrot.slane %v5719_v31, %v7035_v43  ;;  %6639 = vmatpush3.bf16.msra.mxu1 %v6746_v4 }
 0x4e8   : > { %v5669_v62 = vcombine.low %v5650_v23, %v5666_v22  ;;  %v5737_v10 = vcombine.low %v5718_v16, %v5734_v5  ;;  %v5670_v13 = vcombine.high %v5650_v23, %v5666_v22  ;;  %v5738_v51 = vcombine.high %v5718_v16, %v5734_v5 }
 0x4e9   : > { %v5668_v61 = vcombine.high %v8977_v25, %v8980_v48  ;;  %v5736_v33 = vcombine.high %v8983_v45, %v8986_v9  ;;  %v5500_v3 = vcombine.high %v8783_v27, %v8786_v14  ;;  %v5516_v50 = vcombine.high %v8789_v7, %v8792_v59 }
 0x4ea   : > { %v6689_v46 = vpack.i.bf16 %v5737_v10, %v5669_v62  ;;  %v6694_v32 = vpack.i.bf16 %v5738_v51, %v5670_v13  ;;  %v5568_v39 = vcombine.high %v8823_v57, %v8826_v18  ;;  %v5584_v38 = vcombine.high %v8829_v12, %v8832_v11 }
 0x4eb   : > { %v6684_v41 = vpack.i.bf16 %v5736_v33, %v5668_v61  ;;  %v5514_v2 = vrot.slane %v5500_v3, %v7035_v43  ;;  %v5530_v53 = vrot.slane %v5516_v50, %v7035_v43  ;;  %v5499_v47 = vcombine.low %v8783_v27, %v8786_v14 }
 0x4ec   : > { %6690 = vrot.lane.b32.xlu1 %v6689_v46, %s6891_s6  ;;  %v5582_v36 = vrot.slane %v5568_v39, %v7035_v43  ;;  %v5598_v1 = vrot.slane %v5584_v38, %v7035_v43  ;;  %v5515_v30 = vcombine.low %v8789_v7, %v8792_v59  ;;  %v5567_v6 = vcombine.low %v8823_v57, %v8826_v18  ;;  %v6747_v57 = vld [vmem:[%s9183_s2 + $0x8] sm:$0xff]  }
 0x4ed   : > { %6685 = vrot.lane.b32.xlu0 %v6684_v41, %s6892_s7  ;;  %v5534_v55 = vcombine.high %v5514_v2, %v5530_v53  ;;  %v9013_v40 = vrot.slane %v5499_v47, %v7035_v43  ;;  %v5583_v27 = vcombine.low %v8829_v12, %v8832_v11  ;;  %v5533_v14 = vcombine.low %v5514_v2, %v5530_v53 }
 0x4ee   : > { %v5602_v24 = vcombine.high %v5582_v36, %v5598_v1  ;;  %v9018_v26 = vrot.slane %v5515_v30, %v7035_v43  ;;  %v9021_v7 = vrot.slane %v5567_v6, %v7035_v43  ;;  %v5601_v59 = vcombine.low %v5582_v36, %v5598_v1  ;;  %6640 = vmatprep.subr.bf16.mxu1 %v6747_v57 }
 0x4ef   : > { %v9027_v18 = vrot.slane %v5583_v27, %v7035_v43  ;;  %v5771_v52 = vcombine.low %v8904_v15, %v8907_v8  ;;  %v5787_v12 = vcombine.low %v8910_v58, %v8913_v21  ;;  %v5839_v11 = vcombine.low %v8942_v17, %v8945_v42  ;;  %6641 = vmatpush3.bf16.msra.mxu1 %v6747_v57 }
 0x4f0   : > { %6695 = vrot.lane.b32.xlu1 %v6694_v32, %s6893_s10  ;;  %v6709_v63 = vpack.i.bf16 %v5602_v24, %v5534_v55  ;;  %v5532_v60 = vcombine.high %v9013_v40, %v9018_v26  ;;  %v6704_v29 = vpack.i.bf16 %v5601_v59, %v5533_v14  ;;  %v5855_v37 = vcombine.low %v8948_v44, %v8951_v56 }
 0x4f1   : > { %v5600_v31 = vcombine.high %v9021_v7, %v9027_v18  ;;  %v9043_v23 = vrot.slane %v5771_v52, %v7035_v43  ;;  %v9046_v22 = vrot.slane %v5787_v12, %v7035_v43  ;;  %v9049_v16 = vrot.slane %v5839_v11, %v7035_v43 }
 0x4f2   : > { %6710 = vrot.lane.b32.xlu0 %v6709_v63, %s6893_s10  ;;  %v9053_v5 = vrot.slane %v5855_v37, %v7035_v43  ;;  %v5907_v4 = vcombine.low %v8892_v34, %v8895_v20  ;;  %v5923_v62 = vcombine.low %v8898_v49, %v8901_v0  ;;  %v5975_v10 = vcombine.low %v8930_v35, %v8933_v19 }
 0x4f3   : > { %v6699_v13 = vpack.i.bf16 %v5600_v31, %v5532_v60  ;;  %v5804_v51 = vcombine.high %v9043_v23, %v9046_v22  ;;  %v5991_v61 = vcombine.low %v8936_v28, %v8939_v54  ;;  %v5772_v33 = vcombine.high %v8904_v15, %v8907_v8 }
 0x4f4   : > { %v5872_v3 = vcombine.high %v9049_v16, %v9053_v5  ;;  %v9070_v50 = vrot.slane %v5907_v4, %v7035_v43  ;;  %v9073_v46 = vrot.slane %v5923_v62, %v7035_v43  ;;  %v9076_v32 = vrot.slane %v5975_v10, %v7035_v43 }
 0x4f5   : > { %6700 = vrot.lane.b32.xlu1 %v6699_v13, %s6892_s7  ;;  %v9080_v39 = vrot.slane %v5991_v61, %v7035_v43  ;;  %v5786_v15 = vrot.slane %v5772_v33, %v7035_v43  ;;  %v5788_v8 = vcombine.high %v8910_v58, %v8913_v21  ;;  %v5840_v38 = vcombine.high %v8942_v17, %v8945_v42 }
 0x4f6   : > { %v6724_v41 = vpack.i.bf16 %v5872_v3, %v5804_v51  ;;  %v5940_v2 = vcombine.high %v9070_v50, %v9073_v46  ;;  %v5856_v53 = vcombine.high %v8948_v44, %v8951_v56  ;;  %v5908_v47 = vcombine.high %v8892_v34, %v8895_v20 }
 0x4f7   : > { %v6008_v36 = vcombine.high %v9076_v32, %v9080_v39  ;;  %v5802_v1 = vrot.slane %v5788_v8, %v7035_v43  ;;  %v5854_v58 = vrot.slane %v5840_v38, %v7035_v43  ;;  %v5924_v21 = vcombine.high %v8898_v49, %v8901_v0 }
 0x4f8   : > { %6725 = vrot.lane.b32.xlu0 %v6724_v41, %s6892_s7  ;;  %v5870_v17 = vrot.slane %v5856_v53, %v7035_v43  ;;  %v5922_v42 = vrot.slane %v5908_v47, %v7035_v43  ;;  %v5976_v44 = vcombine.high %v8930_v35, %v8933_v19  ;;  %v5992_v34 = vcombine.high %v8936_v28, %v8939_v54 }
 0x4f9   : > { %6705 = vrot.lane.b32.xlu1 %v6704_v29, %s6891_s6  ;;  %v6714_v20 = vpack.i.bf16 %v6008_v36, %v5940_v2  ;;  %v5805_v56 = vcombine.low %v5786_v15, %v5802_v1  ;;  %v5938_v30 = vrot.slane %v5924_v21, %v7035_v43  ;;  %v5806_v6 = vcombine.high %v5786_v15, %v5802_v1 }
 0x4fa   : > { %v5873_v49 = vcombine.low %v5854_v58, %v5870_v17  ;;  %v5990_v0 = vrot.slane %v5976_v44, %v7035_v43  ;;  %v6006_v55 = vrot.slane %v5992_v34, %v7035_v43  ;;  %v5874_v27 = vcombine.high %v5854_v58, %v5870_v17 }
 0x4fb   : > { %v5941_v14 = vcombine.low %v5922_v42, %v5938_v30  ;;  %v5942_v24 = vcombine.high %v5922_v42, %v5938_v30  ;;  %v5735_v35 = vcombine.low %v8983_v45, %v8986_v9  ;;  %v5667_v19 = vcombine.low %v8977_v25, %v8980_v48 }
 0x4fc   : > { %v6729_v28 = vpack.i.bf16 %v5873_v49, %v5805_v56  ;;  %v6009_v54 = vcombine.low %v5990_v0, %v6006_v55  ;;  %v6734_v59 = vpack.i.bf16 %v5874_v27, %v5806_v6  ;;  %v6010_v57 = vcombine.high %v5990_v0, %v6006_v55 }
 0x4fd   : > { %6715 = vrot.lane.b32.xlu1 %v6714_v20, %s6892_s7  ;;  %v5531_v52 = vcombine.low %v9013_v40, %v9018_v26  ;;  %v5599_v43 = vcombine.low %v9021_v7, %v9027_v18  ;;  %v5871_v45 = vcombine.low %v9049_v16, %v9053_v5  ;;  %v5803_v25 = vcombine.low %v9043_v23, %v9046_v22 }
 0x4fe   : > { %6730 = vrot.lane.b32.xlu0 %v6729_v28, %s6891_s6  ;;  %v6719_v12 = vpack.i.bf16 %v6009_v54, %v5941_v14  ;;  %v6739_v11 = vpack.i.bf16 %v6010_v57, %v5942_v24  ;;  %v5939_v48 = vcombine.low %v9070_v50, %v9073_v46  ;;  %v6007_v9 = vcombine.low %v9076_v32, %v9080_v39  ;;  %v6411_v50 = vld [vmem:[%s9184_s3] ss:$0 sm:$0xff] }
 0x501   : > { %6720 = vrot.lane.b32.xlu1 %v6719_v12, %s6891_s6 }
 0x502   : > { %6735 = vrot.lane.b32.xlu0 %v6734_v59, %s6893_s10 }
 0x505   : > { %6740 = vrot.lane.b32.xlu1 %v6739_v11, %s6893_s10 }
 0x55e   : > { %v6691_v40 = vpop.permute.xlu1 %6690 }
 0x55f   : > { %v6686_v26 = vpop.permute.xlu0 %6685  ;;  %v6693_v63 = vunpack.i.h.bf16 %v6691_v40  ;;  %v6692_v60 = vunpack.i.l.bf16 %v6691_v40 }
 0x560   : > { %v6688_v7 = vunpack.i.h.bf16 %v6686_v26  ;;  %v6687_v18 = vunpack.i.l.bf16 %v6686_v26 }
 0x562   : > { %v6110_v29 = vsel %vm3889_vm1, %v5735_v35, %v6688_v7  ;;  %v6109_v37 = vsel %vm3889_vm1, %v5667_v19, %v6687_v18  ;;  %v6696_v31 = vpop.permute.xlu1 %6695 }
 0x563   : > { %v6698_v23 = vunpack.i.h.bf16 %v6696_v31  ;;  %v6697_v22 = vunpack.i.l.bf16 %v6696_v31  ;;  %v6119_v16 = vsel %vm6115_vm3, %v6110_v29, %v6693_v63  ;;  %v6118_v5 = vsel %vm6115_vm3, %v6109_v37, %v6692_v60 }
 0x564   : > { %v6711_v10 = vpop.permute.xlu0 %6710 }
 0x565   : > { %v6127_v4 = vsel %vm6124_vm4, %v6118_v5, %v6697_v22  ;;  %v6128_v62 = vsel %vm6124_vm4, %v6119_v16, %v6698_v23  ;;  %v6713_v8 = vunpack.i.h.bf16 %v6711_v10  ;;  %v6712_v38 = vunpack.i.l.bf16 %v6711_v10 }
 0x566   : > { %v6134_v13 = vpack.c.bf16 %v6128_v62, %v6127_v4 }
 0x567   : > { %v6701_v51 = vpop.permute.xlu1 %6700 }
 0x568   : > { %v6703_v61 = vunpack.i.h.bf16 %v6701_v51  ;;  %v6702_v33 = vunpack.i.l.bf16 %v6701_v51 }
 0x56a   : > { %v6726_v3 = vpop.permute.xlu0 %6725  ;;  %v6108_v41 = vsel %vm3889_vm1, %v5599_v43, %v6703_v61  ;;  %v6107_v2 = vsel %vm3889_vm1, %v5531_v52, %v6702_v33 }
 0x56b   : > { %v6706_v32 = vpop.permute.xlu1 %6705  ;;  %v6728_v21 = vunpack.i.h.bf16 %v6726_v3  ;;  %v6727_v17 = vunpack.i.l.bf16 %v6726_v3 }
 0x56c   : > { %v6708_v39 = vunpack.i.h.bf16 %v6706_v32  ;;  %v6707_v15 = vunpack.i.l.bf16 %v6706_v32 }
 0x56d   : > { %v6112_v6 = vsel %vm3889_vm1, %v5871_v45, %v6728_v21  ;;  %v6111_v49 = vsel %vm3889_vm1, %v5803_v25, %v6727_v17 }
 0x56e   : > { %v6116_v53 = vsel %vm6115_vm3, %v6107_v2, %v6707_v15  ;;  %v6117_v47 = vsel %vm6115_vm3, %v6108_v41, %v6708_v39 }
 0x56f   : > { %v6716_v36 = vpop.permute.xlu1 %6715  ;;  %v6125_v1 = vsel %vm6124_vm4, %v6116_v53, %v6712_v38  ;;  %v6126_v58 = vsel %vm6124_vm4, %v6117_v47, %v6713_v8 }
 0x570   : > { %v6133_v42 = vpack.c.bf16 %v6126_v58, %v6125_v1  ;;  %v6731_v44 = vpop.permute.xlu0 %6730  ;;  %v6718_v56 = vunpack.i.h.bf16 %v6716_v36  ;;  %v6717_v0 = vunpack.i.l.bf16 %v6716_v36 }
 0x571   : > { %v6733_v34 = vunpack.i.h.bf16 %v6731_v44  ;;  %v6732_v20 = vunpack.i.l.bf16 %v6731_v44 }
 0x572   : > { %6642 = vmatprep.mubr.msk.bf16.mxu1 %vm227_vm0, %v6133_v42  ;;  %v6114_v54 = vsel %vm3889_vm1, %v6007_v9, %v6718_v56  ;;  %v6113_v43 = vsel %vm3889_vm1, %v5939_v48, %v6717_v0 }
 0x573   : > { %v6721_v30 = vpop.permute.xlu1 %6720  ;;  %6643 = vmatmul.mubr.msk.bf16.vlgmr.msra.gmra.mrb[32].mxu1 %vm227_vm0, %v6134_v13  ;;  %v6120_v19 = vsel %vm6115_vm3, %v6111_v49, %v6732_v20  ;;  %v6121_v28 = vsel %vm6115_vm3, %v6112_v6, %v6733_v34 }
 0x574   : > { %v6736_v55 = vpop.permute.xlu0 %6735  ;;  %v6723_v27 = vunpack.i.h.bf16 %v6721_v30  ;;  %v6722_v14 = vunpack.i.l.bf16 %v6721_v30 }
 0x575   : > { %v6738_v24 = vunpack.i.h.bf16 %v6736_v55  ;;  %v6737_v35 = vunpack.i.l.bf16 %v6736_v55 }
 0x576   : > { %v6122_v25 = vsel %vm6115_vm3, %v6113_v43, %v6722_v14  ;;  %v6123_v40 = vsel %vm6115_vm3, %v6114_v54, %v6723_v27 }
 0x577   : > { %v6129_v59 = vsel %vm6124_vm4, %v6120_v19, %v6737_v35  ;;  %v6130_v57 = vsel %vm6124_vm4, %v6121_v28, %v6738_v24  ;;  %v6741_v52 = vpop.permute.xlu1 %6740 }
 0x578   : > { %v6135_v12 = vpack.c.bf16 %v6130_v57, %v6129_v59  ;;  %v6743_v11 = vunpack.i.h.bf16 %v6741_v52  ;;  %v6742_v45 = vunpack.i.l.bf16 %v6741_v52 }
 0x57a   : > { %v6131_v9 = vsel %vm6124_vm4, %v6122_v25, %v6742_v45  ;;  %v6132_v26 = vsel %vm6124_vm4, %v6123_v40, %v6743_v11  ;;  %6646 = vmatprep.mubr.msk.bf16.mxu1 %vm227_vm0, %v6135_v12 }
 0x57b   : > { %v6136_v7 = vpack.c.bf16 %v6132_v26, %v6131_v9 }
 0x57d   : > { %6647 = vmatmul.mubr.msk.bf16.gmra.mrb[36].mxu1 %vm227_vm0, %v6136_v7 }
 0x646   : > { %v6644_v46 = vpop.f32.mrb[32].mxu1 }
 0x647   : > { %v6215_v48 = vadd.f32 %v6644_v46, %v6411_v50  ;;  %v6206_v18 = vpop.f32.mrb[33].mxu1 }
 0x648   : > { %v6207_v63 = vadd.f32 %v6411_v50, %v6206_v18  ;;  %v6645_v60 = vpop.f32.mrb[34].mxu1 }
 0x649   : > { %6239 = vst.msk [vmem:[%s197_s17 + $0x10] sm:$0xff] %vm227_vm0, %v6215_v48  ;;  %v6218_v29 = vadd.f32 %v6645_v60, %v6411_v50  ;;  %v6209_v37 = vpop.f32.mrb[35].mxu1 }
 0x64a   : > { %6237 = vst.msk [vmem:[%s197_s17] sm:$0xff] %vm227_vm0, %v6207_v63  ;;  %v6210_v31 = vadd.f32 %v6411_v50, %v6209_v37 }
 0x64b   : > { %6240 = vst.msk [vmem:[%s197_s17 + $0x18] sm:$0xff] %vm227_vm0, %v6218_v29 }
 0x64c   : > { %6238 = vst.msk [vmem:[%s197_s17 + $0x8] sm:$0xff] %vm227_vm0, %v6210_v31 }
 0x650   : > { %v6648_v23 = vpop.f32.mrb[36].mxu1 }
 0x651   : > { %v6231_v22 = vadd.f32 %v6648_v23, %v6411_v50  ;;  %v6222_v16 = vpop.f32.mrb[37].mxu1 }
 0x652   : > { %v6223_v5 = vadd.f32 %v6411_v50, %v6222_v16  ;;  %v6649_v4 = vpop.f32.mrb[38].mxu1 }
 0x653   : > { %6243 = vst.msk [vmem:[%s197_s17 + $0x30] sm:$0xff] %vm227_vm0, %v6231_v22  ;;  %v6234_v62 = vadd.f32 %v6649_v4, %v6411_v50  ;;  %v6225_v10 = vpop.f32.mrb[39].mxu1 }
 0x654   : > { %6241 = vst.msk [vmem:[%s197_s17 + $0x20] sm:$0xff] %vm227_vm0, %v6223_v5  ;;  %v6226_v13 = vadd.f32 %v6411_v50, %v6225_v10 }
 0x655   : > { %6244 = vst.msk [vmem:[%s197_s17 + $0x38] sm:$0xff] %vm227_vm0, %v6234_v62 }
 0x656   : > { %6242 = vst.msk [vmem:[%s197_s17 + $0x28] sm:$0xff] %vm227_vm0, %v6226_v13 }
 0x657 PF: > { %s14_s15 = sadd.s32 1, %s6882_s15  }
 0x658   : > { %p11_p4 = scmp.ge.s32.totalorder %s14_s15, 4  }
 0x65a   :  { %13 = sbr.rel (!%p11_p4) target bundleno = 1 (0x1), region = 66 }

</bundles_post_ra>
